<compile_context>
chip_gen: v6e
topology: v6e:2x2x1
jax: 0.10.0
libtpu: 0.0.40
codegen_flags: <defaults>
</compile_context>

<pallas_src>
import functools

import jax
import jax.numpy as jnp
import numpy as np
from jax import lax
from jax.experimental import pallas as pl
from jax.experimental.pallas import tpu as pltpu


# ----------------------------- Pallas kernel --------------------------------

def _cnnlstm_kernel(x_ref, wc_ref, bc_ref, wf_ref, bf_ref,
                    wih0_ref, whh0_ref, bl0_ref, wih1_ref, whh1_ref, bl1_ref,
                    wo_ref, bo_ref, out_ref, *, batch, seq):
    f32 = jnp.float32
    bf16 = jnp.bfloat16
    N, H, W = x_ref.shape                    # (B*S, n_channels, patch_len), W on lanes
    KH = 5                                   # composed (conv2 o conv1) kernel size
    H2 = H - (KH - 1)                        # conv output height (4)
    C2 = wc_ref.shape[1] // (W - (KH - 1))   # conv output channels (32)
    LH = whh0_ref.shape[0]                   # LSTM hidden size (64)

    x = x_ref[...]                           # f32

    # ---- CNN front end: ONE composed 5x5 conv via Toeplitz-in-W MXU matmuls.
    #      lhs[(n, h2), ph*W + w] = x[n, h2+ph, w]; the weight encodes the W-shift, so the
    #      matmul output columns are already (w2*C2 + c): lane-dense, channels-last. ----
    lhs = jnp.concatenate([x[:, ph:ph + H2, :] for ph in range(KH)], axis=-1)  # (N,H2,5W)
    wc = wc_ref[...]                                                           # (5W, 46*C2)
    o_rows = [jnp.dot(lhs[:, h2, :].astype(bf16), wc, preferred_element_type=f32)
              + bc_ref[...]
              for h2 in range(H2)]           # H2 x (N, (W-4)*C2)

    # ---- 2x2 max-pool, vectorized: W-pairs live C2 lanes apart, H-pairs are row slabs.
    #      Odd-w2 columns keep (finite) pair maxes; their fc1 rows are zero. ----
    q = [jnp.maximum(o[:, :-C2], o[:, C2:]) for o in o_rows]      # H2 x (N, (W-5)*C2)

    # ---- fc1: one K=(W-5)*C2 matmul per H-pooled slab (2 total) ----
    feat = bf_ref[...]
    for hp in range(H2 // 2):
        p_hp = jnp.maximum(q[2 * hp], q[2 * hp + 1]).astype(bf16)  # (N, (W-5)*C2)
        feat = feat + jnp.dot(p_hp, wf_ref[hp], preferred_element_type=f32)
    # feat: (N, hidden*2), rows ordered time-major (s*B + b)

    # ---- 2-layer LSTM, PyTorch gate order (i, f, g, o), gate-fused.
    #      i/f/o columns were pre-scaled by 0.5 at init -> one tanh gives all gates. ----
    def run_layer(inp, wih_ref, whh_ref, bl_ref, collect):
        # Hoisted input projection: ONE matmul for the whole sequence.
        xp = jnp.dot(inp.astype(bf16), wih_ref[...],
                     preferred_element_type=f32) + bl_ref[...]      # (S*B, 4*LH)
        whh = whh_ref[...]
        h = jnp.zeros((batch, LH), f32)
        c = jnp.zeros((batch, LH), f32)
        hs = []
        for t in range(seq):
            g = xp[t * batch:(t + 1) * batch] + jnp.dot(
                h.astype(bf16), whh, preferred_element_type=f32)    # (B, 4*LH)
            tg = jnp.tanh(g)                  # ONE EUP launch for all 4 gates
            gi = 0.5 * tg[:, 0 * LH:1 * LH] + 0.5
            gf = 0.5 * tg[:, 1 * LH:2 * LH] + 0.5
            gg = tg[:, 2 * LH:3 * LH]
            go = 0.5 * tg[:, 3 * LH:4 * LH] + 0.5
            c = gf * c + gi * gg
            h = go * jnp.tanh(c)
            if collect:
                hs.append(h)
        return h, hs

    _, hs0 = run_layer(feat, wih0_ref, whh0_ref, bl0_ref, collect=True)
    seq1 = jnp.concatenate(hs0, axis=0)       # (S*B, LH), time-major
    h_last, _ = run_layer(seq1, wih1_ref, whh1_ref, bl1_ref, collect=False)

    # ---- fc2 head ('detection'/'classification': last time step only) ----
    out_ref[...] = jnp.dot(h_last, wo_ref[...], preferred_element_type=f32) + bo_ref[...]


# ----------------------------- wrapper ---------------------------------------

def cnnlstm_forward(x, kp, p=None, y=None, task='classification'):
    # p, y are unused by the PyTorch forward for the logits; kept for signature parity.
    B, S, NCH, IND = x.shape
    N = B * S
    # Time-major sample ordering so each LSTM step reads a contiguous (B, feat) row block.
    x3 = jnp.transpose(x, (1, 0, 2, 3)).reshape(N, NCH, IND).astype(jnp.float32)
    n_classes = kp['wo_k'].shape[1]
    vmem = pltpu.MemorySpace.VMEM
    kernel = functools.partial(_cnnlstm_kernel, batch=B, seq=S)
    logits = pl.pallas_call(
        kernel,
        out_shape=jax.ShapeDtypeStruct((B, n_classes), jnp.float32),
        in_specs=[pl.BlockSpec(memory_space=vmem)] * 13,
        out_specs=pl.BlockSpec(memory_space=vmem),
    )(x3, kp['wc_k'], kp['bc_k'], kp['wf_k'], kp['bf_k'],
      kp['wih0_k'], kp['whh0_k'], kp['bl0_k'],
      kp['wih1_k'], kp['whh1_k'], kp['bl1_k'], kp['wo_k'], kp['bo_k'])
    if logits.shape[-1] == 1:                            # mirrors torch .squeeze(dim=-1)
        logits = logits[..., 0]
    return {'prob': logits}


# ----------------------------- parameters ------------------------------------

def init_params(key, *, n_channels=8, patch_len=50, hidden=32, n_classes=2):
    hid2 = hidden * 2
    lstm_h = 64
    C1 = C2 = 32
    Hp = (n_channels - 4) // 2
    Wp = (patch_len - 4) // 2            # 23 for patch_len=50, matching the module
    feat = C2 * Wp * Hp

    def u(k, shape, fan_in):
        bound = 1.0 / np.sqrt(fan_in)
        return jax.random.uniform(k, shape, jnp.float32, -bound, bound)

    ks = jax.random.split(key, 16)
    tp = dict(  # PyTorch-canonical parameter shapes (used by the pure-JAX reference)
        conv1_w=u(ks[0], (C1, 1, 3, 3), 9),         conv1_b=u(ks[1], (C1,), 9),
        conv2_w=u(ks[2], (C2, C1, 3, 3), C1 * 9),   conv2_b=u(ks[3], (C2,), C1 * 9),
        fc1_w=u(ks[4], (hid2, feat), feat),         fc1_b=u(ks[5], (hid2,), feat),
        w_ih_l0=u(ks[6], (4 * lstm_h, hid2), lstm_h),
        w_hh_l0=u(ks[7], (4 * lstm_h, lstm_h), lstm_h),
        b_ih_l0=u(ks[8], (4 * lstm_h,), lstm_h),
        b_hh_l0=u(ks[9], (4 * lstm_h,), lstm_h),
        w_ih_l1=u(ks[10], (4 * lstm_h, lstm_h), lstm_h),
        w_hh_l1=u(ks[11], (4 * lstm_h, lstm_h), lstm_h),
        b_ih_l1=u(ks[12], (4 * lstm_h,), lstm_h),
        b_hh_l1=u(ks[13], (4 * lstm_h,), lstm_h),
        fc2_w=u(ks[14], (n_classes, lstm_h), lstm_h),
        fc2_b=u(ks[15], (n_classes,), lstm_h),
    )

    # ---- compose conv2 o conv1 (no nonlinearity between them) into one 5x5 kernel ----
    W1, W2 = tp['conv1_w'], tp['conv2_w']
    weff = jnp.zeros((C2, 5, 5), jnp.float32)            # [d, ph, pw]
    for kh in range(3):
        for kw in range(3):
            contrib = jnp.einsum('dc,cij->dij', W2[:, :, kh, kw], W1[:, 0])
            weff = weff.at[:, kh:kh + 3, kw:kw + 3].add(contrib)
    beff = tp['conv2_b'] + jnp.einsum('dckl,c->d', W2, tp['conv1_b'])

    # ---- Toeplitz-in-W conv weight: wc[ph*W + w, w2*C2 + d] = weff[d, ph, w-w2] ----
    W = patch_len
    W2o = W - 4                                          # conv output width (46)
    wc4 = jnp.zeros((5, W, W2o, C2), jnp.float32)
    w2_idx = jnp.arange(W2o)
    for pw in range(5):
        vals = jnp.broadcast_to(weff[:, :, pw].T[:, None, :], (5, W2o, C2))
        wc4 = wc4.at[:, w2_idx + pw, w2_idx, :].set(vals)
    wc_k = wc4.reshape(5 * W, W2o * C2).astype(jnp.bfloat16)
    bc_k = jnp.tile(beff, W2o).reshape(1, W2o * C2)      # f32

    # ---- fc1 on the un-compacted pooled slab (columns w2*C2 + d, w2 in [0, W2o-1));
    #      valid pooled values sit at even w2 = 2*wp; odd-w2 rows are zero.  PyTorch
    #      flattens the pooled NCHW tensor as c*(Hp*Wp) + hp*Wp + wp. ----
    Wq = (W2o - 1) * C2                                  # 1440
    wf_full = tp['fc1_w']                                # (hid2, feat)
    wfk = jnp.zeros((Hp, Wq, hid2), jnp.float32)
    for hp in range(Hp):
        for wp in range(Wp):
            rows = 2 * wp * C2 + jnp.arange(C2)
            cols = jnp.arange(C2) * (Hp * Wp) + hp * Wp + wp
            wfk = wfk.at[hp, rows, :].set(wf_full[:, cols].T)
    wf_k = wfk.astype(jnp.bfloat16)
    bf_k = tp['fc1_b'].reshape(1, hid2)

    # ---- LSTM: gate-concatenated (i,f,g,o) weights with the sigmoid 0.5 pre-scale
    #      folded into the i/f/o columns; combined ih+hh biases. ----
    gscale = jnp.concatenate([jnp.full((lstm_h,), 0.5), jnp.full((lstm_h,), 0.5),
                              jnp.ones((lstm_h,)), jnp.full((lstm_h,), 0.5)])

    def lstm_cat(w_ih, w_hh, b_ih, b_hh):
        wih = (w_ih.T * gscale[None, :]).astype(jnp.bfloat16)    # (in, 4H)
        whh = (w_hh.T * gscale[None, :]).astype(jnp.bfloat16)    # (H, 4H)
        b = ((b_ih + b_hh) * gscale).reshape(1, 4 * lstm_h)      # f32
        return wih, whh, b

    wih0_k, whh0_k, bl0_k = lstm_cat(tp['w_ih_l0'], tp['w_hh_l0'],
                                     tp['b_ih_l0'], tp['b_hh_l0'])
    wih1_k, whh1_k, bl1_k = lstm_cat(tp['w_ih_l1'], tp['w_hh_l1'],
                                     tp['b_ih_l1'], tp['b_hh_l1'])

    kp = dict(wc_k=wc_k, bc_k=bc_k, wf_k=wf_k, bf_k=bf_k,
              wih0_k=wih0_k, whh0_k=whh0_k, bl0_k=bl0_k,
              wih1_k=wih1_k, whh1_k=whh1_k, bl1_k=bl1_k,
              wo_k=tp['fc2_w'].T, bo_k=tp['fc2_b'].reshape(1, n_classes))
    return tp, kp


# ----------------------------- pure-JAX reference ----------------------------

def reference_forward(x, tp):
    B, S, NCH, IND = x.shape
    xi = x.reshape(B * S, 1, NCH, IND)
    dn = ('NCHW', 'OIHW', 'NCHW')
    o = lax.conv_general_dilated(xi, tp['conv1_w'], (1, 1), 'VALID', dimension_numbers=dn)
    o = o + tp['conv1_b'][None, :, None, None]
    o = lax.conv_general_dilated(o, tp['conv2_w'], (1, 1), 'VALID', dimension_numbers=dn)
    o = o + tp['conv2_b'][None, :, None, None]
    o = lax.reduce_window(o, -jnp.inf, lax.max, (1, 1, 2, 2), (1, 1, 2, 2), 'VALID')
    flat = o.reshape(B * S, -1)
    f1 = flat @ tp['fc1_w'].T + tp['fc1_b']
    seq = f1.reshape(B, S, -1)

    def sigmoid(z):
        return 1.0 / (1.0 + jnp.exp(-z))

    def lstm_layer(inp, wih, whh, bih, bhh):
        Bb, Ss, _ = inp.shape
        Hh = whh.shape[1]
        h = jnp.zeros((Bb, Hh)); c = jnp.zeros((Bb, Hh))
        outs = []
        for t in range(Ss):
            g = inp[:, t, :] @ wih.T + bih + h @ whh.T + bhh
            i = sigmoid(g[:, :Hh]); f = sigmoid(g[:, Hh:2 * Hh])
            gg = jnp.tanh(g[:, 2 * Hh:3 * Hh]); oo = sigmoid(g[:, 3 * Hh:])
            c = f * c + i * gg
            h = oo * jnp.tanh(c)
            outs.append(h)
        return jnp.stack(outs, axis=1)

    s1 = lstm_layer(seq, tp['w_ih_l0'], tp['w_hh_l0'], tp['b_ih_l0'], tp['b_hh_l0'])
    s2 = lstm_layer(s1, tp['w_ih_l1'], tp['w_hh_l1'], tp['b_ih_l1'], tp['b_hh_l1'])
    last = s2[:, -1, :]
    logits = last @ tp['fc2_w'].T + tp['fc2_b']
    if logits.shape[-1] == 1:
        logits = logits[..., 0]
    return logits


# ----------------------------- main -------------------------------------------

if __name__ == "__main__":
    key = jax.random.PRNGKey(0)
    kx, kparam = jax.random.split(key)

    # window=200, patch_len=50 -> seq_len=4; n_channels=8; hidden=32; n_classes=2
    B, SEQ, NCH, IND = 2, 4, 8, 50
    HIDDEN, NCLS = 32, 2

    x = jax.random.normal(kx, (B, SEQ, NCH, IND), jnp.float32)
    torch_p, kernel_p = init_params(kparam, n_channels=NCH, patch_len=IND,
                                    hidden=HIDDEN, n_classes=NCLS)

    out = cnnlstm_forward(x, kernel_p, p=None, y=None, task='classification')
    logits = jax.block_until_ready(out['prob'])

    ref = np.asarray(reference_forward(x, torch_p))
    np.testing.assert_allclose(np.asarray(logits), ref, rtol=2e-2, atol=2e-2)

    print("KERNEL_OK")
</pallas_src>

<mosaic_0001>
module attributes {stable_mosaic.version = 11 : i64} {
  func.func @_cnnlstm_kernel(%arg0: memref<8x8x50xf32, #tpu.memory_space<vmem>>, %arg1: memref<250x1472xbf16, #tpu.memory_space<vmem>>, %arg2: memref<1x1472xf32, #tpu.memory_space<vmem>>, %arg3: memref<2x1440x64xbf16, #tpu.memory_space<vmem>>, %arg4: memref<1x64xf32, #tpu.memory_space<vmem>>, %arg5: memref<64x256xbf16, #tpu.memory_space<vmem>>, %arg6: memref<64x256xbf16, #tpu.memory_space<vmem>>, %arg7: memref<1x256xf32, #tpu.memory_space<vmem>>, %arg8: memref<64x256xbf16, #tpu.memory_space<vmem>>, %arg9: memref<64x256xbf16, #tpu.memory_space<vmem>>, %arg10: memref<1x256xf32, #tpu.memory_space<vmem>>, %arg11: memref<64x2xf32, #tpu.memory_space<vmem>>, %arg12: memref<1x2xf32, #tpu.memory_space<vmem>>, %arg13: memref<2x2xf32, #tpu.memory_space<vmem>>) attributes {dimension_semantics = [], scalar_prefetch = 0 : i64, scratch_operands = 0 : i64, tpu.core_type = #tpu.core_type<tc>} {
    %c0 = arith.constant 0 : index
    %c0_0 = arith.constant 0 : index
    %c0_1 = arith.constant 0 : index
    %0 = vector.load %arg0[%c0, %c0_0, %c0_1] : memref<8x8x50xf32, #tpu.memory_space<vmem>>, vector<8x8x50xf32>
    %1 = vector.extract_strided_slice %0 {offsets = [0, 0, 0], sizes = [8, 4, 50], strides = [1, 1, 1]} : vector<8x8x50xf32> to vector<8x4x50xf32>
    %2 = vector.extract_strided_slice %0 {offsets = [0, 1, 0], sizes = [8, 4, 50], strides = [1, 1, 1]} : vector<8x8x50xf32> to vector<8x4x50xf32>
    %3 = vector.extract_strided_slice %0 {offsets = [0, 2, 0], sizes = [8, 4, 50], strides = [1, 1, 1]} : vector<8x8x50xf32> to vector<8x4x50xf32>
    %4 = vector.extract_strided_slice %0 {offsets = [0, 3, 0], sizes = [8, 4, 50], strides = [1, 1, 1]} : vector<8x8x50xf32> to vector<8x4x50xf32>
    %5 = vector.extract_strided_slice %0 {offsets = [0, 4, 0], sizes = [8, 4, 50], strides = [1, 1, 1]} : vector<8x8x50xf32> to vector<8x4x50xf32>
    %6 = tpu.concatenate %1, %2, %3, %4, %5 in 2 : vector<8x4x50xf32>, vector<8x4x50xf32>, vector<8x4x50xf32>, vector<8x4x50xf32>, vector<8x4x50xf32> -> vector<8x4x250xf32>
    %c0_2 = arith.constant 0 : index
    %c0_3 = arith.constant 0 : index
    %7 = vector.load %arg1[%c0_2, %c0_3] : memref<250x1472xbf16, #tpu.memory_space<vmem>>, vector<250x1472xbf16>
    %8 = vector.extract_strided_slice %6 {offsets = [0, 0, 0], sizes = [8, 1, 250], strides = [1, 1, 1]} : vector<8x4x250xf32> to vector<8x1x250xf32>
    %9 = vector.shape_cast %8 : vector<8x1x250xf32> to vector<8x250xf32>
    %10 = arith.truncf %9 : vector<8x250xf32> to vector<8x250xbf16>
    %cst = arith.constant dense<0.000000e+00> : vector<8x1472xf32>
    %11 = tpu.matmul %10, %7, %cst {dimension_numbers = #tpu.dot_dimension_numbers<[1], [0], [0], [1], [0, 0, 1, 1], [], []>} : vector<8x250xbf16>, vector<250x1472xbf16>, vector<8x1472xf32> -> vector<8x1472xf32>
    %c0_4 = arith.constant 0 : index
    %c0_5 = arith.constant 0 : index
    %12 = vector.load %arg2[%c0_4, %c0_5] : memref<1x1472xf32, #tpu.memory_space<vmem>>, vector<1x1472xf32>
    %13 = vector.broadcast %12 : vector<1x1472xf32> to vector<8x1472xf32>
    %14 = arith.addf %11, %13 : vector<8x1472xf32>
    %15 = vector.extract_strided_slice %6 {offsets = [0, 1, 0], sizes = [8, 1, 250], strides = [1, 1, 1]} : vector<8x4x250xf32> to vector<8x1x250xf32>
    %16 = vector.shape_cast %15 : vector<8x1x250xf32> to vector<8x250xf32>
    %17 = arith.truncf %16 : vector<8x250xf32> to vector<8x250xbf16>
    %cst_6 = arith.constant dense<0.000000e+00> : vector<8x1472xf32>
    %18 = tpu.matmul %17, %7, %cst_6 {dimension_numbers = #tpu.dot_dimension_numbers<[1], [0], [0], [1], [0, 0, 1, 1], [], []>} : vector<8x250xbf16>, vector<250x1472xbf16>, vector<8x1472xf32> -> vector<8x1472xf32>
    %c0_7 = arith.constant 0 : index
    %c0_8 = arith.constant 0 : index
    %19 = vector.load %arg2[%c0_7, %c0_8] : memref<1x1472xf32, #tpu.memory_space<vmem>>, vector<1x1472xf32>
    %20 = vector.broadcast %19 : vector<1x1472xf32> to vector<8x1472xf32>
    %21 = arith.addf %18, %20 : vector<8x1472xf32>
    %22 = vector.extract_strided_slice %6 {offsets = [0, 2, 0], sizes = [8, 1, 250], strides = [1, 1, 1]} : vector<8x4x250xf32> to vector<8x1x250xf32>
    %23 = vector.shape_cast %22 : vector<8x1x250xf32> to vector<8x250xf32>
    %24 = arith.truncf %23 : vector<8x250xf32> to vector<8x250xbf16>
    %cst_9 = arith.constant dense<0.000000e+00> : vector<8x1472xf32>
    %25 = tpu.matmul %24, %7, %cst_9 {dimension_numbers = #tpu.dot_dimension_numbers<[1], [0], [0], [1], [0, 0, 1, 1], [], []>} : vector<8x250xbf16>, vector<250x1472xbf16>, vector<8x1472xf32> -> vector<8x1472xf32>
    %c0_10 = arith.constant 0 : index
    %c0_11 = arith.constant 0 : index
    %26 = vector.load %arg2[%c0_10, %c0_11] : memref<1x1472xf32, #tpu.memory_space<vmem>>, vector<1x1472xf32>
    %27 = vector.broadcast %26 : vector<1x1472xf32> to vector<8x1472xf32>
    %28 = arith.addf %25, %27 : vector<8x1472xf32>
    %29 = vector.extract_strided_slice %6 {offsets = [0, 3, 0], sizes = [8, 1, 250], strides = [1, 1, 1]} : vector<8x4x250xf32> to vector<8x1x250xf32>
    %30 = vector.shape_cast %29 : vector<8x1x250xf32> to vector<8x250xf32>
    %31 = arith.truncf %30 : vector<8x250xf32> to vector<8x250xbf16>
    %cst_12 = arith.constant dense<0.000000e+00> : vector<8x1472xf32>
    %32 = tpu.matmul %31, %7, %cst_12 {dimension_numbers = #tpu.dot_dimension_numbers<[1], [0], [0], [1], [0, 0, 1, 1], [], []>} : vector<8x250xbf16>, vector<250x1472xbf16>, vector<8x1472xf32> -> vector<8x1472xf32>
    %c0_13 = arith.constant 0 : index
    %c0_14 = arith.constant 0 : index
    %33 = vector.load %arg2[%c0_13, %c0_14] : memref<1x1472xf32, #tpu.memory_space<vmem>>, vector<1x1472xf32>
    %34 = vector.broadcast %33 : vector<1x1472xf32> to vector<8x1472xf32>
    %35 = arith.addf %32, %34 : vector<8x1472xf32>
    %36 = vector.extract_strided_slice %14 {offsets = [0, 0], sizes = [8, 1440], strides = [1, 1]} : vector<8x1472xf32> to vector<8x1440xf32>
    %37 = vector.extract_strided_slice %14 {offsets = [0, 32], sizes = [8, 1440], strides = [1, 1]} : vector<8x1472xf32> to vector<8x1440xf32>
    %38 = arith.maximumf %36, %37 : vector<8x1440xf32>
    %39 = vector.extract_strided_slice %21 {offsets = [0, 0], sizes = [8, 1440], strides = [1, 1]} : vector<8x1472xf32> to vector<8x1440xf32>
    %40 = vector.extract_strided_slice %21 {offsets = [0, 32], sizes = [8, 1440], strides = [1, 1]} : vector<8x1472xf32> to vector<8x1440xf32>
    %41 = arith.maximumf %39, %40 : vector<8x1440xf32>
    %42 = vector.extract_strided_slice %28 {offsets = [0, 0], sizes = [8, 1440], strides = [1, 1]} : vector<8x1472xf32> to vector<8x1440xf32>
    %43 = vector.extract_strided_slice %28 {offsets = [0, 32], sizes = [8, 1440], strides = [1, 1]} : vector<8x1472xf32> to vector<8x1440xf32>
    %44 = arith.maximumf %42, %43 : vector<8x1440xf32>
    %45 = vector.extract_strided_slice %35 {offsets = [0, 0], sizes = [8, 1440], strides = [1, 1]} : vector<8x1472xf32> to vector<8x1440xf32>
    %46 = vector.extract_strided_slice %35 {offsets = [0, 32], sizes = [8, 1440], strides = [1, 1]} : vector<8x1472xf32> to vector<8x1440xf32>
    %47 = arith.maximumf %45, %46 : vector<8x1440xf32>
    %c0_15 = arith.constant 0 : index
    %c0_16 = arith.constant 0 : index
    %48 = vector.load %arg4[%c0_15, %c0_16] : memref<1x64xf32, #tpu.memory_space<vmem>>, vector<1x64xf32>
    %49 = arith.maximumf %38, %41 : vector<8x1440xf32>
    %50 = arith.truncf %49 : vector<8x1440xf32> to vector<8x1440xbf16>
    %c0_17 = arith.constant 0 : index
    %c0_18 = arith.constant 0 : index
    %c0_19 = arith.constant 0 : index
    %51 = vector.load %arg3[%c0_17, %c0_18, %c0_19] : memref<2x1440x64xbf16, #tpu.memory_space<vmem>>, vector<1x1440x64xbf16>
    %52 = vector.shape_cast %51 : vector<1x1440x64xbf16> to vector<1440x64xbf16>
    %cst_20 = arith.constant dense<0.000000e+00> : vector<8x64xf32>
    %53 = tpu.matmul %50, %52, %cst_20 {dimension_numbers = #tpu.dot_dimension_numbers<[1], [0], [0], [1], [0, 0, 1, 1], [], []>} : vector<8x1440xbf16>, vector<1440x64xbf16>, vector<8x64xf32> -> vector<8x64xf32>
    %54 = vector.broadcast %48 : vector<1x64xf32> to vector<8x64xf32>
    %55 = arith.addf %54, %53 : vector<8x64xf32>
    %56 = arith.maximumf %44, %47 : vector<8x1440xf32>
    %57 = arith.truncf %56 : vector<8x1440xf32> to vector<8x1440xbf16>
    %c1 = arith.constant 1 : index
    %c0_21 = arith.constant 0 : index
    %c0_22 = arith.constant 0 : index
    %58 = vector.load %arg3[%c1, %c0_21, %c0_22] : memref<2x1440x64xbf16, #tpu.memory_space<vmem>>, vector<1x1440x64xbf16>
    %59 = vector.shape_cast %58 : vector<1x1440x64xbf16> to vector<1440x64xbf16>
    %cst_23 = arith.constant dense<0.000000e+00> : vector<8x64xf32>
    %60 = tpu.matmul %57, %59, %cst_23 {dimension_numbers = #tpu.dot_dimension_numbers<[1], [0], [0], [1], [0, 0, 1, 1], [], []>} : vector<8x1440xbf16>, vector<1440x64xbf16>, vector<8x64xf32> -> vector<8x64xf32>
    %61 = arith.addf %55, %60 : vector<8x64xf32>
    %62 = arith.truncf %61 : vector<8x64xf32> to vector<8x64xbf16>
    %c0_24 = arith.constant 0 : index
    %c0_25 = arith.constant 0 : index
    %63 = vector.load %arg5[%c0_24, %c0_25] : memref<64x256xbf16, #tpu.memory_space<vmem>>, vector<64x256xbf16>
    %cst_26 = arith.constant dense<0.000000e+00> : vector<8x256xf32>
    %64 = tpu.matmul %62, %63, %cst_26 {dimension_numbers = #tpu.dot_dimension_numbers<[1], [0], [0], [1], [0, 0, 1, 1], [], []>} : vector<8x64xbf16>, vector<64x256xbf16>, vector<8x256xf32> -> vector<8x256xf32>
    %c0_27 = arith.constant 0 : index
    %c0_28 = arith.constant 0 : index
    %65 = vector.load %arg7[%c0_27, %c0_28] : memref<1x256xf32, #tpu.memory_space<vmem>>, vector<1x256xf32>
    %66 = vector.broadcast %65 : vector<1x256xf32> to vector<8x256xf32>
    %67 = arith.addf %64, %66 : vector<8x256xf32>
    %c0_29 = arith.constant 0 : index
    %c0_30 = arith.constant 0 : index
    %68 = vector.load %arg6[%c0_29, %c0_30] : memref<64x256xbf16, #tpu.memory_space<vmem>>, vector<64x256xbf16>
    %cst_31 = arith.constant 0.000000e+00 : f32
    %69 = vector.broadcast %cst_31 : f32 to vector<2x64xf32>
    %cst_32 = arith.constant 0.000000e+00 : f32
    %70 = vector.broadcast %cst_32 : f32 to vector<2x64xf32>
    %71 = vector.extract_strided_slice %67 {offsets = [0, 0], sizes = [2, 256], strides = [1, 1]} : vector<8x256xf32> to vector<2x256xf32>
    %72 = arith.truncf %69 : vector<2x64xf32> to vector<2x64xbf16>
    %cst_33 = arith.constant dense<0.000000e+00> : vector<2x256xf32>
    %73 = tpu.matmul %72, %68, %cst_33 {dimension_numbers = #tpu.dot_dimension_numbers<[1], [0], [0], [1], [0, 0, 1, 1], [], []>} : vector<2x64xbf16>, vector<64x256xbf16>, vector<2x256xf32> -> vector<2x256xf32>
    %74 = arith.addf %71, %73 : vector<2x256xf32>
    %75 = math.tanh %74 : vector<2x256xf32>
    %76 = vector.extract_strided_slice %75 {offsets = [0, 0], sizes = [2, 64], strides = [1, 1]} : vector<2x256xf32> to vector<2x64xf32>
    %cst_34 = arith.constant 5.000000e-01 : f32
    %77 = vector.broadcast %cst_34 : f32 to vector<2x64xf32>
    %78 = arith.mulf %77, %76 : vector<2x64xf32>
    %cst_35 = arith.constant 5.000000e-01 : f32
    %79 = vector.broadcast %cst_35 : f32 to vector<2x64xf32>
    %80 = arith.addf %78, %79 : vector<2x64xf32>
    %81 = vector.extract_strided_slice %75 {offsets = [0, 64], sizes = [2, 64], strides = [1, 1]} : vector<2x256xf32> to vector<2x64xf32>
    %cst_36 = arith.constant 5.000000e-01 : f32
    %82 = vector.broadcast %cst_36 : f32 to vector<2x64xf32>
    %83 = arith.mulf %82, %81 : vector<2x64xf32>
    %cst_37 = arith.constant 5.000000e-01 : f32
    %84 = vector.broadcast %cst_37 : f32 to vector<2x64xf32>
    %85 = arith.addf %83, %84 : vector<2x64xf32>
    %86 = vector.extract_strided_slice %75 {offsets = [0, 128], sizes = [2, 64], strides = [1, 1]} : vector<2x256xf32> to vector<2x64xf32>
    %87 = vector.extract_strided_slice %75 {offsets = [0, 192], sizes = [2, 64], strides = [1, 1]} : vector<2x256xf32> to vector<2x64xf32>
    %cst_38 = arith.constant 5.000000e-01 : f32
    %88 = vector.broadcast %cst_38 : f32 to vector<2x64xf32>
    %89 = arith.mulf %88, %87 : vector<2x64xf32>
    %cst_39 = arith.constant 5.000000e-01 : f32
    %90 = vector.broadcast %cst_39 : f32 to vector<2x64xf32>
    %91 = arith.addf %89, %90 : vector<2x64xf32>
    %92 = arith.mulf %85, %70 : vector<2x64xf32>
    %93 = arith.mulf %80, %86 : vector<2x64xf32>
    %94 = arith.addf %92, %93 : vector<2x64xf32>
    %95 = math.tanh %94 : vector<2x64xf32>
    %96 = arith.mulf %91, %95 : vector<2x64xf32>
    %97 = vector.extract_strided_slice %67 {offsets = [2, 0], sizes = [2, 256], strides = [1, 1]} : vector<8x256xf32> to vector<2x256xf32>
    %98 = arith.truncf %96 : vector<2x64xf32> to vector<2x64xbf16>
    %cst_40 = arith.constant dense<0.000000e+00> : vector<2x256xf32>
    %99 = tpu.matmul %98, %68, %cst_40 {dimension_numbers = #tpu.dot_dimension_numbers<[1], [0], [0], [1], [0, 0, 1, 1], [], []>} : vector<2x64xbf16>, vector<64x256xbf16>, vector<2x256xf32> -> vector<2x256xf32>
    %100 = arith.addf %97, %99 : vector<2x256xf32>
    %101 = math.tanh %100 : vector<2x256xf32>
    %102 = vector.extract_strided_slice %101 {offsets = [0, 0], sizes = [2, 64], strides = [1, 1]} : vector<2x256xf32> to vector<2x64xf32>
    %cst_41 = arith.constant 5.000000e-01 : f32
    %103 = vector.broadcast %cst_41 : f32 to vector<2x64xf32>
    %104 = arith.mulf %103, %102 : vector<2x64xf32>
    %cst_42 = arith.constant 5.000000e-01 : f32
    %105 = vector.broadcast %cst_42 : f32 to vector<2x64xf32>
    %106 = arith.addf %104, %105 : vector<2x64xf32>
    %107 = vector.extract_strided_slice %101 {offsets = [0, 64], sizes = [2, 64], strides = [1, 1]} : vector<2x256xf32> to vector<2x64xf32>
    %cst_43 = arith.constant 5.000000e-01 : f32
    %108 = vector.broadcast %cst_43 : f32 to vector<2x64xf32>
    %109 = arith.mulf %108, %107 : vector<2x64xf32>
    %cst_44 = arith.constant 5.000000e-01 : f32
    %110 = vector.broadcast %cst_44 : f32 to vector<2x64xf32>
    %111 = arith.addf %109, %110 : vector<2x64xf32>
    %112 = vector.extract_strided_slice %101 {offsets = [0, 128], sizes = [2, 64], strides = [1, 1]} : vector<2x256xf32> to vector<2x64xf32>
    %113 = vector.extract_strided_slice %101 {offsets = [0, 192], sizes = [2, 64], strides = [1, 1]} : vector<2x256xf32> to vector<2x64xf32>
    %cst_45 = arith.constant 5.000000e-01 : f32
    %114 = vector.broadcast %cst_45 : f32 to vector<2x64xf32>
    %115 = arith.mulf %114, %113 : vector<2x64xf32>
    %cst_46 = arith.constant 5.000000e-01 : f32
    %116 = vector.broadcast %cst_46 : f32 to vector<2x64xf32>
    %117 = arith.addf %115, %116 : vector<2x64xf32>
    %118 = arith.mulf %111, %94 : vector<2x64xf32>
    %119 = arith.mulf %106, %112 : vector<2x64xf32>
    %120 = arith.addf %118, %119 : vector<2x64xf32>
    %121 = math.tanh %120 : vector<2x64xf32>
    %122 = arith.mulf %117, %121 : vector<2x64xf32>
    %123 = vector.extract_strided_slice %67 {offsets = [4, 0], sizes = [2, 256], strides = [1, 1]} : vector<8x256xf32> to vector<2x256xf32>
    %124 = arith.truncf %122 : vector<2x64xf32> to vector<2x64xbf16>
    %cst_47 = arith.constant dense<0.000000e+00> : vector<2x256xf32>
    %125 = tpu.matmul %124, %68, %cst_47 {dimension_numbers = #tpu.dot_dimension_numbers<[1], [0], [0], [1], [0, 0, 1, 1], [], []>} : vector<2x64xbf16>, vector<64x256xbf16>, vector<2x256xf32> -> vector<2x256xf32>
    %126 = arith.addf %123, %125 : vector<2x256xf32>
    %127 = math.tanh %126 : vector<2x256xf32>
    %128 = vector.extract_strided_slice %127 {offsets = [0, 0], sizes = [2, 64], strides = [1, 1]} : vector<2x256xf32> to vector<2x64xf32>
    %cst_48 = arith.constant 5.000000e-01 : f32
    %129 = vector.broadcast %cst_48 : f32 to vector<2x64xf32>
    %130 = arith.mulf %129, %128 : vector<2x64xf32>
    %cst_49 = arith.constant 5.000000e-01 : f32
    %131 = vector.broadcast %cst_49 : f32 to vector<2x64xf32>
    %132 = arith.addf %130, %131 : vector<2x64xf32>
    %133 = vector.extract_strided_slice %127 {offsets = [0, 64], sizes = [2, 64], strides = [1, 1]} : vector<2x256xf32> to vector<2x64xf32>
    %cst_50 = arith.constant 5.000000e-01 : f32
    %134 = vector.broadcast %cst_50 : f32 to vector<2x64xf32>
    %135 = arith.mulf %134, %133 : vector<2x64xf32>
    %cst_51 = arith.constant 5.000000e-01 : f32
    %136 = vector.broadcast %cst_51 : f32 to vector<2x64xf32>
    %137 = arith.addf %135, %136 : vector<2x64xf32>
    %138 = vector.extract_strided_slice %127 {offsets = [0, 128], sizes = [2, 64], strides = [1, 1]} : vector<2x256xf32> to vector<2x64xf32>
    %139 = vector.extract_strided_slice %127 {offsets = [0, 192], sizes = [2, 64], strides = [1, 1]} : vector<2x256xf32> to vector<2x64xf32>
    %cst_52 = arith.constant 5.000000e-01 : f32
    %140 = vector.broadcast %cst_52 : f32 to vector<2x64xf32>
    %141 = arith.mulf %140, %139 : vector<2x64xf32>
    %cst_53 = arith.constant 5.000000e-01 : f32
    %142 = vector.broadcast %cst_53 : f32 to vector<2x64xf32>
    %143 = arith.addf %141, %142 : vector<2x64xf32>
    %144 = arith.mulf %137, %120 : vector<2x64xf32>
    %145 = arith.mulf %132, %138 : vector<2x64xf32>
    %146 = arith.addf %144, %145 : vector<2x64xf32>
    %147 = math.tanh %146 : vector<2x64xf32>
    %148 = arith.mulf %143, %147 : vector<2x64xf32>
    %149 = vector.extract_strided_slice %67 {offsets = [6, 0], sizes = [2, 256], strides = [1, 1]} : vector<8x256xf32> to vector<2x256xf32>
    %150 = arith.truncf %148 : vector<2x64xf32> to vector<2x64xbf16>
    %cst_54 = arith.constant dense<0.000000e+00> : vector<2x256xf32>
    %151 = tpu.matmul %150, %68, %cst_54 {dimension_numbers = #tpu.dot_dimension_numbers<[1], [0], [0], [1], [0, 0, 1, 1], [], []>} : vector<2x64xbf16>, vector<64x256xbf16>, vector<2x256xf32> -> vector<2x256xf32>
    %152 = arith.addf %149, %151 : vector<2x256xf32>
    %153 = math.tanh %152 : vector<2x256xf32>
    %154 = vector.extract_strided_slice %153 {offsets = [0, 0], sizes = [2, 64], strides = [1, 1]} : vector<2x256xf32> to vector<2x64xf32>
    %cst_55 = arith.constant 5.000000e-01 : f32
    %155 = vector.broadcast %cst_55 : f32 to vector<2x64xf32>
    %156 = arith.mulf %155, %154 : vector<2x64xf32>
    %cst_56 = arith.constant 5.000000e-01 : f32
    %157 = vector.broadcast %cst_56 : f32 to vector<2x64xf32>
    %158 = arith.addf %156, %157 : vector<2x64xf32>
    %159 = vector.extract_strided_slice %153 {offsets = [0, 64], sizes = [2, 64], strides = [1, 1]} : vector<2x256xf32> to vector<2x64xf32>
    %cst_57 = arith.constant 5.000000e-01 : f32
    %160 = vector.broadcast %cst_57 : f32 to vector<2x64xf32>
    %161 = arith.mulf %160, %159 : vector<2x64xf32>
    %cst_58 = arith.constant 5.000000e-01 : f32
    %162 = vector.broadcast %cst_58 : f32 to vector<2x64xf32>
    %163 = arith.addf %161, %162 : vector<2x64xf32>
    %164 = vector.extract_strided_slice %153 {offsets = [0, 128], sizes = [2, 64], strides = [1, 1]} : vector<2x256xf32> to vector<2x64xf32>
    %165 = vector.extract_strided_slice %153 {offsets = [0, 192], sizes = [2, 64], strides = [1, 1]} : vector<2x256xf32> to vector<2x64xf32>
    %cst_59 = arith.constant 5.000000e-01 : f32
    %166 = vector.broadcast %cst_59 : f32 to vector<2x64xf32>
    %167 = arith.mulf %166, %165 : vector<2x64xf32>
    %cst_60 = arith.constant 5.000000e-01 : f32
    %168 = vector.broadcast %cst_60 : f32 to vector<2x64xf32>
    %169 = arith.addf %167, %168 : vector<2x64xf32>
    %170 = arith.mulf %163, %146 : vector<2x64xf32>
    %171 = arith.mulf %158, %164 : vector<2x64xf32>
    %172 = arith.addf %170, %171 : vector<2x64xf32>
    %173 = math.tanh %172 : vector<2x64xf32>
    %174 = arith.mulf %169, %173 : vector<2x64xf32>
    %175 = tpu.concatenate %96, %122, %148, %174 in 0 : vector<2x64xf32>, vector<2x64xf32>, vector<2x64xf32>, vector<2x64xf32> -> vector<8x64xf32>
    %176 = arith.truncf %175 : vector<8x64xf32> to vector<8x64xbf16>
    %c0_61 = arith.constant 0 : index
    %c0_62 = arith.constant 0 : index
    %177 = vector.load %arg8[%c0_61, %c0_62] : memref<64x256xbf16, #tpu.memory_space<vmem>>, vector<64x256xbf16>
    %cst_63 = arith.constant dense<0.000000e+00> : vector<8x256xf32>
    %178 = tpu.matmul %176, %177, %cst_63 {dimension_numbers = #tpu.dot_dimension_numbers<[1], [0], [0], [1], [0, 0, 1, 1], [], []>} : vector<8x64xbf16>, vector<64x256xbf16>, vector<8x256xf32> -> vector<8x256xf32>
    %c0_64 = arith.constant 0 : index
    %c0_65 = arith.constant 0 : index
    %179 = vector.load %arg10[%c0_64, %c0_65] : memref<1x256xf32, #tpu.memory_space<vmem>>, vector<1x256xf32>
    %180 = vector.broadcast %179 : vector<1x256xf32> to vector<8x256xf32>
    %181 = arith.addf %178, %180 : vector<8x256xf32>
    %c0_66 = arith.constant 0 : index
    %c0_67 = arith.constant 0 : index
    %182 = vector.load %arg9[%c0_66, %c0_67] : memref<64x256xbf16, #tpu.memory_space<vmem>>, vector<64x256xbf16>
    %cst_68 = arith.constant 0.000000e+00 : f32
    %183 = vector.broadcast %cst_68 : f32 to vector<2x64xf32>
    %cst_69 = arith.constant 0.000000e+00 : f32
    %184 = vector.broadcast %cst_69 : f32 to vector<2x64xf32>
    %185 = vector.extract_strided_slice %181 {offsets = [0, 0], sizes = [2, 256], strides = [1, 1]} : vector<8x256xf32> to vector<2x256xf32>
    %186 = arith.truncf %183 : vector<2x64xf32> to vector<2x64xbf16>
    %cst_70 = arith.constant dense<0.000000e+00> : vector<2x256xf32>
    %187 = tpu.matmul %186, %182, %cst_70 {dimension_numbers = #tpu.dot_dimension_numbers<[1], [0], [0], [1], [0, 0, 1, 1], [], []>} : vector<2x64xbf16>, vector<64x256xbf16>, vector<2x256xf32> -> vector<2x256xf32>
    %188 = arith.addf %185, %187 : vector<2x256xf32>
    %189 = math.tanh %188 : vector<2x256xf32>
    %190 = vector.extract_strided_slice %189 {offsets = [0, 0], sizes = [2, 64], strides = [1, 1]} : vector<2x256xf32> to vector<2x64xf32>
    %cst_71 = arith.constant 5.000000e-01 : f32
    %191 = vector.broadcast %cst_71 : f32 to vector<2x64xf32>
    %192 = arith.mulf %191, %190 : vector<2x64xf32>
    %cst_72 = arith.constant 5.000000e-01 : f32
    %193 = vector.broadcast %cst_72 : f32 to vector<2x64xf32>
    %194 = arith.addf %192, %193 : vector<2x64xf32>
    %195 = vector.extract_strided_slice %189 {offsets = [0, 64], sizes = [2, 64], strides = [1, 1]} : vector<2x256xf32> to vector<2x64xf32>
    %cst_73 = arith.constant 5.000000e-01 : f32
    %196 = vector.broadcast %cst_73 : f32 to vector<2x64xf32>
    %197 = arith.mulf %196, %195 : vector<2x64xf32>
    %cst_74 = arith.constant 5.000000e-01 : f32
    %198 = vector.broadcast %cst_74 : f32 to vector<2x64xf32>
    %199 = arith.addf %197, %198 : vector<2x64xf32>
    %200 = vector.extract_strided_slice %189 {offsets = [0, 128], sizes = [2, 64], strides = [1, 1]} : vector<2x256xf32> to vector<2x64xf32>
    %201 = vector.extract_strided_slice %189 {offsets = [0, 192], sizes = [2, 64], strides = [1, 1]} : vector<2x256xf32> to vector<2x64xf32>
    %cst_75 = arith.constant 5.000000e-01 : f32
    %202 = vector.broadcast %cst_75 : f32 to vector<2x64xf32>
    %203 = arith.mulf %202, %201 : vector<2x64xf32>
    %cst_76 = arith.constant 5.000000e-01 : f32
    %204 = vector.broadcast %cst_76 : f32 to vector<2x64xf32>
    %205 = arith.addf %203, %204 : vector<2x64xf32>
    %206 = arith.mulf %199, %184 : vector<2x64xf32>
    %207 = arith.mulf %194, %200 : vector<2x64xf32>
    %208 = arith.addf %206, %207 : vector<2x64xf32>
    %209 = math.tanh %208 : vector<2x64xf32>
    %210 = arith.mulf %205, %209 : vector<2x64xf32>
    %211 = vector.extract_strided_slice %181 {offsets = [2, 0], sizes = [2, 256], strides = [1, 1]} : vector<8x256xf32> to vector<2x256xf32>
    %212 = arith.truncf %210 : vector<2x64xf32> to vector<2x64xbf16>
    %cst_77 = arith.constant dense<0.000000e+00> : vector<2x256xf32>
    %213 = tpu.matmul %212, %182, %cst_77 {dimension_numbers = #tpu.dot_dimension_numbers<[1], [0], [0], [1], [0, 0, 1, 1], [], []>} : vector<2x64xbf16>, vector<64x256xbf16>, vector<2x256xf32> -> vector<2x256xf32>
    %214 = arith.addf %211, %213 : vector<2x256xf32>
    %215 = math.tanh %214 : vector<2x256xf32>
    %216 = vector.extract_strided_slice %215 {offsets = [0, 0], sizes = [2, 64], strides = [1, 1]} : vector<2x256xf32> to vector<2x64xf32>
    %cst_78 = arith.constant 5.000000e-01 : f32
    %217 = vector.broadcast %cst_78 : f32 to vector<2x64xf32>
    %218 = arith.mulf %217, %216 : vector<2x64xf32>
    %cst_79 = arith.constant 5.000000e-01 : f32
    %219 = vector.broadcast %cst_79 : f32 to vector<2x64xf32>
    %220 = arith.addf %218, %219 : vector<2x64xf32>
    %221 = vector.extract_strided_slice %215 {offsets = [0, 64], sizes = [2, 64], strides = [1, 1]} : vector<2x256xf32> to vector<2x64xf32>
    %cst_80 = arith.constant 5.000000e-01 : f32
    %222 = vector.broadcast %cst_80 : f32 to vector<2x64xf32>
    %223 = arith.mulf %222, %221 : vector<2x64xf32>
    %cst_81 = arith.constant 5.000000e-01 : f32
    %224 = vector.broadcast %cst_81 : f32 to vector<2x64xf32>
    %225 = arith.addf %223, %224 : vector<2x64xf32>
    %226 = vector.extract_strided_slice %215 {offsets = [0, 128], sizes = [2, 64], strides = [1, 1]} : vector<2x256xf32> to vector<2x64xf32>
    %227 = vector.extract_strided_slice %215 {offsets = [0, 192], sizes = [2, 64], strides = [1, 1]} : vector<2x256xf32> to vector<2x64xf32>
    %cst_82 = arith.constant 5.000000e-01 : f32
    %228 = vector.broadcast %cst_82 : f32 to vector<2x64xf32>
    %229 = arith.mulf %228, %227 : vector<2x64xf32>
    %cst_83 = arith.constant 5.000000e-01 : f32
    %230 = vector.broadcast %cst_83 : f32 to vector<2x64xf32>
    %231 = arith.addf %229, %230 : vector<2x64xf32>
    %232 = arith.mulf %225, %208 : vector<2x64xf32>
    %233 = arith.mulf %220, %226 : vector<2x64xf32>
    %234 = arith.addf %232, %233 : vector<2x64xf32>
    %235 = math.tanh %234 : vector<2x64xf32>
    %236 = arith.mulf %231, %235 : vector<2x64xf32>
    %237 = vector.extract_strided_slice %181 {offsets = [4, 0], sizes = [2, 256], strides = [1, 1]} : vector<8x256xf32> to vector<2x256xf32>
    %238 = arith.truncf %236 : vector<2x64xf32> to vector<2x64xbf16>
    %cst_84 = arith.constant dense<0.000000e+00> : vector<2x256xf32>
    %239 = tpu.matmul %238, %182, %cst_84 {dimension_numbers = #tpu.dot_dimension_numbers<[1], [0], [0], [1], [0, 0, 1, 1], [], []>} : vector<2x64xbf16>, vector<64x256xbf16>, vector<2x256xf32> -> vector<2x256xf32>
    %240 = arith.addf %237, %239 : vector<2x256xf32>
    %241 = math.tanh %240 : vector<2x256xf32>
    %242 = vector.extract_strided_slice %241 {offsets = [0, 0], sizes = [2, 64], strides = [1, 1]} : vector<2x256xf32> to vector<2x64xf32>
    %cst_85 = arith.constant 5.000000e-01 : f32
    %243 = vector.broadcast %cst_85 : f32 to vector<2x64xf32>
    %244 = arith.mulf %243, %242 : vector<2x64xf32>
    %cst_86 = arith.constant 5.000000e-01 : f32
    %245 = vector.broadcast %cst_86 : f32 to vector<2x64xf32>
    %246 = arith.addf %244, %245 : vector<2x64xf32>
    %247 = vector.extract_strided_slice %241 {offsets = [0, 64], sizes = [2, 64], strides = [1, 1]} : vector<2x256xf32> to vector<2x64xf32>
    %cst_87 = arith.constant 5.000000e-01 : f32
    %248 = vector.broadcast %cst_87 : f32 to vector<2x64xf32>
    %249 = arith.mulf %248, %247 : vector<2x64xf32>
    %cst_88 = arith.constant 5.000000e-01 : f32
    %250 = vector.broadcast %cst_88 : f32 to vector<2x64xf32>
    %251 = arith.addf %249, %250 : vector<2x64xf32>
    %252 = vector.extract_strided_slice %241 {offsets = [0, 128], sizes = [2, 64], strides = [1, 1]} : vector<2x256xf32> to vector<2x64xf32>
    %253 = vector.extract_strided_slice %241 {offsets = [0, 192], sizes = [2, 64], strides = [1, 1]} : vector<2x256xf32> to vector<2x64xf32>
    %cst_89 = arith.constant 5.000000e-01 : f32
    %254 = vector.broadcast %cst_89 : f32 to vector<2x64xf32>
    %255 = arith.mulf %254, %253 : vector<2x64xf32>
    %cst_90 = arith.constant 5.000000e-01 : f32
    %256 = vector.broadcast %cst_90 : f32 to vector<2x64xf32>
    %257 = arith.addf %255, %256 : vector<2x64xf32>
    %258 = arith.mulf %251, %234 : vector<2x64xf32>
    %259 = arith.mulf %246, %252 : vector<2x64xf32>
    %260 = arith.addf %258, %259 : vector<2x64xf32>
    %261 = math.tanh %260 : vector<2x64xf32>
    %262 = arith.mulf %257, %261 : vector<2x64xf32>
    %263 = vector.extract_strided_slice %181 {offsets = [6, 0], sizes = [2, 256], strides = [1, 1]} : vector<8x256xf32> to vector<2x256xf32>
    %264 = arith.truncf %262 : vector<2x64xf32> to vector<2x64xbf16>
    %cst_91 = arith.constant dense<0.000000e+00> : vector<2x256xf32>
    %265 = tpu.matmul %264, %182, %cst_91 {dimension_numbers = #tpu.dot_dimension_numbers<[1], [0], [0], [1], [0, 0, 1, 1], [], []>} : vector<2x64xbf16>, vector<64x256xbf16>, vector<2x256xf32> -> vector<2x256xf32>
    %266 = arith.addf %263, %265 : vector<2x256xf32>
    %267 = math.tanh %266 : vector<2x256xf32>
    %268 = vector.extract_strided_slice %267 {offsets = [0, 0], sizes = [2, 64], strides = [1, 1]} : vector<2x256xf32> to vector<2x64xf32>
    %cst_92 = arith.constant 5.000000e-01 : f32
    %269 = vector.broadcast %cst_92 : f32 to vector<2x64xf32>
    %270 = arith.mulf %269, %268 : vector<2x64xf32>
    %cst_93 = arith.constant 5.000000e-01 : f32
    %271 = vector.broadcast %cst_93 : f32 to vector<2x64xf32>
    %272 = arith.addf %270, %271 : vector<2x64xf32>
    %273 = vector.extract_strided_slice %267 {offsets = [0, 64], sizes = [2, 64], strides = [1, 1]} : vector<2x256xf32> to vector<2x64xf32>
    %cst_94 = arith.constant 5.000000e-01 : f32
    %274 = vector.broadcast %cst_94 : f32 to vector<2x64xf32>
    %275 = arith.mulf %274, %273 : vector<2x64xf32>
    %cst_95 = arith.constant 5.000000e-01 : f32
    %276 = vector.broadcast %cst_95 : f32 to vector<2x64xf32>
    %277 = arith.addf %275, %276 : vector<2x64xf32>
    %278 = vector.extract_strided_slice %267 {offsets = [0, 128], sizes = [2, 64], strides = [1, 1]} : vector<2x256xf32> to vector<2x64xf32>
    %279 = vector.extract_strided_slice %267 {offsets = [0, 192], sizes = [2, 64], strides = [1, 1]} : vector<2x256xf32> to vector<2x64xf32>
    %cst_96 = arith.constant 5.000000e-01 : f32
    %280 = vector.broadcast %cst_96 : f32 to vector<2x64xf32>
    %281 = arith.mulf %280, %279 : vector<2x64xf32>
    %cst_97 = arith.constant 5.000000e-01 : f32
    %282 = vector.broadcast %cst_97 : f32 to vector<2x64xf32>
    %283 = arith.addf %281, %282 : vector<2x64xf32>
    %284 = arith.mulf %277, %260 : vector<2x64xf32>
    %285 = arith.mulf %272, %278 : vector<2x64xf32>
    %286 = arith.addf %284, %285 : vector<2x64xf32>
    %287 = math.tanh %286 : vector<2x64xf32>
    %288 = arith.mulf %283, %287 : vector<2x64xf32>
    %c0_98 = arith.constant 0 : index
    %c0_99 = arith.constant 0 : index
    %289 = vector.load %arg11[%c0_98, %c0_99] : memref<64x2xf32, #tpu.memory_space<vmem>>, vector<64x2xf32>
    %cst_100 = arith.constant dense<0.000000e+00> : vector<2x2xf32>
    %290 = tpu.matmul %288, %289, %cst_100 {dimension_numbers = #tpu.dot_dimension_numbers<[1], [0], [0], [1], [0, 0, 1, 1], [], []>} : vector<2x64xf32>, vector<64x2xf32>, vector<2x2xf32> -> vector<2x2xf32>
    %c0_101 = arith.constant 0 : index
    %c0_102 = arith.constant 0 : index
    %291 = vector.load %arg12[%c0_101, %c0_102] : memref<1x2xf32, #tpu.memory_space<vmem>>, vector<1x2xf32>
    %292 = vector.broadcast %291 : vector<1x2xf32> to vector<2x2xf32>
    %293 = arith.addf %290, %292 : vector<2x2xf32>
    %c0_103 = arith.constant 0 : index
    %c0_104 = arith.constant 0 : index
    %294 = vector.load %arg13[%c0_103, %c0_104] : memref<2x2xf32, #tpu.memory_space<vmem>>, vector<2x2xf32>
    tpu.vector_store %arg13[%c0_103, %c0_104], %293 {strides = array<i32>} : memref<2x2xf32, #tpu.memory_space<vmem>>, vector<2x2xf32>,
    return
  }
}

</mosaic_0001>

<bundles_post_ra>
// kernel: tpu_custom_call.1
= control target key start
LH: loop header
LB: loop body
LE: loop exit
PB: predicated region body
PF: predicated region fallthrough
CT: control target
= control target key end

     0   :  { %s7880_s20 = smov 100   ;;  %s7881_s21 = smov 50   ;;  %vm1520_vm0 = vcmask 1044480   ;;  %vm190_vm1 = vcmask 408576   ;;  %vm199_vm2 = vcmask 818176   ;;  %vm208_vm3 = vcmask 179200   ;;  %s12439_s0 = inlined_call_operand.vmem [shape: f32[8,8,50], index: 0, kind: input, shape index: {}]   ;;  %s12440_s1 = inlined_call_operand.vmem [shape: bf16[250,1472], index: 1, kind: input, shape index: {}]   ;;  %s12441_s2 = inlined_call_operand.vmem [shape: f32[1,1472], index: 2, kind: input, shape index: {}]   ;;  %s12442_s3 = inlined_call_operand.vmem [shape: bf16[2,1440,64], index: 3, kind: input, shape index: {}]   ;;  %s12443_s4 = inlined_call_operand.vmem [shape: f32[1,64], index: 4, kind: input, shape index: {}]   ;;  %s12444_s5 = inlined_call_operand.vmem [shape: bf16[64,256], index: 5, kind: input, shape index: {}]   ;;  %s12445_s6 = inlined_call_operand.vmem [shape: bf16[64,256], index: 6, kind: input, shape index: {}]   ;;  %s12446_s7 = inlined_call_operand.vmem [shape: f32[1,256], index: 7, kind: input, shape index: {}]   ;;  %s12447_s8 = inlined_call_operand.vmem [shape: bf16[64,256], index: 8, kind: input, shape index: {}]   ;;  %s12448_s9 = inlined_call_operand.vmem [shape: bf16[64,256], index: 9, kind: input, shape index: {}]   ;;  %s12449_s10 = inlined_call_operand.vmem [shape: f32[1,256], index: 10, kind: input, shape index: {}]   ;;  %s12450_s11 = inlined_call_operand.vmem [shape: f32[64,2], index: 11, kind: input, shape index: {}]   ;;  %s12451_s12 = inlined_call_operand.vmem [shape: f32[1,2], index: 12, kind: input, shape index: {}]   ;;  %s12452_s13 = inlined_call_operand.hbm [shape: f32[2,2], index: 13, kind: output, shape index: {}]  }
   0x1   :  { %v7963_v0 = vld [vmem:[%s12439_s0 + $0x8] sm:$0xff]  ;;  %v7968_v1 = vld [vmem:[%s12439_s0 + $0x10] sm:$0xff]  ;;  %v7977_v6 = vld [vmem:[%s12439_s0] sm:$0xff]  ;;  %s7882_s15 = smov 22   ;;  %s7883_s16 = smov 72   ;;  %vm217_vm4 = vcmask 588800  }
   0x2   :  { %v95_v2 = vrot.slane %v7963_v0, 2  ;;  %v96_v3 = vrot.slane %v7968_v1, 2  ;;  %v63_v4 = vrot.slane %v7963_v0, 1  ;;  %v64_v5 = vrot.slane %v7968_v1, 1  ;;  %v7986_v11 = vld [vmem:[%s12439_s0 + $0x18] sm:$0xff]  ;;  %v7991_v14 = vld [vmem:[%s12439_s0 + $0x20] sm:$0xff] }
   0x3   :  { %v127_v7 = vrot.slane %v7963_v0, 3  ;;  %v128_v8 = vrot.slane %v7968_v1, 3  ;;  %v159_v9 = vrot.slane %v7963_v0, 4  ;;  %v160_v10 = vrot.slane %v7968_v1, 4  ;;  %v7006_v17 = vld [vmem:[%s12440_s1 + $0x2a4] ss:$48 sps:$4 sm:$0xff]  }
   0x4   :  { %v6806_v12 = vpack.i.bf16 %v96_v3, %v95_v2  ;;  %v6816_v13 = vpack.i.bf16 %v64_v5, %v63_v4  ;;  %v126_v15 = vrot.slane %v7977_v6, 3  ;;  %v129_v16 = vrot.slane %v7986_v11, 3  ;;  %v8005_v22 = vld [vmem:[%s12439_s0 + $0x28] sm:$0xff]  ;;  %1557 = vmatprep.subr.bf16.mxu0 %v7006_v17  ;;  %v7010_v24 = vld [vmem:[%s12440_s1 + $0x2a0] ss:$48 sps:$4 sm:$0xff]   ;;  %v53_v50 = vld [vmem:[%s12439_s0 + $0x38] sm:$0xff] }
   0x5   :  { %v6811_v18 = vpack.i.bf16 %v128_v8, %v127_v7  ;;  %v6821_v19 = vpack.i.bf16 %v160_v10, %v159_v9  ;;  %v94_v20 = vrot.slane %v7977_v6, 2  ;;  %v97_v21 = vrot.slane %v7986_v11, 2  ;;  %v7008_v23 = vld [vmem:[%s12440_s1 + $0x2ac] ss:$48 sps:$4 sm:$0xff]   ;;  %v7011_v27 = vld [vmem:[%s12440_s1 + $0x2a8] ss:$48 sps:$4 sm:$0xff]   ;;  %1558 = vmatpush1.bf16.msra.mxu0 %v7010_v24 }
   0x6   :  { %6807 = vrot.lane.b32.xlu0 %v6806_v12, %s7880_s20  ;;  %6817 = vrot.lane.b32.xlu1 %v6816_v13, %s7881_s21  ;;  %v6831_v25 = vpack.i.bf16 %v129_v16, %v126_v15  ;;  %v98_v26 = vrot.slane %v7991_v14, 2  ;;  %v7012_v28 = vld [vmem:[%s12440_s1 + $0x244] ss:$48 sps:$4 sm:$0xff]   ;;  %v99_v30 = vrot.slane %v8005_v22, 2  ;;  %v62_v31 = vrot.slane %v7977_v6, 1 }
   0x7   :  { %1598 = vmatprep.subr.bf16.mxu1 %v7008_v23  ;;  %v6826_v29 = vpack.i.bf16 %v97_v21, %v94_v20  ;;  %v65_v32 = vrot.slane %v7986_v11, 1  ;;  %v7014_v33 = vld [vmem:[%s12440_s1 + $0x24c] ss:$48 sps:$4 sm:$0xff]   ;;  %1559 = vmatprep.subr.bf16.mxu0 %v7012_v28  ;;  %v7016_v34 = vld [vmem:[%s12440_s1 + $0x240] ss:$48 sps:$4 sm:$0xff]   ;;  %v158_v36 = vrot.slane %v7977_v6, 4 }
   0x8   :  { %1599 = vmatpush1.bf16.msra.mxu1 %v7011_v27  ;;  %v7017_v35 = vld [vmem:[%s12440_s1 + $0x248] ss:$48 sps:$4 sm:$0xff]   ;;  %v161_v37 = vrot.slane %v7986_v11, 4  ;;  %v7018_v38 = vld [vmem:[%s12440_s1 + $0x1e4] ss:$48 sps:$4 sm:$0xff]   ;;  %v6841_v39 = vpack.i.bf16 %v99_v30, %v98_v26  ;;  %v130_v41 = vrot.slane %v7991_v14, 3 }
   0x9   :  { %1600 = vmatprep.subr.bf16.mxu1 %v7014_v33  ;;  %v6836_v40 = vpack.i.bf16 %v65_v32, %v62_v31  ;;  %v131_v42 = vrot.slane %v8005_v22, 3  ;;  %v7020_v43 = vld [vmem:[%s12440_s1 + $0x1ec] ss:$48 sps:$4 sm:$0xff]   ;;  %1560 = vmatpush1.bf16.msra.mxu0 %v7016_v34  ;;  %v7022_v44 = vld [vmem:[%s12440_s1 + $0x1e0] ss:$48 sps:$4 sm:$0xff]   ;;  %v162_v49 = vrot.slane %v7991_v14, 4 }
   0xa   :  { %6812 = vrot.lane.b32.xlu0 %v6811_v18, %s7882_s15  ;;  %6822 = vrot.lane.b32.xlu1 %v6821_v19, %s7883_s16  ;;  %v7023_v45 = vld [vmem:[%s12440_s1 + $0x1e8] ss:$48 sps:$4 sm:$0xff]   ;;  %v52_v46 = vld [vmem:[%s12439_s0 + $0x30] sm:$0xff]  ;;  %v6851_v48 = vpack.i.bf16 %v161_v37, %v158_v36  ;;  %v163_v53 = vrot.slane %v8005_v22, 4  ;;  %v66_v54 = vrot.slane %v7991_v14, 1  ;;  %v67_v55 = vrot.slane %v8005_v22, 1 }
   0xb   :  { %1561 = vmatprep.subr.bf16.mxu0 %v7018_v38  ;;  %v7024_v47 = vld [vmem:[%s12440_s1 + $0x184] ss:$48 sps:$4 sm:$0xff]   ;;  %v7026_v51 = vld [vmem:[%s12440_s1 + $0x18c] ss:$48 sps:$4 sm:$0xff]   ;;  %v6846_v52 = vpack.i.bf16 %v131_v42, %v130_v41  ;;  %v7028_v56 = vld [vmem:[%s12440_s1 + $0x180] ss:$48 sps:$4 sm:$0xff]  }
   0xc   :  { %1601 = vmatpush1.bf16.msra.mxu1 %v7017_v35  ;;  %v7029_v57 = vld [vmem:[%s12440_s1 + $0x188] ss:$48 sps:$4 sm:$0xff]   ;;  %v7030_v58 = vld [vmem:[%s12440_s1 + $0x124] ss:$48 sps:$4 sm:$0xff]   ;;  %v7032_v59 = vld [vmem:[%s12440_s1 + $0x12c] ss:$48 sps:$4 sm:$0xff]   ;;  %v6861_v62 = vpack.i.bf16 %v163_v53, %v162_v49  ;;  %v6856_v63 = vpack.i.bf16 %v67_v55, %v66_v54 }
   0xd   :  { %1602 = vmatprep.subr.bf16.mxu1 %v7020_v43  ;;  %1562 = vmatpush1.bf16.msra.mxu0 %v7022_v44  ;;  %v132_v60 = vrot.slane %v52_v46, 3  ;;  %v133_v61 = vrot.slane %v53_v50, 3  ;;  %v100_v2 = vrot.slane %v52_v46, 2  ;;  %v101_v3 = vrot.slane %v53_v50, 2  ;;  %v7034_v4 = vld [vmem:[%s12440_s1 + $0x120] ss:$48 sps:$4 sm:$0xff]  }
   0xe   :  { %6832 = vrot.lane.b32.xlu1 %v6831_v25, %s7882_s15  ;;  %6827 = vrot.lane.b32.xlu0 %v6826_v29, %s7880_s20  ;;  %v7035_v5 = vld [vmem:[%s12440_s1 + $0x128] ss:$48 sps:$4 sm:$0xff]   ;;  %v7036_v7 = vld [vmem:[%s12440_s1 + $0xc4] ss:$48 sps:$4 sm:$0xff]   ;;  %v164_v9 = vrot.slane %v52_v46, 4  ;;  %v165_v10 = vrot.slane %v53_v50, 4 }
   0xf   :  { %1563 = vmatprep.subr.bf16.mxu0 %v7024_v47  ;;  %v7038_v8 = vld [vmem:[%s12440_s1 + $0xcc] ss:$48 sps:$4 sm:$0xff]   ;;  %v6871_v12 = vpack.i.bf16 %v133_v61, %v132_v60  ;;  %v6866_v13 = vpack.i.bf16 %v101_v3, %v100_v2  ;;  %v68_v14 = vrot.slane %v52_v46, 1  ;;  %v69_v15 = vrot.slane %v53_v50, 1  ;;  %v7040_v16 = vld [vmem:[%s12440_s1 + $0xc0] ss:$48 sps:$4 sm:$0xff]  }
  0x10   :  { %1603 = vmatpush1.bf16.msra.mxu1 %v7023_v45  ;;  %v7041_v17 = vld [vmem:[%s12440_s1 + $0xc8] ss:$48 sps:$4 sm:$0xff]   ;;  %v7042_v18 = vld [vmem:[%s12440_s1 + $0x64] ss:$48 sps:$4 sm:$0xff]   ;;  %v7044_v19 = vld [vmem:[%s12440_s1 + $0x6c] ss:$48 sps:$4 sm:$0xff]   ;;  %v6881_v21 = vpack.i.bf16 %v165_v10, %v164_v9 }
  0x11   :  { %1604 = vmatprep.subr.bf16.mxu1 %v7026_v51  ;;  %1564 = vmatpush1.bf16.msra.mxu0 %v7028_v56  ;;  %v7046_v20 = vld [vmem:[%s12440_s1 + $0x60] ss:$48 sps:$4 sm:$0xff]   ;;  %v6876_v22 = vpack.i.bf16 %v69_v15, %v68_v14  ;;  %v7047_v23 = vld [vmem:[%s12440_s1 + $0x68] ss:$48 sps:$4 sm:$0xff]   ;;  %v7048_v24 = vld [vmem:[%s12440_s1 + $0x4] ss:$48 sps:$4 sm:$0xff]  }
  0x12   :  { %6842 = vrot.lane.b32.xlu1 %v6841_v39, %s7880_s20  ;;  %6837 = vrot.lane.b32.xlu0 %v6836_v40, %s7881_s21  ;;  %v7050_v25 = vld [vmem:[%s12440_s1 + $0xc] ss:$48 sps:$4 sm:$0xff]   ;;  %v7052_v26 = vld [vmem:[%s12440_s1] ss:$48 sps:$4 sm:$0xff]   ;;  %vm531_vm5 = vcmask 1041409   ;;  %vm534_vm6 = vcmask 1042434  }
  0x13   :  { %1565 = vmatprep.subr.bf16.mxu0 %v7030_v58  ;;  %v7054_v27 = vld [vmem:[%s12440_s1 + $0x5a4] ss:$48 sps:$4 sm:$0x1f]   ;;  %v7056_v28 = vld [vmem:[%s12440_s1 + $0x5ac] ss:$48 sps:$4 sm:$0x1f]  }
  0x14   :  { %1605 = vmatpush1.bf16.msra.mxu1 %v7029_v57  ;;  %v7053_v29 = vld [vmem:[%s12440_s1 + $0x8] ss:$48 sps:$4 sm:$0xff]   ;;  %v7058_v30 = vld [vmem:[%s12440_s1 + $0x5a0] ss:$48 sps:$4 sm:$0x1f]   ;;  %vm537_vm7 = vcmask 1043459  }
  0x15   :  { %1606 = vmatprep.subr.bf16.mxu1 %v7032_v59  ;;  %1566 = vmatpush1.bf16.msra.mxu0 %v7034_v4  ;;  %v7059_v31 = vld [vmem:[%s12440_s1 + $0x5a8] ss:$48 sps:$4 sm:$0x1f]   ;;  %v7060_v32 = vld [vmem:[%s12440_s1 + $0x544] ss:$48 sps:$4 sm:$0xff]   ;;  %v8150_v33 = vsel %vm1520_vm0, %v7058_v30, 0 }
  0x16   :  { %6852 = vrot.lane.b32.xlu1 %v6851_v48, %s7883_s16  ;;  %6847 = vrot.lane.b32.xlu0 %v6846_v52, %s7882_s15  ;;  %12680 = vst [vmem:[#allocation5_spill] sm:$0xff] %v8150_v33  ;;  %v8153_v34 = vsel %vm1520_vm0, %v7059_v31, 0  ;;  %v7062_v35 = vld [vmem:[%s12440_s1 + $0x54c] ss:$48 sps:$4 sm:$0xff]   ;;  %v7064_v36 = vld [vmem:[%s12440_s1 + $0x540] ss:$48 sps:$4 sm:$0xff]  }
  0x17   :  { %1567 = vmatprep.subr.bf16.mxu0 %v7036_v7  ;;  %12681 = vst [vmem:[#allocation6_spill] sm:$0xff] %v8153_v34  ;;  %v7065_v37 = vld [vmem:[%s12440_s1 + $0x548] ss:$48 sps:$4 sm:$0xff]   ;;  %v7066_v38 = vld [vmem:[%s12440_s1 + $0x4e4] ss:$48 sps:$4 sm:$0xff]   ;;  %vm540_vm8 = vcmask 1044484  }
  0x18   :  { %1607 = vmatpush1.bf16.msra.mxu1 %v7035_v5  ;;  %v7068_v39 = vld [vmem:[%s12440_s1 + $0x4ec] ss:$48 sps:$4 sm:$0xff]   ;;  %v7070_v40 = vld [vmem:[%s12440_s1 + $0x4e0] ss:$48 sps:$4 sm:$0xff]   ;;  %v7071_v41 = vld [vmem:[%s12440_s1 + $0x4e8] ss:$48 sps:$4 sm:$0xff]  }
  0x19   :  { %1608 = vmatprep.subr.bf16.mxu1 %v7038_v8  ;;  %1568 = vmatpush1.bf16.msra.mxu0 %v7040_v16  ;;  %v7072_v42 = vld [vmem:[%s12440_s1 + $0x484] ss:$48 sps:$4 sm:$0xff]   ;;  %v7074_v43 = vld [vmem:[%s12440_s1 + $0x48c] ss:$48 sps:$4 sm:$0xff]   ;;  %v7076_v44 = vld [vmem:[%s12440_s1 + $0x480] ss:$48 sps:$4 sm:$0xff]  }
  0x1a   :  { %6862 = vrot.lane.b32.xlu1 %v6861_v62, %s7883_s16  ;;  %6857 = vrot.lane.b32.xlu0 %v6856_v63, %s7881_s21  ;;  %v7077_v45 = vld [vmem:[%s12440_s1 + $0x488] ss:$48 sps:$4 sm:$0xff]   ;;  %v7078_v46 = vld [vmem:[%s12440_s1 + $0x424] ss:$48 sps:$4 sm:$0xff]   ;;  %vm543_vm9 = vcmask 1045509   ;;  %vm546_vm10 = vcmask 1046534  }
  0x1b   :  { %1569 = vmatprep.subr.bf16.mxu0 %v7042_v18  ;;  %v7080_v47 = vld [vmem:[%s12440_s1 + $0x42c] ss:$48 sps:$4 sm:$0xff]   ;;  %v7082_v48 = vld [vmem:[%s12440_s1 + $0x420] ss:$48 sps:$4 sm:$0xff]   ;;  %v7083_v49 = vld [vmem:[%s12440_s1 + $0x428] ss:$48 sps:$4 sm:$0xff]  }
  0x1c   :  { %1609 = vmatpush1.bf16.msra.mxu1 %v7041_v17  ;;  %v7084_v50 = vld [vmem:[%s12440_s1 + $0x3c4] ss:$48 sps:$4 sm:$0xff]   ;;  %v7086_v51 = vld [vmem:[%s12440_s1 + $0x3cc] ss:$48 sps:$4 sm:$0xff]   ;;  %v7088_v52 = vld [vmem:[%s12440_s1 + $0x3c0] ss:$48 sps:$4 sm:$0xff]  }
  0x1d   :  { %1610 = vmatprep.subr.bf16.mxu1 %v7044_v19  ;;  %1570 = vmatpush1.bf16.msra.mxu0 %v7046_v20  ;;  %v7089_v53 = vld [vmem:[%s12440_s1 + $0x3c8] ss:$48 sps:$4 sm:$0xff]   ;;  %v7090_v54 = vld [vmem:[%s12440_s1 + $0x364] ss:$48 sps:$4 sm:$0xff]   ;;  %v7092_v55 = vld [vmem:[%s12440_s1 + $0x36c] ss:$48 sps:$4 sm:$0xff]  }
  0x1e   :  { %6872 = vrot.lane.b32.xlu1 %v6871_v12, %s7882_s15  ;;  %6867 = vrot.lane.b32.xlu0 %v6866_v13, %s7880_s20  ;;  %v7094_v56 = vld [vmem:[%s12440_s1 + $0x360] ss:$48 sps:$4 sm:$0xff]   ;;  %v7095_v57 = vld [vmem:[%s12440_s1 + $0x368] ss:$48 sps:$4 sm:$0xff]   ;;  %vm549_vm11 = vcmask 1047559   ;;  %vm1516_vm12 = vcmask 998400  }
  0x1f   :  { %1571 = vmatprep.subr.bf16.mxu0 %v7048_v24  ;;  %v7096_v58 = vld [vmem:[%s12440_s1 + $0x304] ss:$48 sps:$4 sm:$0xff]   ;;  %v7098_v59 = vld [vmem:[%s12440_s1 + $0x30c] ss:$48 sps:$4 sm:$0xff]   ;;  %v7100_v60 = vld [vmem:[%s12440_s1 + $0x300] ss:$48 sps:$4 sm:$0xff]  }
  0x20   :  { %1611 = vmatpush1.bf16.msra.mxu1 %v7047_v23  ;;  %v7101_v61 = vld [vmem:[%s12440_s1 + $0x308] ss:$48 sps:$4 sm:$0xff]   ;;  %v7102_v62 = vld [vmem:[%s12440_s1 + $0x2b4] ss:$48 sps:$4 sm:$0xff]   ;;  %v7104_v63 = vld [vmem:[%s12440_s1 + $0x2bc] ss:$48 sps:$4 sm:$0xff]  }
  0x21   :  { %1612 = vmatprep.subr.bf16.mxu1 %v7050_v25  ;;  %1572 = vmatpush1.bf16.msra.mxu0 %v7052_v26 }
  0x22   :  { %6882 = vrot.lane.b32.xlu1 %v6881_v21, %s7883_s16  ;;  %6877 = vrot.lane.b32.xlu0 %v6876_v22, %s7881_s21 }
  0x23   :  { %6095 = vmatprep.subr.msk.bf16.mxu0 %vm1520_vm0, %v7054_v27 }
  0x24   :  { %1613 = vmatpush1.bf16.msra.mxu1 %v7053_v29 }
  0x25   :  { %6097 = vmatprep.subr.msk.bf16.mxu1 %vm1520_vm0, %v7056_v28  ;;  %1574 = vmatpush2.bf16.msra.mxu0 %v8150_v33 }
  0x26   :  { %1575 = vmatprep.subr.bf16.mxu0 %v7060_v32 }
  0x28   :  { %1615 = vmatpush2.bf16.msra.mxu1 %v8153_v34 }
  0x29   :  { %1616 = vmatprep.subr.bf16.mxu1 %v7062_v35  ;;  %1576 = vmatpush2.bf16.msra.mxu0 %v7064_v36 }
  0x2a   :  { %1577 = vmatprep.subr.bf16.mxu0 %v7066_v38 }
  0x2c   :  { %1617 = vmatpush2.bf16.msra.mxu1 %v7065_v37 }
  0x2d   :  { %1618 = vmatprep.subr.bf16.mxu1 %v7068_v39  ;;  %1578 = vmatpush2.bf16.msra.mxu0 %v7070_v40 }
  0x2e   :  { %1579 = vmatprep.subr.bf16.mxu0 %v7072_v42 }
  0x30   :  { %1619 = vmatpush2.bf16.msra.mxu1 %v7071_v41 }
  0x31   :  { %1620 = vmatprep.subr.bf16.mxu1 %v7074_v43  ;;  %1580 = vmatpush2.bf16.msra.mxu0 %v7076_v44 }
  0x32   :  { %1581 = vmatprep.subr.bf16.mxu0 %v7078_v46 }
  0x34   :  { %1621 = vmatpush2.bf16.msra.mxu1 %v7077_v45 }
  0x35   :  { %1622 = vmatprep.subr.bf16.mxu1 %v7080_v47  ;;  %1582 = vmatpush2.bf16.msra.mxu0 %v7082_v48 }
  0x36   :  { %1583 = vmatprep.subr.bf16.mxu0 %v7084_v50 }
  0x38   :  { %1623 = vmatpush2.bf16.msra.mxu1 %v7083_v49 }
  0x39   :  { %1624 = vmatprep.subr.bf16.mxu1 %v7086_v51  ;;  %1584 = vmatpush2.bf16.msra.mxu0 %v7088_v52 }
  0x3a   :  { %1585 = vmatprep.subr.bf16.mxu0 %v7090_v54 }
  0x3c   :  { %1625 = vmatpush2.bf16.msra.mxu1 %v7089_v53 }
  0x3d   :  { %1626 = vmatprep.subr.bf16.mxu1 %v7092_v55  ;;  %1586 = vmatpush2.bf16.msra.mxu0 %v7094_v56 }
  0x3e   :  { %1587 = vmatprep.subr.bf16.mxu0 %v7096_v58 }
  0x40   :  { %1627 = vmatpush2.bf16.msra.mxu1 %v7095_v57 }
  0x41   :  { %1628 = vmatprep.subr.bf16.mxu1 %v7098_v59  ;;  %1588 = vmatpush2.bf16.msra.mxu0 %v7100_v60 }
  0x42   :  { %1639 = vmatprep.subr.bf16.mxu0 %v7102_v62 }
  0x44   :  { %1629 = vmatpush2.bf16.msra.mxu1 %v7101_v61 }
  0x45   :  { %1680 = vmatprep.subr.bf16.mxu1 %v7104_v63 }
  0x78   :  { %v6808_v2 = vpop.permute.xlu0 %6807  ;;  %v6818_v3 = vpop.permute.xlu1 %6817 }
  0x79   :  { %v6810_v4 = vunpack.i.h.bf16 %v6808_v2  ;;  %v6809_v5 = vunpack.i.l.bf16 %v6808_v2  ;;  %v6820_v7 = vunpack.i.h.bf16 %v6818_v3  ;;  %v6819_v8 = vunpack.i.l.bf16 %v6818_v3 }
  0x7b   :  { %v193_v9 = vsel %vm190_vm1, %v7968_v1, %v6820_v7  ;;  %v192_v10 = vsel %vm190_vm1, %v7963_v0, %v6819_v8 }
  0x7c   :  { %v202_v12 = vsel %vm199_vm2, %v193_v9, %v6810_v4  ;;  %v201_v13 = vsel %vm199_vm2, %v192_v10, %v6809_v5  ;;  %v6813_v14 = vpop.permute.xlu0 %6812  ;;  %v6823_v15 = vpop.permute.xlu1 %6822 }
  0x7d   :  { %v422_v16 = vpack.c.bf16 %v202_v12, %v202_v12  ;;  %v420_v17 = vpack.c.bf16 %v201_v13, %v201_v13  ;;  %v6815_v18 = vunpack.i.h.bf16 %v6813_v14  ;;  %v6814_v19 = vunpack.i.l.bf16 %v6813_v14 }
  0x7e   :  { %v6825_v20 = vunpack.i.h.bf16 %v6823_v15  ;;  %v6824_v21 = vunpack.i.l.bf16 %v6823_v15 }
  0x7f   :  { %v8250_v22 = vunpack.c.l.b16 %v422_v16  ;;  %v210_v1 = vsel %vm208_vm3, %v6809_v5, %v6814_v19  ;;  %v211_v0 = vsel %vm208_vm3, %v6810_v4, %v6815_v18  ;;  %v8254_v23 = vunpack.c.l.b16 %v420_v17 }
  0x80   :  { %v220_v24 = vsel %vm217_vm4, %v211_v0, %v6825_v20  ;;  %v219_v25 = vsel %vm217_vm4, %v210_v1, %v6824_v21  ;;  %v6833_v26 = vpop.permute.xlu1 %6832  ;;  %v6828_v27 = vpop.permute.xlu0 %6827 }
  0x81   :  { %v533_v28 = vrot.slane %v8250_v22, 6  ;;  %v1805_v29 = vrot.slane %v8250_v22, 7  ;;  %v423_v30 = vpack.c.bf16 %v220_v24, %v220_v24  ;;  %v421_v31 = vpack.c.bf16 %v219_v25, %v219_v25 }
  0x82   :  { %v6835_v32 = vunpack.i.h.bf16 %v6833_v26  ;;  %v6834_v35 = vunpack.i.l.bf16 %v6833_v26  ;;  %v6830_v36 = vunpack.i.h.bf16 %v6828_v27  ;;  %v6829_v37 = vunpack.i.l.bf16 %v6828_v27 }
  0x83   :  { %v2366_v38 = vrot.slane %v8250_v22, 1  ;;  %v530_v39 = vrot.slane %v8254_v23, 7  ;;  %v8262_v40 = vunpack.c.l.b16 %v423_v30  ;;  %v8264_v41 = vunpack.c.l.b16 %v421_v31 }
  0x84   :  { %v8266_v42 = vpop.permute.xlu1 %6842  ;;  %v6838_v43 = vpop.permute.xlu0 %6837  ;;  %v2084_v44 = vrot.slane %v8254_v23, 1  ;;  %v2364_v45 = vrot.slane %v8254_v23, 2  ;;  %v212_v46 = vsel %vm208_vm3, %v6830_v36, %v6835_v32  ;;  %v209_v47 = vsel %vm208_vm3, %v6829_v37, %v6834_v35 }
  0x85   :  { %v553_v48 = vrot.slane %v8262_v40, 6  ;;  %v1819_v49 = vrot.slane %v8262_v40, 7  ;;  %v6840_v50 = vunpack.i.h.bf16 %v6838_v43  ;;  %v6839_v51 = vunpack.i.l.bf16 %v6838_v43 }
  0x86   :  { %v2380_v52 = vrot.slane %v8262_v40, 1  ;;  %v551_v53 = vrot.slane %v8264_v41, 7  ;;  %v6845_v54 = vunpack.i.h.bf16 %v8266_v42  ;;  %v6844_v55 = vunpack.i.l.bf16 %v8266_v42 }
  0x87   :  { %v194_v58 = vsel %vm190_vm1, %v7986_v11, %v6840_v50  ;;  %v191_v59 = vsel %vm190_vm1, %v7977_v6, %v6839_v51  ;;  %v2098_v11 = vrot.slane %v8264_v41, 1  ;;  %v2378_v9 = vrot.slane %v8264_v41, 2 }
  0x88   :  { %v6853_v56 = vpop.permute.xlu1 %6852  ;;  %v6848_v57 = vpop.permute.xlu0 %6847  ;;  %v203_v62 = vsel %vm199_vm2, %v194_v58, %v6830_v36  ;;  %v200_v63 = vsel %vm199_vm2, %v191_v59, %v6829_v37 }
  0x89   :  { %v6855_v60 = vunpack.i.h.bf16 %v6853_v56  ;;  %v6854_v61 = vunpack.i.l.bf16 %v6853_v56  ;;  %v6850_v2 = vunpack.i.h.bf16 %v6848_v57  ;;  %v6849_v3 = vunpack.i.l.bf16 %v6848_v57 }
  0x8a   :  { %v424_v4 = vpack.c.bf16 %v203_v62, %v203_v62  ;;  %v418_v5 = vpack.c.bf16 %v200_v63, %v200_v63 }
  0x8b   :  { %v218_v7 = vsel %vm217_vm4, %v209_v47, %v6854_v61  ;;  %v221_v8 = vsel %vm217_vm4, %v212_v46, %v6855_v60  ;;  %v214_v16 = vsel %vm208_vm3, %v6845_v54, %v6850_v2  ;;  %v213_v17 = vsel %vm208_vm3, %v6844_v55, %v6849_v3  ;;  %v7570_v60 = vld [vmem:[%s12439_s0 + $0x28] sm:$0xff] }
  0x8c   :  { %v419_v6 = vpack.c.bf16 %v218_v7, %v218_v7  ;;  %v425_v10 = vpack.c.bf16 %v221_v8, %v221_v8  ;;  %v6863_v12 = vpop.permute.xlu1 %6862  ;;  %v6858_v13 = vpop.permute.xlu0 %6857  ;;  %v520_v14 = vunpack.c.l.b16 %v424_v4  ;;  %v514_v15 = vunpack.c.l.b16 %v418_v5  ;;  %v7571_v5 = vld [vmem:[%s12439_s0 + $0x20] sm:$0xff] }
  0x8d   :  { %v6865_v20 = vunpack.i.h.bf16 %v6863_v12  ;;  %v6864_v21 = vunpack.i.l.bf16 %v6863_v12  ;;  %v6860_v24 = vunpack.i.h.bf16 %v6858_v13  ;;  %v6859_v25 = vunpack.i.l.bf16 %v6858_v13 }
  0x8e   :  { %v515_v18 = vunpack.c.l.b16 %v419_v6  ;;  %v521_v19 = vunpack.c.l.b16 %v425_v10  ;;  %v536_v1 = vrot.slane %v520_v14, 5  ;;  %v532_v0 = vsel %vm531_vm5, %v530_v39, %v514_v15 }
  0x8f   :  { %v1807_v26 = vrot.slane %v520_v14, 6  ;;  %v1803_v27 = vrot.slane %v514_v15, 1  ;;  %v2083_v30 = vrot.slane %v514_v15, 2  ;;  %v2363_v31 = vrot.slane %v514_v15, 3 }
  0x90   :  { %v2087_v32 = vrot.slane %v520_v14, 7  ;;  %v535_v35 = vsel %vm534_vm6, %v533_v28, %v532_v0  ;;  %v552_v36 = vsel %vm531_vm5, %v551_v53, %v515_v18  ;;  %v1817_v37 = vrot.slane %v515_v18, 1  ;;  %v6873_v8 = vpop.permute.xlu1 %6872  ;;  %v6868_v15 = vpop.permute.xlu0 %6867 }
  0x91   :  { %v1804_v43 = vsel %vm531_vm5, %v8254_v23, %v1803_v27  ;;  %v2085_v46 = vsel %vm531_vm5, %v2084_v44, %v2083_v30  ;;  %v2365_v39 = vsel %vm531_vm5, %v2364_v45, %v2363_v31  ;;  %v555_v47 = vrot.slane %v521_v19, 5 }
  0x92   :  { %v1806_v50 = vsel %vm534_vm6, %v1805_v29, %v1804_v43  ;;  %v2086_v51 = vsel %vm534_vm6, %v8250_v22, %v2085_v46  ;;  %v2367_v28 = vsel %vm534_vm6, %v2366_v38, %v2365_v39  ;;  %v554_v53 = vsel %vm534_vm6, %v553_v48, %v552_v36 }
  0x93   :  { %v8313_v23 = vsel %vm537_vm7, %v1807_v26, %v1806_v50  ;;  %v8316_v44 = vsel %vm537_vm7, %v2087_v32, %v2086_v51  ;;  %v8319_v45 = vsel %vm537_vm7, %v520_v14, %v2367_v28  ;;  %v1818_v29 = vsel %vm531_vm5, %v8264_v41, %v1817_v37 }
  0x94   :  { %v1820_v22 = vsel %vm534_vm6, %v1819_v49, %v1818_v29  ;;  %v1821_v38 = vrot.slane %v521_v19, 6  ;;  %v2097_v56 = vrot.slane %v515_v18, 2  ;;  %v2101_v48 = vrot.slane %v521_v19, 7  ;;  %v6883_v30 = vpop.permute.xlu1 %6882 }
  0x95   :  { %v2377_v57 = vrot.slane %v515_v18, 3  ;;  %v222_v58 = vsel %vm217_vm4, %v213_v17, %v6864_v21  ;;  %v223_v59 = vsel %vm217_vm4, %v214_v16, %v6865_v20  ;;  %v196_v61 = vsel %vm190_vm1, %v7570_v60, %v6860_v24 }
  0x96   :  { %v1822_v41 = vsel %vm537_vm7, %v1821_v38, %v1820_v22  ;;  %v2099_v62 = vsel %vm531_vm5, %v2098_v11, %v2097_v56  ;;  %v427_v63 = vpack.c.bf16 %v222_v58, %v222_v58  ;;  %v429_v49 = vpack.c.bf16 %v223_v59, %v223_v59 }
  0x97   :  { %v2100_v2 = vsel %vm534_vm6, %v8262_v40, %v2099_v62  ;;  %v2379_v3 = vsel %vm531_vm5, %v2378_v9, %v2377_v57  ;;  %v205_v4 = vsel %vm199_vm2, %v196_v61, %v6845_v54  ;;  %v195_v7 = vsel %vm190_vm1, %v7571_v5, %v6859_v25  ;;  %v7155_v61 = vld [vmem:[%s12440_s1 + $0x5b8] ss:$48 sps:$4 sm:$0x1f]  }
  0x98   :  { %v2102_v11 = vsel %vm537_vm7, %v2101_v48, %v2100_v2  ;;  %v2381_v6 = vsel %vm534_vm6, %v2380_v52, %v2379_v3  ;;  %v523_v10 = vunpack.c.l.b16 %v427_v63  ;;  %v8348_v12 = vunpack.c.l.b16 %v429_v49  ;;  %v7154_v48 = vld [vmem:[%s12440_s1 + $0x5b0] ss:$48 sps:$4 sm:$0x1f]  }
  0x99   :  { %v538_v9 = vsel %vm537_vm7, %v536_v1, %v535_v35  ;;  %v2382_v54 = vsel %vm537_vm7, %v521_v19, %v2381_v6  ;;  %v428_v13 = vpack.c.bf16 %v205_v4, %v205_v4  ;;  %v204_v14 = vsel %vm199_vm2, %v195_v7, %v6844_v55 }
  0x9a   :  { %v556_v16 = vsel %vm537_vm7, %v555_v47, %v554_v53  ;;  %v557_v17 = vrot.slane %v523_v10, 4  ;;  %v1823_v18 = vrot.slane %v523_v10, 5  ;;  %v1825_v40 = vrot.slane %v8348_v12, 4  ;;  %v6878_v47 = vpop.permute.xlu0 %6877 }
  0x9b   :  { %v2103_v52 = vrot.slane %v523_v10, 6  ;;  %v2105_v20 = vrot.slane %v8348_v12, 5  ;;  %v2383_v21 = vrot.slane %v523_v10, 7  ;;  %v2385_v1 = vrot.slane %v8348_v12, 6 }
  0x9c   :  { %v1824_v19 = vsel %vm540_vm8, %v1823_v18, %v1822_v41  ;;  %v524_v0 = vunpack.c.l.b16 %v428_v13  ;;  %v426_v24 = vpack.c.bf16 %v204_v14, %v204_v14  ;;  %v6875_v42 = vunpack.i.h.bf16 %v6873_v8 }
  0x9d   :  { %v559_v55 = vrot.slane %v8348_v12, 3  ;;  %v8362_v25 = vsel %vm543_vm9, %v1825_v40, %v1824_v19  ;;  %v2104_v26 = vsel %vm540_vm8, %v2103_v52, %v2102_v11  ;;  %v2384_v27 = vsel %vm540_vm8, %v2383_v21, %v2382_v54 }
  0x9e   :  { %v558_v31 = vsel %vm540_vm8, %v557_v17, %v556_v16  ;;  %v8368_v32 = vsel %vm543_vm9, %v2105_v20, %v2104_v26  ;;  %v8371_v35 = vsel %vm543_vm9, %v2385_v1, %v2384_v27  ;;  %v1811_v36 = vrot.slane %v524_v0, 4 }
  0x9f   :  { %v2091_v37 = vrot.slane %v524_v0, 5  ;;  %v2371_v43 = vrot.slane %v524_v0, 6  ;;  %v522_v46 = vunpack.c.l.b16 %v426_v24  ;;  %v6874_v39 = vunpack.i.l.bf16 %v6873_v8  ;;  %v7573_v8 = vld [vmem:[%s12439_s0 + $0x30] sm:$0xff] }
  0xa0   :  { %v6870_v50 = vunpack.i.h.bf16 %v6868_v15  ;;  %v6869_v51 = vunpack.i.l.bf16 %v6868_v15  ;;  %v6885_v28 = vunpack.i.h.bf16 %v6883_v30  ;;  %v6884_v53 = vunpack.i.l.bf16 %v6883_v30 }
  0xa1   :  { %v539_v29 = vrot.slane %v522_v46, 4  ;;  %v1809_v22 = vrot.slane %v522_v46, 5  ;;  %v2089_v38 = vrot.slane %v522_v46, 6  ;;  %v2369_v56 = vrot.slane %v522_v46, 7 }
  0xa2   :  { %v542_v57 = vrot.slane %v524_v0, 3  ;;  %v216_v58 = vsel %vm208_vm3, %v6870_v50, %v6875_v42  ;;  %v6880_v59 = vunpack.i.h.bf16 %v6878_v47  ;;  %v6879_v60 = vunpack.i.l.bf16 %v6878_v47 }
  0xa3   :  { %v1810_v41 = vsel %vm540_vm8, %v1809_v22, %v8313_v23  ;;  %v2090_v62 = vsel %vm540_vm8, %v2089_v38, %v8316_v44  ;;  %v2370_v63 = vsel %vm540_vm8, %v2369_v56, %v8319_v45  ;;  %v215_v49 = vsel %vm208_vm3, %v6869_v51, %v6874_v39  ;;  %v7572_v44 = vld [vmem:[%s12439_s0 + $0x38] sm:$0xff] }
  0xa4   :  { %v541_v2 = vsel %vm540_vm8, %v539_v29, %v538_v9  ;;  %v1812_v3 = vsel %vm543_vm9, %v1811_v36, %v1810_v41  ;;  %v2092_v4 = vsel %vm543_vm9, %v2091_v37, %v2090_v62  ;;  %v8391_v5 = vsel %vm543_vm9, %v2371_v43, %v2370_v63  ;;  %v7112_v41 = vld [vmem:[%s12440_s1 + $0x250] ss:$48 sps:$4 sm:$0xff]   ;;  %v7113_v62 = vld [vmem:[%s12440_s1 + $0x258] ss:$48 sps:$4 sm:$0xff]  }
  0xa5   :  { %v224_v23 = vsel %vm217_vm4, %v215_v49, %v6884_v53  ;;  %v225_v7 = vsel %vm217_vm4, %v216_v58, %v6885_v28  ;;  %v198_v45 = vsel %vm190_vm1, %v7572_v44, %v6880_v59  ;;  %v197_v11 = vsel %vm190_vm1, %v7573_v8, %v6879_v60  ;;  %v7106_v53 = vld [vmem:[%s12440_s1 + $0x2b0] ss:$48 sps:$4 sm:$0xff]   ;;  %v7120_v44 = vld [vmem:[%s12440_s1 + $0x194] ss:$48 sps:$4 sm:$0xff]  }
  0xa6   :  { %v431_v6 = vpack.c.bf16 %v224_v23, %v224_v23  ;;  %v433_v10 = vpack.c.bf16 %v225_v7, %v225_v7  ;;  %v206_v12 = vsel %vm199_vm2, %v197_v11, %v6869_v51  ;;  %v207_v9 = vsel %vm199_vm2, %v198_v45, %v6870_v50  ;;  %v7118_v7 = vld [vmem:[%s12440_s1 + $0x1f0] ss:$48 sps:$4 sm:$0xff]   ;;  %v7122_v45 = vld [vmem:[%s12440_s1 + $0x19c] ss:$48 sps:$4 sm:$0xff]   ;;  %v7125_v11 = vld [vmem:[%s12440_s1 + $0x198] ss:$48 sps:$4 sm:$0xff]  }
  0xa7   :  { %v430_v54 = vpack.c.bf16 %v206_v12, %v206_v12  ;;  %v432_v13 = vpack.c.bf16 %v207_v9, %v207_v9  ;;  %v8406_v14 = vsel %vm1520_vm0, %v7154_v48, 0  ;;  %v8409_v15 = vsel %vm1520_vm0, %v7155_v61, 0  ;;  %v7108_v48 = vld [vmem:[%s12440_s1 + $0x254] ss:$48 sps:$4 sm:$0xff]   ;;  %v7124_v8 = vld [vmem:[%s12440_s1 + $0x190] ss:$48 sps:$4 sm:$0xff]  }
  0xa8   :  { %12682 = vst [vmem:[#allocation7_spill] sm:$0xff] %v8406_v14  ;;  %12683 = vst [vmem:[#allocation8_spill] sm:$0xff] %v8409_v15  ;;  %v527_v16 = vunpack.c.l.b16 %v431_v6  ;;  %v529_v17 = vunpack.c.l.b16 %v433_v10  ;;  %v560_v18 = vsel %vm543_vm9, %v559_v55, %v558_v31  ;;  %v544_v40 = vsel %vm543_vm9, %v542_v57, %v541_v2  ;;  %v7110_v57 = vld [vmem:[%s12440_s1 + $0x25c] ss:$48 sps:$4 sm:$0xff]   ;;  %v7114_v2 = vld [vmem:[%s12440_s1 + $0x1f4] ss:$48 sps:$4 sm:$0xff]  }
  0xa9   :  { %v526_v52 = vunpack.c.l.b16 %v430_v54  ;;  %v528_v20 = vunpack.c.l.b16 %v432_v13  ;;  %v7126_v6 = vld [vmem:[%s12440_s1 + $0x134] ss:$48 sps:$4 sm:$0xff]   ;;  %v7128_v10 = vld [vmem:[%s12440_s1 + $0x13c] ss:$48 sps:$4 sm:$0xff]   ;;  %v7130_v12 = vld [vmem:[%s12440_s1 + $0x130] ss:$48 sps:$4 sm:$0xff]  }
  0xaa   :  { %v561_v21 = vrot.slane %v527_v16, 2  ;;  %v563_v1 = vrot.slane %v529_v17, 1  ;;  %v1827_v19 = vrot.slane %v527_v16, 3  ;;  %v1829_v0 = vrot.slane %v529_v17, 2  ;;  %v7131_v9 = vld [vmem:[%s12440_s1 + $0x138] ss:$48 sps:$4 sm:$0xff]  }
  0xab   :  { %v2107_v24 = vrot.slane %v527_v16, 4  ;;  %v2109_v42 = vrot.slane %v529_v17, 3  ;;  %v2387_v26 = vrot.slane %v527_v16, 5  ;;  %v2389_v27 = vrot.slane %v529_v17, 4  ;;  %v7132_v54 = vld [vmem:[%s12440_s1 + $0xd4] ss:$48 sps:$4 sm:$0xff]  }
  0xac   :  { %v562_v30 = vsel %vm546_vm10, %v561_v21, %v560_v18  ;;  %v1828_v36 = vsel %vm546_vm10, %v1827_v19, %v8362_v25  ;;  %v545_v37 = vrot.slane %v526_v52, 2  ;;  %v548_v43 = vrot.slane %v528_v20, 1  ;;  %v7134_v13 = vld [vmem:[%s12440_s1 + $0xdc] ss:$48 sps:$4 sm:$0xff]   ;;  %v7136_v16 = vld [vmem:[%s12440_s1 + $0xd0] ss:$48 sps:$4 sm:$0xff]  }
  0xad   :  { %v2108_v55 = vsel %vm546_vm10, %v2107_v24, %v8368_v32  ;;  %v2388_v31 = vsel %vm546_vm10, %v2387_v26, %v8371_v35  ;;  %v1813_v46 = vrot.slane %v526_v52, 3  ;;  %v1815_v39 = vrot.slane %v528_v20, 2  ;;  %v7107_v32 = vld [vmem:[%s12440_s1 + $0x2b8] ss:$48 sps:$4 sm:$0xff]   ;;  %v7138_v18 = vld [vmem:[%s12440_s1 + $0x74] ss:$48 sps:$4 sm:$0xff]  }
  0xae   :  { %v2093_v47 = vrot.slane %v526_v52, 4  ;;  %v2095_v50 = vrot.slane %v528_v20, 3  ;;  %v2373_v51 = vrot.slane %v526_v52, 5  ;;  %v2375_v28 = vrot.slane %v528_v20, 4  ;;  %v7137_v17 = vld [vmem:[%s12440_s1 + $0xd8] ss:$48 sps:$4 sm:$0xff]  }
  0xaf   :  { %v564_v25 = vsel %vm549_vm11, %v563_v1, %v562_v30  ;;  %v547_v29 = vsel %vm546_vm10, %v545_v37, %v544_v40  ;;  %v8429_v35 = vsel %vm549_vm11, %v1829_v0, %v1828_v36  ;;  %v1814_v22 = vsel %vm546_vm10, %v1813_v46, %v1812_v3  ;;  %v7116_v3 = vld [vmem:[%s12440_s1 + $0x1fc] ss:$48 sps:$4 sm:$0xff]   ;;  %v7142_v52 = vld [vmem:[%s12440_s1 + $0x70] ss:$48 sps:$4 sm:$0xff]   ;;  %v7143_v20 = vld [vmem:[%s12440_s1 + $0x78] ss:$48 sps:$4 sm:$0xff]  }
  0xb0   :  { %v8432_v38 = vpack.c.b16 %v564_v25, %v564_v25  ;;  %v550_v56 = vsel %vm549_vm11, %v548_v43, %v547_v29  ;;  %v8442_v58 = vsel %vm549_vm11, %v1815_v39, %v1814_v22  ;;  %v8447_v60 = vsel %vm549_vm11, %v2109_v42, %v2108_v55  ;;  %v7140_v40 = vld [vmem:[%s12440_s1 + $0x7c] ss:$48 sps:$4 sm:$0xff]   ;;  %v7144_v21 = vld [vmem:[%s12440_s1 + $0x14] ss:$48 sps:$4 sm:$0xff]   ;;  %v7148_v19 = vld [vmem:[%s12440_s1 + $0x10] ss:$48 sps:$4 sm:$0xff]  }
  0xb1   :  { %v8444_v59 = vpack.c.b16 %v550_v56, %v550_v56  ;;  %12684 = vst [vmem:[#allocation9_spill] sm:$0xff] %v8447_v60  ;;  %v2094_v61 = vsel %vm546_vm10, %v2093_v47, %v2092_v4  ;;  %v8464_v49 = vsel %vm549_vm11, %v2389_v27, %v2388_v31  ;;  %v2374_v4 = vsel %vm546_vm10, %v2373_v51, %v8391_v5  ;;  %v7119_v5 = vld [vmem:[%s12440_s1 + $0x1f8] ss:$48 sps:$4 sm:$0xff]   ;;  %v7146_v1 = vld [vmem:[%s12440_s1 + $0x1c] ss:$48 sps:$4 sm:$0xff]  }
  0xb2   :  { %6096 = vmatprep.mubr.msk.bf16.mxu0 %vm1516_vm12, %v8432_v38  ;;  %6098 = vmatprep.mubr.msk.bf16.mxu1 %vm1516_vm12, %v8432_v38  ;;  %v8461_v63 = vsel %vm549_vm11, %v2095_v50, %v2094_v61  ;;  %12686 = vst [vmem:[#allocation11_spill] sm:$0xff] %v8464_v49  ;;  %v8477_v23 = vsel %vm549_vm11, %v2375_v28, %v2374_v4  ;;  %v7149_v0 = vld [vmem:[%s12440_s1 + $0x18] ss:$48 sps:$4 sm:$0xff]   ;;  %v7150_v24 = vld [vmem:[%s12440_s1 + $0x5b4] ss:$48 sps:$4 sm:$0x1f]  }
  0xb3   :  { %12685 = vst [vmem:[#allocation10_spill] sm:$0xff] %v8461_v63  ;;  %1590 = vmatmul.mubr.bf16.vlgmr.msra.gmra.mxu0 %v8444_v59  ;;  %1631 = vmatmul.mubr.bf16.vlgmr.msra.gmra.mxu1 %v8444_v59  ;;  %12687 = vst [vmem:[#allocation12_spill] sm:$0xff] %v8477_v23  ;;  %v7152_v42 = vld [vmem:[%s12440_s1 + $0x5bc] ss:$48 sps:$4 sm:$0x1f]  }
  0xb4   :  { %1640 = vmatpush1.bf16.msra.mxu0 %v7106_v53  ;;  %1681 = vmatpush1.bf16.msra.mxu1 %v7107_v32  ;;  %v7156_v26 = vld [vmem:[%s12440_s1 + $0x554] ss:$48 sps:$4 sm:$0xff]   ;;  %v7158_v27 = vld [vmem:[%s12440_s1 + $0x55c] ss:$48 sps:$4 sm:$0xff]   ;;  %v7160_v30 = vld [vmem:[%s12440_s1 + $0x550] ss:$48 sps:$4 sm:$0xff]  }
  0xb5   :  { %6100 = vmatprep.mubr.msk.bf16.mxu0 %vm1516_vm12, %v8432_v38  ;;  %6102 = vmatprep.mubr.msk.bf16.mxu1 %vm1516_vm12, %v8432_v38  ;;  %v7161_v36 = vld [vmem:[%s12440_s1 + $0x558] ss:$48 sps:$4 sm:$0xff]   ;;  %v8572_v37 = vld [vmem:[%s12440_s1 + $0x4f4] ss:$48 sps:$4 sm:$0xff]   ;;  %v8577_v43 = vld [vmem:[%s12440_s1 + $0x4fc] ss:$48 sps:$4 sm:$0xff]  }
  0xb6   :  { %1641 = vmatprep.subr.bf16.mxu0 %v7108_v48  ;;  %1682 = vmatprep.subr.bf16.mxu1 %v7110_v57  ;;  %v8584_v55 = vld [vmem:[%s12440_s1 + $0x4f0] ss:$48 sps:$4 sm:$0xff]   ;;  %v8589_v31 = vld [vmem:[%s12440_s1 + $0x4f8] ss:$48 sps:$4 sm:$0xff]   ;;  %v8594_v46 = vld [vmem:[%s12440_s1 + $0x494] ss:$48 sps:$4 sm:$0xff]  }
  0xb7   :  { %v8599_v39 = vld [vmem:[%s12440_s1 + $0x49c] ss:$48 sps:$4 sm:$0xff]   ;;  %v8606_v47 = vld [vmem:[%s12440_s1 + $0x490] ss:$48 sps:$4 sm:$0xff]   ;;  %v8611_v50 = vld [vmem:[%s12440_s1 + $0x498] ss:$48 sps:$4 sm:$0xff]  }
  0xb8   :  { %1642 = vmatpush1.bf16.msra.mxu0 %v7112_v41  ;;  %1683 = vmatpush1.bf16.msra.mxu1 %v7113_v62  ;;  %v8616_v51 = vld [vmem:[%s12440_s1 + $0x434] ss:$48 sps:$4 sm:$0xff]   ;;  %v8621_v28 = vld [vmem:[%s12440_s1 + $0x43c] ss:$48 sps:$4 sm:$0xff]   ;;  %v8630_v53 = vld [vmem:[%s12440_s1 + $0x430] ss:$48 sps:$4 sm:$0xff]  }
  0xb9   :  { %1643 = vmatprep.subr.bf16.mxu0 %v7114_v2  ;;  %1684 = vmatprep.subr.bf16.mxu1 %v7116_v3  ;;  %v8635_v25 = vld [vmem:[%s12440_s1 + $0x438] ss:$48 sps:$4 sm:$0xff]   ;;  %v8640_v29 = vld [vmem:[%s12440_s1 + $0x3d4] ss:$48 sps:$4 sm:$0xff]   ;;  %v8645_v32 = vld [vmem:[%s12440_s1 + $0x3dc] ss:$48 sps:$4 sm:$0xff]  }
  0xba   :  { %v8654_v22 = vld [vmem:[%s12440_s1 + $0x3d0] ss:$48 sps:$4 sm:$0xff]   ;;  %v8659_v56 = vld [vmem:[%s12440_s1 + $0x3d8] ss:$48 sps:$4 sm:$0xff]   ;;  %v8664_v48 = vld [vmem:[%s12440_s1 + $0x374] ss:$48 sps:$4 sm:$0xff]  }
  0xbb   :  { %v8669_v57 = vld [vmem:[%s12440_s1 + $0x37c] ss:$48 sps:$4 sm:$0xff]   ;;  %v8678_v61 = vld [vmem:[%s12440_s1 + $0x370] ss:$48 sps:$4 sm:$0xff]   ;;  %v8683_v41 = vld [vmem:[%s12440_s1 + $0x378] ss:$48 sps:$4 sm:$0xff]  }
  0xbc   :  { %1644 = vmatpush1.bf16.msra.mxu0 %v7118_v7  ;;  %1685 = vmatpush1.bf16.msra.mxu1 %v7119_v5  ;;  %v8688_v62 = vld [vmem:[%s12440_s1 + $0x314] ss:$48 sps:$4 sm:$0xff]   ;;  %v8693_v2 = vld [vmem:[%s12440_s1 + $0x31c] ss:$48 sps:$4 sm:$0xff]   ;;  %v8702_v3 = vld [vmem:[%s12440_s1 + $0x310] ss:$48 sps:$4 sm:$0xff]  }
  0xbd   :  { %1645 = vmatprep.subr.bf16.mxu0 %v7120_v44  ;;  %1686 = vmatprep.subr.bf16.mxu1 %v7122_v45  ;;  %v8707_v4 = vld [vmem:[%s12440_s1 + $0x318] ss:$48 sps:$4 sm:$0xff]   ;;  %v8712_v7 = vld [vmem:[%s12440_s1 + $0x2c4] ss:$48 sps:$4 sm:$0xff]   ;;  %v8717_v5 = vld [vmem:[%s12440_s1 + $0x2cc] ss:$48 sps:$4 sm:$0xff]  }
  0xbe   :  { %v8726_v44 = vld [vmem:[%s12440_s1 + $0x2c0] ss:$48 sps:$4 sm:$0xff]   ;;  %v8731_v45 = vld [vmem:[%s12440_s1 + $0x2c8] ss:$48 sps:$4 sm:$0xff]   ;;  %v8892_v23 = vld [vmem:[%s12440_s1 + $0x2c] ss:$48 sps:$4 sm:$0xff]  }
  0xbf   :  { %12694 = vst [vmem:[#allocation19_spill] sm:$0xff] %v8892_v23  ;;  %v8900_v49 = vld [vmem:[%s12440_s1 + $0x20] ss:$48 sps:$4 sm:$0xff]   ;;  %v8905_v63 = vld [vmem:[%s12440_s1 + $0x28] ss:$48 sps:$4 sm:$0xff]  }
  0xc0   :  { %1646 = vmatpush1.bf16.msra.mxu0 %v7124_v8  ;;  %1687 = vmatpush1.bf16.msra.mxu1 %v7125_v11  ;;  %v8738_v8 = vld [vmem:[%s12440_s1 + $0x264] ss:$48 sps:$4 sm:$0xff]   ;;  %v8743_v11 = vld [vmem:[%s12440_s1 + $0x26c] ss:$48 sps:$4 sm:$0xff]   ;;  %12695 = vst [vmem:[#allocation20_spill] sm:$0xff] %v8900_v49  ;;  %12696 = vst [vmem:[#allocation21_spill] sm:$0xff] %v8905_v63 }
  0xc1   :  { %1647 = vmatprep.subr.bf16.mxu0 %v7126_v6  ;;  %1688 = vmatprep.subr.bf16.mxu1 %v7128_v10  ;;  %v8750_v6 = vld [vmem:[%s12440_s1 + $0x260] ss:$48 sps:$4 sm:$0xff]   ;;  %v8757_v10 = vld [vmem:[%s12440_s1 + $0x268] ss:$48 sps:$4 sm:$0xff]  }
  0xc2   :  { %v8910_v60 = vld [vmem:[%s12440_s1 + $0x5c4] ss:$48 sps:$4 sm:$0x1f]  }
  0xc4   :  { %1648 = vmatpush1.bf16.msra.mxu0 %v7130_v12  ;;  %1689 = vmatpush1.bf16.msra.mxu1 %v7131_v9  ;;  %v8765_v12 = vld [vmem:[%s12440_s1 + $0x204] ss:$48 sps:$4 sm:$0xff]   ;;  %v8773_v9 = vld [vmem:[%s12440_s1 + $0x20c] ss:$48 sps:$4 sm:$0xff]  }
  0xc5   :  { %1649 = vmatprep.subr.bf16.mxu0 %v7132_v54  ;;  %1690 = vmatprep.subr.bf16.mxu1 %v7134_v13  ;;  %v8780_v54 = vld [vmem:[%s12440_s1 + $0x200] ss:$48 sps:$4 sm:$0xff]   ;;  %v8785_v13 = vld [vmem:[%s12440_s1 + $0x208] ss:$48 sps:$4 sm:$0xff]  }
  0xc8   :  { %1650 = vmatpush1.bf16.msra.mxu0 %v7136_v16  ;;  %1691 = vmatpush1.bf16.msra.mxu1 %v7137_v17  ;;  %v8796_v16 = vld [vmem:[%s12440_s1 + $0x1ac] ss:$48 sps:$4 sm:$0xff]   ;;  %v8804_v17 = vld [vmem:[%s12440_s1 + $0x1a0] ss:$48 sps:$4 sm:$0xff]  }
  0xc9   :  { %1651 = vmatprep.subr.bf16.mxu0 %v7138_v18  ;;  %1692 = vmatprep.subr.bf16.mxu1 %v7140_v40  ;;  %v8809_v18 = vld [vmem:[%s12440_s1 + $0x1a8] ss:$48 sps:$4 sm:$0xff]   ;;  %v8814_v40 = vld [vmem:[%s12440_s1 + $0x144] ss:$48 sps:$4 sm:$0xff]  }
  0xcc   :  { %1652 = vmatpush1.bf16.msra.mxu0 %v7142_v52  ;;  %1693 = vmatpush1.bf16.msra.mxu1 %v7143_v20  ;;  %v8820_v52 = vld [vmem:[%s12440_s1 + $0x14c] ss:$48 sps:$4 sm:$0xff]   ;;  %v8828_v20 = vld [vmem:[%s12440_s1 + $0x140] ss:$48 sps:$4 sm:$0xff]  }
  0xcd   :  { %1653 = vmatprep.subr.bf16.mxu0 %v7144_v21  ;;  %1694 = vmatprep.subr.bf16.mxu1 %v7146_v1  ;;  %v8833_v21 = vld [vmem:[%s12440_s1 + $0x148] ss:$48 sps:$4 sm:$0xff]   ;;  %v8838_v1 = vld [vmem:[%s12440_s1 + $0xe4] ss:$48 sps:$4 sm:$0xff]  }
  0xd0   :  { %1654 = vmatpush1.bf16.msra.mxu0 %v7148_v19  ;;  %1695 = vmatpush1.bf16.msra.mxu1 %v7149_v0  ;;  %v8844_v19 = vld [vmem:[%s12440_s1 + $0xec] ss:$48 sps:$4 sm:$0xff]   ;;  %v8852_v0 = vld [vmem:[%s12440_s1 + $0xe0] ss:$48 sps:$4 sm:$0xff]  }
  0xd1   :  { %6099 = vmatprep.subr.msk.bf16.mxu0 %vm1520_vm0, %v7150_v24  ;;  %6101 = vmatprep.subr.msk.bf16.mxu1 %vm1520_vm0, %v7152_v42  ;;  %12688 = vst [vmem:[#allocation13_spill] sm:$0xff] %v8852_v0  ;;  %v8857_v24 = vld [vmem:[%s12440_s1 + $0xe8] ss:$48 sps:$4 sm:$0xff]   ;;  %v8862_v42 = vld [vmem:[%s12440_s1 + $0x84] ss:$48 sps:$4 sm:$0xff]  }
  0xd2   :  { %12689 = vst [vmem:[#allocation14_spill] sm:$0xff] %v8857_v24  ;;  %12690 = vst [vmem:[#allocation15_spill] sm:$0xff] %v8862_v42 }
  0xd4   :  { %1656 = vmatpush2.bf16.msra.mxu0 %v8406_v14  ;;  %1697 = vmatpush2.bf16.msra.mxu1 %v8409_v15 }
  0xd5   :  { %1657 = vmatprep.subr.bf16.mxu0 %v7156_v26  ;;  %1698 = vmatprep.subr.bf16.mxu1 %v7158_v27  ;;  %v8868_v26 = vld [vmem:[%s12440_s1 + $0x8c] ss:$48 sps:$4 sm:$0xff]   ;;  %v8876_v27 = vld [vmem:[%s12440_s1 + $0x80] ss:$48 sps:$4 sm:$0xff]  }
  0xd6   :  { %12691 = vst [vmem:[#allocation16_spill] sm:$0xff] %v8868_v26  ;;  %12692 = vst [vmem:[#allocation17_spill] sm:$0xff] %v8876_v27 }
  0xd8   :  { %1658 = vmatpush2.bf16.msra.mxu0 %v7160_v30  ;;  %1699 = vmatpush2.bf16.msra.mxu1 %v7161_v36  ;;  %v8881_v30 = vld [vmem:[%s12440_s1 + $0x88] ss:$48 sps:$4 sm:$0xff]   ;;  %v8886_v36 = vld [vmem:[%s12440_s1 + $0x24] ss:$48 sps:$4 sm:$0xff]  }
  0xd9   :  { %1659 = vmatprep.subr.bf16.mxu0 %v8572_v37  ;;  %1700 = vmatprep.subr.bf16.mxu1 %v8577_v43  ;;  %12693 = vst [vmem:[#allocation18_spill] sm:$0xff] %v8886_v36 }
  0xdc   :  { %1660 = vmatpush2.bf16.msra.mxu0 %v8584_v55  ;;  %1701 = vmatpush2.bf16.msra.mxu1 %v8589_v31 }
  0xdd   :  { %1661 = vmatprep.subr.bf16.mxu0 %v8594_v46  ;;  %1702 = vmatprep.subr.bf16.mxu1 %v8599_v39 }
  0xe0   :  { %1662 = vmatpush2.bf16.msra.mxu0 %v8606_v47  ;;  %1703 = vmatpush2.bf16.msra.mxu1 %v8611_v50 }
  0xe1   :  { %1663 = vmatprep.subr.bf16.mxu0 %v8616_v51  ;;  %1704 = vmatprep.subr.bf16.mxu1 %v8621_v28 }
  0xe4   :  { %1664 = vmatpush2.bf16.msra.mxu0 %v8630_v53  ;;  %1705 = vmatpush2.bf16.msra.mxu1 %v8635_v25 }
  0xe5   :  { %1665 = vmatprep.subr.bf16.mxu0 %v8640_v29  ;;  %1706 = vmatprep.subr.bf16.mxu1 %v8645_v32 }
  0xe8   :  { %1666 = vmatpush2.bf16.msra.mxu0 %v8654_v22  ;;  %1707 = vmatpush2.bf16.msra.mxu1 %v8659_v56 }
  0xe9   :  { %1667 = vmatprep.subr.bf16.mxu0 %v8664_v48  ;;  %1708 = vmatprep.subr.bf16.mxu1 %v8669_v57 }
  0xec   :  { %1668 = vmatpush2.bf16.msra.mxu0 %v8678_v61  ;;  %1709 = vmatpush2.bf16.msra.mxu1 %v8683_v41 }
  0xed   :  { %1669 = vmatprep.subr.bf16.mxu0 %v8688_v62  ;;  %1710 = vmatprep.subr.bf16.mxu1 %v8693_v2 }
  0xf0   :  { %1670 = vmatpush2.bf16.msra.mxu0 %v8702_v3  ;;  %1711 = vmatpush2.bf16.msra.mxu1 %v8707_v4 }
  0xf1   :  { %1721 = vmatprep.subr.bf16.mxu0 %v8712_v7  ;;  %1762 = vmatprep.subr.bf16.mxu1 %v8717_v5 }
  0xf3   :  { %1672 = vmatmul.mubr.bf16.vlgmr.msra.gmra.mxu0 %v8444_v59  ;;  %1713 = vmatmul.mubr.bf16.vlgmr.msra.gmra.mxu1 %v8444_v59 }
  0xf4   :  { %1722 = vmatpush1.bf16.msra.mxu0 %v8726_v44  ;;  %6104 = vmatprep.mubr.msk.bf16.mxu0 %vm1516_vm12, %v8432_v38 }
  0xf5   :  { %1763 = vmatpush1.bf16.msra.mxu1 %v8731_v45  ;;  %6106 = vmatprep.mubr.msk.bf16.mxu1 %vm1516_vm12, %v8432_v38  ;;  %v8790_v38 = vld [vmem:[%s12440_s1 + $0x1a4] ss:$48 sps:$4 sm:$0xff]  }
  0xf6   :  { %1723 = vmatprep.subr.bf16.mxu0 %v8738_v8  ;;  %1764 = vmatprep.subr.bf16.mxu1 %v8743_v11 }
  0xf8   :  { %1724 = vmatpush1.bf16.msra.mxu0 %v8750_v6 }
  0xf9   :  { %1765 = vmatpush1.bf16.msra.mxu1 %v8757_v10  ;;  %1725 = vmatprep.subr.bf16.mxu0 %v8765_v12 }
  0xfa   :  { %1766 = vmatprep.subr.bf16.mxu1 %v8773_v9 }
  0xfc   :  { %1726 = vmatpush1.bf16.msra.mxu0 %v8780_v54 }
  0xfd   :  { %1767 = vmatpush1.bf16.msra.mxu1 %v8785_v13  ;;  %1727 = vmatprep.subr.bf16.mxu0 %v8790_v38 }
  0xfe   :  { %1768 = vmatprep.subr.bf16.mxu1 %v8796_v16 }
 0x100   :  { %1728 = vmatpush1.bf16.msra.mxu0 %v8804_v17 }
 0x101   :  { %1769 = vmatpush1.bf16.msra.mxu1 %v8809_v18  ;;  %1729 = vmatprep.subr.bf16.mxu0 %v8814_v40 }
 0x102   :  { %1770 = vmatprep.subr.bf16.mxu1 %v8820_v52 }
 0x104   :  { %1730 = vmatpush1.bf16.msra.mxu0 %v8828_v20 }
 0x105   :  { %1771 = vmatpush1.bf16.msra.mxu1 %v8833_v21  ;;  %1731 = vmatprep.subr.bf16.mxu0 %v8838_v1 }
 0x106   :  { %1772 = vmatprep.subr.bf16.mxu1 %v8844_v19 }
 0x108   :  { %1732 = vmatpush1.bf16.msra.mxu0 %v8852_v0  ;;  %v8930_v0 = vld [vmem:[%s12440_s1 + $0x564] ss:$48 sps:$4 sm:$0xff]  }
 0x109   :  { %1773 = vmatpush1.bf16.msra.mxu1 %v8857_v24  ;;  %1733 = vmatprep.subr.bf16.mxu0 %v8862_v42  ;;  %v7250_v42 = vld [vmem:[%s12440_s1 + $0x5c0] ss:$48 sps:$4 sm:$0x1f]   ;;  %v7251_v24 = vld [vmem:[%s12440_s1 + $0x5c8] ss:$48 sps:$4 sm:$0x1f]  }
 0x10a   :  { %1774 = vmatprep.subr.bf16.mxu1 %v8868_v26  ;;  %v8919_v26 = vld [vmem:[%s12440_s1 + $0x5cc] ss:$48 sps:$4 sm:$0x1f]   ;;  %12698 = vst [vmem:[#allocation23_spill] sm:$0xff] %v8930_v0 }
 0x10b   :  { %12697 = vst [vmem:[#allocation22_spill] sm:$0xff] %v8919_v26 }
 0x10c   :  { %1734 = vmatpush1.bf16.msra.mxu0 %v8876_v27  ;;  %v8936_v27 = vld [vmem:[%s12440_s1 + $0x56c] ss:$48 sps:$4 sm:$0xff]  }
 0x10d   :  { %1775 = vmatpush1.bf16.msra.mxu1 %v8881_v30  ;;  %1735 = vmatprep.subr.bf16.mxu0 %v8886_v36  ;;  %12699 = vst [vmem:[#allocation24_spill] sm:$0xff] %v8936_v27  ;;  %v8942_v36 = vsel %vm1520_vm0, %v7250_v42, 0  ;;  %v8962_v42 = vld [vmem:[%s12440_s1 + $0x504] ss:$48 sps:$4 sm:$0xff]  }
 0x10e   :  { %1776 = vmatprep.subr.bf16.mxu1 %v8892_v23  ;;  %12700 = vst [vmem:[#allocation25_spill] sm:$0xff] %v8942_v36  ;;  %v8947_v23 = vsel %vm1520_vm0, %v7251_v24, 0  ;;  %12704 = vst [vmem:[#allocation29_spill] sm:$0xff] %v8962_v42  ;;  %v8971_v24 = vld [vmem:[%s12440_s1 + $0x50c] ss:$48 sps:$4 sm:$0xff]  }
 0x10f   :  { %12701 = vst [vmem:[#allocation26_spill] sm:$0xff] %v8947_v23  ;;  %12705 = vst [vmem:[#allocation30_spill] sm:$0xff] %v8971_v24 }
 0x110   :  { %1736 = vmatpush1.bf16.msra.mxu0 %v8900_v49  ;;  %v8952_v49 = vld [vmem:[%s12440_s1 + $0x560] ss:$48 sps:$4 sm:$0xff]  }
 0x111   :  { %1777 = vmatpush1.bf16.msra.mxu1 %v8905_v63  ;;  %6103 = vmatprep.subr.msk.bf16.mxu0 %vm1520_vm0, %v8910_v60  ;;  %12702 = vst [vmem:[#allocation27_spill] sm:$0xff] %v8952_v49  ;;  %v8957_v63 = vld [vmem:[%s12440_s1 + $0x568] ss:$48 sps:$4 sm:$0xff]  }
 0x112   :  { %6105 = vmatprep.subr.msk.bf16.mxu1 %vm1520_vm0, %v8919_v26  ;;  %12703 = vst [vmem:[#allocation28_spill] sm:$0xff] %v8957_v63 }
 0x114   :  { %1738 = vmatpush2.bf16.msra.mxu0 %v8942_v36 }
 0x115   :  { %1779 = vmatpush2.bf16.msra.mxu1 %v8947_v23  ;;  %1739 = vmatprep.subr.bf16.mxu0 %v8930_v0 }
 0x116   :  { %1780 = vmatprep.subr.bf16.mxu1 %v8936_v27 }
 0x117   :  { %18 = vsyncpa [#allocation3], 0  ;;  %v8977_v26 = vld [vmem:[%s12440_s1 + $0x500] ss:$48 sps:$4 sm:$0xff]   ;;  %v8984_v27 = vld [vmem:[%s12440_s1 + $0x508] ss:$48 sps:$4 sm:$0xff]  }
 0x118   :  { %1740 = vmatpush2.bf16.msra.mxu0 %v8952_v49  ;;  %12706 = vst [vmem:[#allocation31_spill] sm:$0xff] %v8977_v26  ;;  %12707 = vst [vmem:[#allocation32_spill] sm:$0xff] %v8984_v27  ;;  %v8989_v0 = vld [vmem:[%s12440_s1 + $0x4a4] ss:$48 sps:$4 sm:$0xff]   ;;  %v8995_v49 = vld [vmem:[%s12440_s1 + $0x4ac] ss:$48 sps:$4 sm:$0xff]  }
 0x119   :  { %1781 = vmatpush2.bf16.msra.mxu1 %v8957_v63  ;;  %1741 = vmatprep.subr.bf16.mxu0 %v8962_v42  ;;  %12708 = vst [vmem:[#allocation33_spill] sm:$0xff] %v8989_v0  ;;  %12709 = vst [vmem:[#allocation34_spill] sm:$0xff] %v8995_v49  ;;  %v9001_v42 = vld [vmem:[%s12440_s1 + $0x4a0] ss:$48 sps:$4 sm:$0xff]   ;;  %v9013_v63 = vld [vmem:[%s12440_s1 + $0x444] ss:$48 sps:$4 sm:$0xff]  }
 0x11a   :  { %1782 = vmatprep.subr.bf16.mxu1 %v8971_v24  ;;  %12710 = vst [vmem:[#allocation35_spill] sm:$0xff] %v9001_v42  ;;  %v9008_v24 = vld [vmem:[%s12440_s1 + $0x4a8] ss:$48 sps:$4 sm:$0xff]   ;;  %12712 = vst [vmem:[#allocation37_spill] sm:$0xff] %v9013_v63  ;;  %s7884_s0 = smov 96   ;;  %vm2679_vm13 = vcmask 785408  }
 0x11b   :  { %12711 = vst [vmem:[#allocation36_spill] sm:$0xff] %v9008_v24  ;;  %vm3673_vm14 = vcmask 261120   ;;  %vm4974_vm15 = vcmask 523264   ;;  %vm5354_vm1 = vcmask 1043456   ;;  %vm5356_vm2 = vcmask 1045504  }
 0x11c   :  { %1742 = vmatpush2.bf16.msra.mxu0 %v8977_v26  ;;  %v9019_v26 = vld [vmem:[%s12440_s1 + $0x44c] ss:$48 sps:$4 sm:$0xff]   ;;  %vm7888_vm3 = vmmov 0   ;;  %vm5887_vm4 = vcmask 9216  }
 0x11d   :  { %1783 = vmatpush2.bf16.msra.mxu1 %v8984_v27  ;;  %1743 = vmatprep.subr.bf16.mxu0 %v8989_v0  ;;  %12713 = vst [vmem:[#allocation38_spill] sm:$0xff] %v9019_v26  ;;  %v9025_v0 = vld [vmem:[%s12440_s1 + $0x440] ss:$48 sps:$4 sm:$0xff]   ;;  %v9037_v27 = vld [vmem:[%s12440_s1 + $0x3e4] ss:$48 sps:$4 sm:$0xff]  }
 0x11e   :  { %1784 = vmatprep.subr.bf16.mxu1 %v8995_v49  ;;  %12714 = vst [vmem:[#allocation39_spill] sm:$0xff] %v9025_v0  ;;  %v9032_v49 = vld [vmem:[%s12440_s1 + $0x448] ss:$48 sps:$4 sm:$0xff]   ;;  %12716 = vst [vmem:[#allocation41_spill] sm:$0xff] %v9037_v27 }
 0x11f   :  { %12715 = vst [vmem:[#allocation40_spill] sm:$0xff] %v9032_v49 }
 0x120   :  { %1744 = vmatpush2.bf16.msra.mxu0 %v9001_v42  ;;  %v9043_v42 = vld [vmem:[%s12440_s1 + $0x3ec] ss:$48 sps:$4 sm:$0xff]  }
 0x121   :  { %1785 = vmatpush2.bf16.msra.mxu1 %v9008_v24  ;;  %1745 = vmatprep.subr.bf16.mxu0 %v9013_v63  ;;  %12717 = vst [vmem:[#allocation42_spill] sm:$0xff] %v9043_v42  ;;  %v9049_v63 = vld [vmem:[%s12440_s1 + $0x3e0] ss:$48 sps:$4 sm:$0xff]   ;;  %v9061_v24 = vld [vmem:[%s12440_s1 + $0x384] ss:$48 sps:$4 sm:$0xff]  }
 0x122   :  { %1786 = vmatprep.subr.bf16.mxu1 %v9019_v26  ;;  %12718 = vst [vmem:[#allocation43_spill] sm:$0xff] %v9049_v63  ;;  %v9056_v26 = vld [vmem:[%s12440_s1 + $0x3e8] ss:$48 sps:$4 sm:$0xff]   ;;  %12719 = vst [vmem:[#allocation44_spill] sm:$0xff] %v9061_v24 }
 0x124   :  { %1746 = vmatpush2.bf16.msra.mxu0 %v9025_v0  ;;  %v9067_v0 = vld [vmem:[%s12440_s1 + $0x38c] ss:$48 sps:$4 sm:$0xff]  }
 0x125   :  { %1787 = vmatpush2.bf16.msra.mxu1 %v9032_v49  ;;  %1747 = vmatprep.subr.bf16.mxu0 %v9037_v27  ;;  %12720 = vst [vmem:[#allocation45_spill] sm:$0xff] %v9067_v0  ;;  %v9073_v27 = vld [vmem:[%s12440_s1 + $0x380] ss:$48 sps:$4 sm:$0xff]   ;;  %v9085_v49 = vld [vmem:[%s12440_s1 + $0x324] ss:$48 sps:$4 sm:$0xff]  }
 0x126   :  { %1788 = vmatprep.subr.bf16.mxu1 %v9043_v42  ;;  %12721 = vst [vmem:[#allocation46_spill] sm:$0xff] %v9073_v27  ;;  %v9080_v42 = vld [vmem:[%s12440_s1 + $0x388] ss:$48 sps:$4 sm:$0xff]   ;;  %12722 = vst [vmem:[#allocation47_spill] sm:$0xff] %v9085_v49 }
 0x128   :  { %1748 = vmatpush2.bf16.msra.mxu0 %v9049_v63  ;;  %v9091_v63 = vld [vmem:[%s12440_s1 + $0x32c] ss:$48 sps:$4 sm:$0xff]  }
 0x129   :  { %1789 = vmatpush2.bf16.msra.mxu1 %v9056_v26  ;;  %1749 = vmatprep.subr.bf16.mxu0 %v9061_v24  ;;  %12723 = vst [vmem:[#allocation48_spill] sm:$0xff] %v9091_v63  ;;  %v9097_v24 = vld [vmem:[%s12440_s1 + $0x320] ss:$48 sps:$4 sm:$0xff]  }
 0x12a   :  { %1790 = vmatprep.subr.bf16.mxu1 %v9067_v0  ;;  %12724 = vst [vmem:[#allocation49_spill] sm:$0xff] %v9097_v24  ;;  %v9104_v0 = vld [vmem:[%s12440_s1 + $0x328] ss:$48 sps:$4 sm:$0xff]  }
 0x12b   :  { %12725 = vst [vmem:[#allocation50_spill] sm:$0xff] %v9104_v0 }
 0x12c   :  { %1750 = vmatpush2.bf16.msra.mxu0 %v9073_v27  ;;  %v9112_v27 = vld [vmem:[%s12440_s1 + $0x2a4] ss:$48 sps:$4 sm:$0xff]  }
 0x12d   :  { %1791 = vmatpush2.bf16.msra.mxu1 %v9080_v42  ;;  %1751 = vmatprep.subr.bf16.mxu0 %v9085_v49  ;;  %12726 = vst [vmem:[#allocation51_spill] sm:$0xff] %v9112_v27  ;;  %v9118_v49 = vld [vmem:[%s12440_s1 + $0x2ac] ss:$48 sps:$4 sm:$0xff]  }
 0x12e   :  { %1792 = vmatprep.subr.bf16.mxu1 %v9091_v63  ;;  %12727 = vst [vmem:[#allocation52_spill] sm:$0xff] %v9118_v49 }
 0x130   :  { %1752 = vmatpush2.bf16.msra.mxu0 %v9097_v24  ;;  %v9124_v24 = vpack.c.b16 %v8429_v35, %v8429_v35  ;;  %v9146_v35 = vld [vmem:[%s12440_s1 + $0x244] ss:$48 sps:$4 sm:$0xff]  }
 0x131   :  { %1793 = vmatpush2.bf16.msra.mxu1 %v9104_v0  ;;  %1837 = vmatprep.subr.bf16.mxu0 %v9112_v27  ;;  %v9130_v0 = vld [vmem:[%s12440_s1 + $0x2a0] ss:$48 sps:$4 sm:$0xff]   ;;  %12730 = vst [vmem:[#allocation55_spill] sm:$0xff] %v9146_v35 }
 0x132   :  { %1878 = vmatprep.subr.bf16.mxu1 %v9118_v49  ;;  %12728 = vst [vmem:[#allocation53_spill] sm:$0xff] %v9130_v0  ;;  %v9138_v49 = vld [vmem:[%s12440_s1 + $0x2a8] ss:$48 sps:$4 sm:$0xff]  }
 0x133   :  { %1754 = vmatmul.mubr.bf16.vlgmr.msra.gmra.mxu0 %v8444_v59  ;;  %12729 = vst [vmem:[#allocation54_spill] sm:$0xff] %v9138_v49 }
 0x134   :  { %1795 = vmatmul.mubr.bf16.vlgmr.msra.gmra.mxu1 %v8444_v59  ;;  %1838 = vmatpush1.bf16.msra.mxu0 %v9130_v0  ;;  %v9152_v59 = vld [vmem:[%s12440_s1 + $0x24c] ss:$48 sps:$4 sm:$0xff]   ;;  %v9164_v0 = vld [vmem:[%s12440_s1 + $0x248] ss:$48 sps:$4 sm:$0xff]  }
 0x135   :  { %6108 = vmatprep.mubr.msk.bf16.mxu0 %vm1516_vm12, %v9124_v24  ;;  %1879 = vmatpush1.bf16.msra.mxu1 %v9138_v49  ;;  %12731 = vst [vmem:[#allocation56_spill] sm:$0xff] %v9152_v59  ;;  %v9158_v49 = vld [vmem:[%s12440_s1 + $0x240] ss:$48 sps:$4 sm:$0xff]   ;;  %12733 = vst [vmem:[#allocation58_spill] sm:$0xff] %v9164_v0 }
 0x136   :  { %6110 = vmatprep.mubr.msk.bf16.mxu1 %vm1516_vm12, %v9124_v24  ;;  %1839 = vmatprep.subr.bf16.mxu0 %v9146_v35  ;;  %12732 = vst [vmem:[#allocation57_spill] sm:$0xff] %v9158_v49  ;;  %v9170_v35 = vld [vmem:[%s12440_s1 + $0x1e4] ss:$48 sps:$4 sm:$0xff]  }
 0x137   :  { %1880 = vmatprep.subr.bf16.mxu1 %v9152_v59  ;;  %12734 = vst [vmem:[#allocation59_spill] sm:$0xff] %v9170_v35  ;;  %v9176_v59 = vld [vmem:[%s12440_s1 + $0x1ec] ss:$48 sps:$4 sm:$0xff]  }
 0x138   :  { %1840 = vmatpush1.bf16.msra.mxu0 %v9158_v49  ;;  %12735 = vst [vmem:[#allocation60_spill] sm:$0xff] %v9176_v59  ;;  %v9182_v49 = vld [vmem:[%s12440_s1 + $0x1e0] ss:$48 sps:$4 sm:$0xff]  }
 0x139   :  { %1881 = vmatpush1.bf16.msra.mxu1 %v9164_v0  ;;  %1841 = vmatprep.subr.bf16.mxu0 %v9170_v35  ;;  %12736 = vst [vmem:[#allocation61_spill] sm:$0xff] %v9182_v49  ;;  %v9188_v0 = vld [vmem:[%s12440_s1 + $0x1e8] ss:$48 sps:$4 sm:$0xff]   ;;  %v9194_v35 = vld [vmem:[%s12440_s1 + $0x184] ss:$48 sps:$4 sm:$0xff]  }
 0x13a   :  { %1882 = vmatprep.subr.bf16.mxu1 %v9176_v59  ;;  %12737 = vst [vmem:[#allocation62_spill] sm:$0xff] %v9188_v0  ;;  %12738 = vst [vmem:[#allocation63_spill] sm:$0xff] %v9194_v35  ;;  %v9200_v59 = vld [vmem:[%s12440_s1 + $0x18c] ss:$48 sps:$4 sm:$0xff]  }
 0x13b   :  { %12739 = vst [vmem:[#allocation64_spill] sm:$0xff] %v9200_v59 }
 0x13c   :  { %1842 = vmatpush1.bf16.msra.mxu0 %v9182_v49  ;;  %v9206_v49 = vld [vmem:[%s12440_s1 + $0x180] ss:$48 sps:$4 sm:$0xff]  }
 0x13d   :  { %1883 = vmatpush1.bf16.msra.mxu1 %v9188_v0  ;;  %1843 = vmatprep.subr.bf16.mxu0 %v9194_v35  ;;  %12740 = vst [vmem:[#allocation65_spill] sm:$0xff] %v9206_v49  ;;  %v9212_v0 = vld [vmem:[%s12440_s1 + $0x188] ss:$48 sps:$4 sm:$0xff]   ;;  %v9218_v35 = vld [vmem:[%s12440_s1 + $0x124] ss:$48 sps:$4 sm:$0xff]  }
 0x13e   :  { %1884 = vmatprep.subr.bf16.mxu1 %v9200_v59  ;;  %12741 = vst [vmem:[#allocation66_spill] sm:$0xff] %v9212_v0  ;;  %12742 = vst [vmem:[#allocation67_spill] sm:$0xff] %v9218_v35  ;;  %v9224_v59 = vld [vmem:[%s12440_s1 + $0x12c] ss:$48 sps:$4 sm:$0xff]  }
 0x13f   :  { %12743 = vst [vmem:[#allocation68_spill] sm:$0xff] %v9224_v59 }
 0x140   :  { %1844 = vmatpush1.bf16.msra.mxu0 %v9206_v49  ;;  %v9230_v49 = vld [vmem:[%s12440_s1 + $0x120] ss:$48 sps:$4 sm:$0xff]  }
 0x141   :  { %1885 = vmatpush1.bf16.msra.mxu1 %v9212_v0  ;;  %1845 = vmatprep.subr.bf16.mxu0 %v9218_v35  ;;  %12744 = vst [vmem:[#allocation69_spill] sm:$0xff] %v9230_v49  ;;  %v9236_v0 = vld [vmem:[%s12440_s1 + $0x128] ss:$48 sps:$4 sm:$0xff]   ;;  %v9242_v35 = vld [vmem:[%s12440_s1 + $0xc4] ss:$48 sps:$4 sm:$0xff]  }
 0x142   :  { %1886 = vmatprep.subr.bf16.mxu1 %v9224_v59  ;;  %12745 = vst [vmem:[#allocation70_spill] sm:$0xff] %v9236_v0  ;;  %12746 = vst [vmem:[#allocation71_spill] sm:$0xff] %v9242_v35  ;;  %v9248_v59 = vld [vmem:[%s12440_s1 + $0xcc] ss:$48 sps:$4 sm:$0xff]  }
 0x143   :  { %12747 = vst [vmem:[#allocation72_spill] sm:$0xff] %v9248_v59 }
 0x144   :  { %1846 = vmatpush1.bf16.msra.mxu0 %v9230_v49  ;;  %v9254_v49 = vld [vmem:[%s12440_s1 + $0xc0] ss:$48 sps:$4 sm:$0xff]  }
 0x145   :  { %1887 = vmatpush1.bf16.msra.mxu1 %v9236_v0  ;;  %1847 = vmatprep.subr.bf16.mxu0 %v9242_v35  ;;  %12748 = vst [vmem:[#allocation73_spill] sm:$0xff] %v9254_v49  ;;  %v9260_v0 = vld [vmem:[%s12440_s1 + $0xc8] ss:$48 sps:$4 sm:$0xff]   ;;  %v9266_v35 = vld [vmem:[%s12440_s1 + $0x64] ss:$48 sps:$4 sm:$0xff]  }
 0x146   :  { %1888 = vmatprep.subr.bf16.mxu1 %v9248_v59  ;;  %12749 = vst [vmem:[#allocation74_spill] sm:$0xff] %v9260_v0  ;;  %12750 = vst [vmem:[#allocation75_spill] sm:$0xff] %v9266_v35  ;;  %v9272_v59 = vld [vmem:[%s12440_s1 + $0x6c] ss:$48 sps:$4 sm:$0xff]  }
 0x147   :  { %12751 = vst [vmem:[#allocation76_spill] sm:$0xff] %v9272_v59 }
 0x148   :  { %1848 = vmatpush1.bf16.msra.mxu0 %v9254_v49  ;;  %v9278_v49 = vld [vmem:[%s12440_s1 + $0x60] ss:$48 sps:$4 sm:$0xff]  }
 0x149   :  { %1889 = vmatpush1.bf16.msra.mxu1 %v9260_v0  ;;  %1849 = vmatprep.subr.bf16.mxu0 %v9266_v35  ;;  %12752 = vst [vmem:[#allocation77_spill] sm:$0xff] %v9278_v49  ;;  %v9284_v0 = vld [vmem:[%s12440_s1 + $0x68] ss:$48 sps:$4 sm:$0xff]   ;;  %v9290_v35 = vld [vmem:[%s12440_s1 + $0x4] ss:$48 sps:$4 sm:$0xff]  }
 0x14a   :  { %1890 = vmatprep.subr.bf16.mxu1 %v9272_v59  ;;  %12753 = vst [vmem:[#allocation78_spill] sm:$0xff] %v9284_v0  ;;  %12754 = vst [vmem:[#allocation79_spill] sm:$0xff] %v9290_v35  ;;  %v9296_v59 = vld [vmem:[%s12440_s1 + $0xc] ss:$48 sps:$4 sm:$0xff]  }
 0x14b   :  { %12755 = vst [vmem:[#allocation80_spill] sm:$0xff] %v9296_v59 }
 0x14c   :  { %1850 = vmatpush1.bf16.msra.mxu0 %v9278_v49  ;;  %v9302_v49 = vld [vmem:[%s12440_s1] ss:$48 sps:$4 sm:$0xff]  }
 0x14d   :  { %1891 = vmatpush1.bf16.msra.mxu1 %v9284_v0  ;;  %1851 = vmatprep.subr.bf16.mxu0 %v9290_v35  ;;  %12756 = vst [vmem:[#allocation81_spill] sm:$0xff] %v9302_v49  ;;  %v9308_v0 = vld [vmem:[%s12440_s1 + $0x8] ss:$48 sps:$4 sm:$0xff]   ;;  %v9314_v35 = vld [vmem:[%s12440_s1 + $0x5a4] ss:$48 sps:$4 sm:$0x1f]  }
 0x14e   :  { %1892 = vmatprep.subr.bf16.mxu1 %v9296_v59  ;;  %12757 = vst [vmem:[#allocation82_spill] sm:$0xff] %v9308_v0  ;;  %12758 = vst [vmem:[#allocation83_spill] sm:$0xff] %v9314_v35  ;;  %v9321_v59 = vld [vmem:[%s12440_s1 + $0x5ac] ss:$48 sps:$4 sm:$0x1f]  }
 0x14f   :  { %12759 = vst [vmem:[#allocation84_spill] sm:$0xff] %v9321_v59 }
 0x150   :  { %1852 = vmatpush1.bf16.msra.mxu0 %v9302_v49  ;;  %v9552_v49 = vld [vmem:[%s12440_s1 + $0x250] ss:$48 sps:$4 sm:$0xff]  }
 0x151   :  { %1893 = vmatpush1.bf16.msra.mxu1 %v9308_v0  ;;  %6107 = vmatprep.subr.msk.bf16.mxu0 %vm1520_vm0, %v9314_v35  ;;  %v9330_v0 = vld [vmem:[%s12440_s1 + $0x544] ss:$48 sps:$4 sm:$0xff]   ;;  %v9336_v35 = vld [vmem:[%s12440_s1 + $0x54c] ss:$48 sps:$4 sm:$0xff]  }
 0x152   :  { %6109 = vmatprep.subr.msk.bf16.mxu1 %vm1520_vm0, %v9321_v59  ;;  %12760 = vst [vmem:[#allocation85_spill] sm:$0xff] %v9330_v0  ;;  %12761 = vst [vmem:[#allocation86_spill] sm:$0xff] %v9336_v35  ;;  %v9520_v59 = vld [vmem:[%s12440_s1 + $0x2b0] ss:$48 sps:$4 sm:$0xff]  }
 0x153   :  { %12792 = vst [vmem:[#allocation117_spill] sm:$0xff] %v9520_v59 }
 0x154   :  { %1854 = vmatpush2.bf16.msra.mxu0 %v8150_v33  ;;  %v9342_v33 = vld [vmem:[%s12440_s1 + $0x540] ss:$48 sps:$4 sm:$0xff]  }
 0x155   :  { %1895 = vmatpush2.bf16.msra.mxu1 %v8153_v34  ;;  %1855 = vmatprep.subr.bf16.mxu0 %v9330_v0  ;;  %12762 = vst [vmem:[#allocation87_spill] sm:$0xff] %v9342_v33  ;;  %v9348_v34 = vld [vmem:[%s12440_s1 + $0x548] ss:$48 sps:$4 sm:$0xff]   ;;  %v9354_v0 = vld [vmem:[%s12440_s1 + $0x4e4] ss:$48 sps:$4 sm:$0xff]  }
 0x156   :  { %1896 = vmatprep.subr.bf16.mxu1 %v9336_v35  ;;  %12763 = vst [vmem:[#allocation88_spill] sm:$0xff] %v9348_v34  ;;  %12764 = vst [vmem:[#allocation89_spill] sm:$0xff] %v9354_v0  ;;  %v9360_v35 = vld [vmem:[%s12440_s1 + $0x4ec] ss:$48 sps:$4 sm:$0xff]  }
 0x157   :  { %12765 = vst [vmem:[#allocation90_spill] sm:$0xff] %v9360_v35 }
 0x158   :  { %1856 = vmatpush2.bf16.msra.mxu0 %v9342_v33  ;;  %v9366_v33 = vld [vmem:[%s12440_s1 + $0x4e0] ss:$48 sps:$4 sm:$0xff]  }
 0x159   :  { %1897 = vmatpush2.bf16.msra.mxu1 %v9348_v34  ;;  %1857 = vmatprep.subr.bf16.mxu0 %v9354_v0  ;;  %12766 = vst [vmem:[#allocation91_spill] sm:$0xff] %v9366_v33  ;;  %v9372_v34 = vld [vmem:[%s12440_s1 + $0x4e8] ss:$48 sps:$4 sm:$0xff]   ;;  %v9378_v0 = vld [vmem:[%s12440_s1 + $0x484] ss:$48 sps:$4 sm:$0xff]  }
 0x15a   :  { %1898 = vmatprep.subr.bf16.mxu1 %v9360_v35  ;;  %12767 = vst [vmem:[#allocation92_spill] sm:$0xff] %v9372_v34  ;;  %12768 = vst [vmem:[#allocation93_spill] sm:$0xff] %v9378_v0  ;;  %v9384_v35 = vld [vmem:[%s12440_s1 + $0x48c] ss:$48 sps:$4 sm:$0xff]  }
 0x15b   :  { %12769 = vst [vmem:[#allocation94_spill] sm:$0xff] %v9384_v35 }
 0x15c   :  { %1858 = vmatpush2.bf16.msra.mxu0 %v9366_v33  ;;  %v9390_v33 = vld [vmem:[%s12440_s1 + $0x480] ss:$48 sps:$4 sm:$0xff]  }
 0x15d   :  { %1899 = vmatpush2.bf16.msra.mxu1 %v9372_v34  ;;  %1859 = vmatprep.subr.bf16.mxu0 %v9378_v0  ;;  %12770 = vst [vmem:[#allocation95_spill] sm:$0xff] %v9390_v33  ;;  %v9396_v34 = vld [vmem:[%s12440_s1 + $0x488] ss:$48 sps:$4 sm:$0xff]   ;;  %v9402_v0 = vld [vmem:[%s12440_s1 + $0x424] ss:$48 sps:$4 sm:$0xff]  }
 0x15e   :  { %1900 = vmatprep.subr.bf16.mxu1 %v9384_v35  ;;  %12771 = vst [vmem:[#allocation96_spill] sm:$0xff] %v9396_v34  ;;  %12772 = vst [vmem:[#allocation97_spill] sm:$0xff] %v9402_v0  ;;  %v9408_v35 = vld [vmem:[%s12440_s1 + $0x42c] ss:$48 sps:$4 sm:$0xff]  }
 0x15f   :  { %12773 = vst [vmem:[#allocation98_spill] sm:$0xff] %v9408_v35 }
 0x160   :  { %1860 = vmatpush2.bf16.msra.mxu0 %v9390_v33  ;;  %v9414_v33 = vld [vmem:[%s12440_s1 + $0x420] ss:$48 sps:$4 sm:$0xff]  }
 0x161   :  { %1901 = vmatpush2.bf16.msra.mxu1 %v9396_v34  ;;  %1861 = vmatprep.subr.bf16.mxu0 %v9402_v0  ;;  %12774 = vst [vmem:[#allocation99_spill] sm:$0xff] %v9414_v33  ;;  %v9420_v34 = vld [vmem:[%s12440_s1 + $0x428] ss:$48 sps:$4 sm:$0xff]   ;;  %v9426_v0 = vld [vmem:[%s12440_s1 + $0x3c4] ss:$48 sps:$4 sm:$0xff]  }
 0x162   :  { %1902 = vmatprep.subr.bf16.mxu1 %v9408_v35  ;;  %12775 = vst [vmem:[#allocation100_spill] sm:$0xff] %v9420_v34  ;;  %12776 = vst [vmem:[#allocation101_spill] sm:$0xff] %v9426_v0  ;;  %v9432_v35 = vld [vmem:[%s12440_s1 + $0x3cc] ss:$48 sps:$4 sm:$0xff]  }
 0x163   :  { %12777 = vst [vmem:[#allocation102_spill] sm:$0xff] %v9432_v35 }
 0x164   :  { %1862 = vmatpush2.bf16.msra.mxu0 %v9414_v33  ;;  %v9438_v33 = vld [vmem:[%s12440_s1 + $0x3c0] ss:$48 sps:$4 sm:$0xff]  }
 0x165   :  { %1903 = vmatpush2.bf16.msra.mxu1 %v9420_v34  ;;  %1863 = vmatprep.subr.bf16.mxu0 %v9426_v0  ;;  %12778 = vst [vmem:[#allocation103_spill] sm:$0xff] %v9438_v33  ;;  %v9444_v34 = vld [vmem:[%s12440_s1 + $0x3c8] ss:$48 sps:$4 sm:$0xff]   ;;  %v9450_v0 = vld [vmem:[%s12440_s1 + $0x364] ss:$48 sps:$4 sm:$0xff]  }
 0x166   :  { %1904 = vmatprep.subr.bf16.mxu1 %v9432_v35  ;;  %12779 = vst [vmem:[#allocation104_spill] sm:$0xff] %v9444_v34  ;;  %12780 = vst [vmem:[#allocation105_spill] sm:$0xff] %v9450_v0  ;;  %v9456_v35 = vld [vmem:[%s12440_s1 + $0x36c] ss:$48 sps:$4 sm:$0xff]  }
 0x167   :  { %12781 = vst [vmem:[#allocation106_spill] sm:$0xff] %v9456_v35 }
 0x168   :  { %1864 = vmatpush2.bf16.msra.mxu0 %v9438_v33  ;;  %v9462_v33 = vld [vmem:[%s12440_s1 + $0x360] ss:$48 sps:$4 sm:$0xff]  }
 0x169   :  { %1905 = vmatpush2.bf16.msra.mxu1 %v9444_v34  ;;  %1865 = vmatprep.subr.bf16.mxu0 %v9450_v0  ;;  %12782 = vst [vmem:[#allocation107_spill] sm:$0xff] %v9462_v33  ;;  %v9468_v34 = vld [vmem:[%s12440_s1 + $0x368] ss:$48 sps:$4 sm:$0xff]   ;;  %v9474_v0 = vld [vmem:[%s12440_s1 + $0x304] ss:$48 sps:$4 sm:$0xff]  }
 0x16a   :  { %1906 = vmatprep.subr.bf16.mxu1 %v9456_v35  ;;  %12783 = vst [vmem:[#allocation108_spill] sm:$0xff] %v9468_v34  ;;  %12784 = vst [vmem:[#allocation109_spill] sm:$0xff] %v9474_v0  ;;  %v9480_v35 = vld [vmem:[%s12440_s1 + $0x30c] ss:$48 sps:$4 sm:$0xff]  }
 0x16b   :  { %12785 = vst [vmem:[#allocation110_spill] sm:$0xff] %v9480_v35 }
 0x16c   :  { %1866 = vmatpush2.bf16.msra.mxu0 %v9462_v33  ;;  %v9486_v33 = vld [vmem:[%s12440_s1 + $0x300] ss:$48 sps:$4 sm:$0xff]  }
 0x16d   :  { %1907 = vmatpush2.bf16.msra.mxu1 %v9468_v34  ;;  %1867 = vmatprep.subr.bf16.mxu0 %v9474_v0  ;;  %12786 = vst [vmem:[#allocation111_spill] sm:$0xff] %v9486_v33  ;;  %v9492_v34 = vld [vmem:[%s12440_s1 + $0x308] ss:$48 sps:$4 sm:$0xff]   ;;  %v9497_v0 = vpack.c.b16 %v8442_v58, %v8442_v58 }
 0x16e   :  { %1908 = vmatprep.subr.bf16.mxu1 %v9480_v35  ;;  %12787 = vst [vmem:[#allocation112_spill] sm:$0xff] %v9492_v34  ;;  %v9502_v35 = vld [vmem:[%s12440_s1 + $0x2b4] ss:$48 sps:$4 sm:$0xff]  }
 0x16f   :  { %12788 = vst [vmem:[#allocation113_spill] sm:$0xff] %v9502_v35 }
 0x170   :  { %1868 = vmatpush2.bf16.msra.mxu0 %v9486_v33  ;;  %v9508_v33 = vld [vmem:[%s12440_s1 + $0x2bc] ss:$48 sps:$4 sm:$0xff]  }
 0x171   :  { %1909 = vmatpush2.bf16.msra.mxu1 %v9492_v34  ;;  %1919 = vmatprep.subr.bf16.mxu0 %v9502_v35  ;;  %12789 = vst [vmem:[#allocation114_spill] sm:$0xff] %v9508_v33  ;;  %v9546_v35 = vld [vmem:[%s12440_s1 + $0x25c] ss:$48 sps:$4 sm:$0xff]  }
 0x172   :  { %1960 = vmatprep.subr.bf16.mxu1 %v9508_v33  ;;  %v9528_v33 = vld [vmem:[%s12440_s1 + $0x2b8] ss:$48 sps:$4 sm:$0xff]  }
 0x173   :  { %1870 = vmatmul.mubr.bf16.vlgmr.msra.gmra.mxu0 %v9497_v0  ;;  %v9512_v34 = vpop.f32.mrf.mxu0  ;;  %v9514_v58 = vpop.f32.mrf.mxu1  ;;  %12793 = vst [vmem:[#allocation118_spill] sm:$0xff] %v9528_v33 }
 0x174   :  { %12790 = vst [vmem:[#allocation115_spill] sm:$0xff] %v9512_v34  ;;  %12791 = vst [vmem:[#allocation116_spill] sm:$0xff] %v9514_v58  ;;  %1911 = vmatmul.mubr.bf16.vlgmr.msra.gmra.mxu1 %v9497_v0  ;;  %1920 = vmatpush1.bf16.msra.mxu0 %v9520_v59  ;;  %v9540_v59 = vld [vmem:[%s12440_s1 + $0x254] ss:$48 sps:$4 sm:$0xff]  }
 0x175   :  { %6112 = vmatprep.mubr.msk.bf16.mxu0 %vm1516_vm12, %v9124_v24  ;;  %1961 = vmatpush1.bf16.msra.mxu1 %v9528_v33  ;;  %v9531_v34 = vpop.f32.mrf.mxu0  ;;  %v9533_v58 = vpop.f32.mrf.mxu1  ;;  %12795 = vst [vmem:[#allocation120_spill] sm:$0xff] %v9540_v59 }
 0x176   :  { %12794 = vst [vmem:[#allocation119_spill] sm:$0xff] %v9531_v34  ;;  %6114 = vmatprep.mubr.msk.bf16.mxu1 %vm1516_vm12, %v9124_v24  ;;  %1921 = vmatprep.subr.bf16.mxu0 %v9540_v59  ;;  %v9558_v59 = vld [vmem:[%s12440_s1 + $0x258] ss:$48 sps:$4 sm:$0xff]  }
 0x177   :  { %1962 = vmatprep.subr.bf16.mxu1 %v9546_v35  ;;  %v1595_v34 = vpop.f32.mrf.mxu0  ;;  %v1636_v33 = vpop.f32.mrf.mxu1  ;;  %12796 = vst [vmem:[#allocation121_spill] sm:$0xff] %v9558_v59 }
 0x178   :  { %1922 = vmatpush1.bf16.msra.mxu0 %v9552_v49  ;;  %v9564_v33 = vld [vmem:[%s12440_s1 + $0x1f4] ss:$48 sps:$4 sm:$0xff]   ;;  %v9570_v34 = vld [vmem:[%s12440_s1 + $0x1fc] ss:$48 sps:$4 sm:$0xff]  }
 0x179   :  { %1963 = vmatpush1.bf16.msra.mxu1 %v9558_v59  ;;  %v1596_v27 = vpop.f32.mrf.mxu0  ;;  %v1637_v63 = vpop.f32.mrf.mxu1  ;;  %1923 = vmatprep.subr.bf16.mxu0 %v9564_v33  ;;  %12797 = vst [vmem:[#allocation122_spill] sm:$0xff] %v9570_v34  ;;  %v9576_v59 = vld [vmem:[%s12440_s1 + $0x1f0] ss:$48 sps:$4 sm:$0xff]  }
 0x17a   :  { %1964 = vmatprep.subr.bf16.mxu1 %v9570_v34  ;;  %12798 = vst [vmem:[#allocation123_spill] sm:$0xff] %v9576_v59  ;;  %v9582_v63 = vld [vmem:[%s12440_s1 + $0x1f8] ss:$48 sps:$4 sm:$0xff]   ;;  %v9588_v27 = vld [vmem:[%s12440_s1 + $0x194] ss:$48 sps:$4 sm:$0xff]  }
 0x17b   :  { %12799 = vst [vmem:[#allocation124_spill] sm:$0xff] %v9582_v63  ;;  %12800 = vst [vmem:[#allocation125_spill] sm:$0xff] %v9588_v27  ;;  %v9594_v34 = vld [vmem:[%s12440_s1 + $0x19c] ss:$48 sps:$4 sm:$0xff]  }
 0x17c   :  { %1924 = vmatpush1.bf16.msra.mxu0 %v9576_v59  ;;  %12801 = vst [vmem:[#allocation126_spill] sm:$0xff] %v9594_v34  ;;  %v9600_v59 = vld [vmem:[%s12440_s1 + $0x190] ss:$48 sps:$4 sm:$0xff]  }
 0x17d   :  { %1965 = vmatpush1.bf16.msra.mxu1 %v9582_v63  ;;  %1925 = vmatprep.subr.bf16.mxu0 %v9588_v27  ;;  %12802 = vst [vmem:[#allocation127_spill] sm:$0xff] %v9600_v59  ;;  %v9606_v63 = vld [vmem:[%s12440_s1 + $0x198] ss:$48 sps:$4 sm:$0xff]   ;;  %v9612_v27 = vld [vmem:[%s12440_s1 + $0x134] ss:$48 sps:$4 sm:$0xff]  }
 0x17e   :  { %1966 = vmatprep.subr.bf16.mxu1 %v9594_v34  ;;  %12803 = vst [vmem:[#allocation128_spill] sm:$0xff] %v9606_v63  ;;  %12804 = vst [vmem:[#allocation129_spill] sm:$0xff] %v9612_v27  ;;  %v9618_v34 = vld [vmem:[%s12440_s1 + $0x13c] ss:$48 sps:$4 sm:$0xff]  }
 0x17f   :  { %12805 = vst [vmem:[#allocation130_spill] sm:$0xff] %v9618_v34 }
 0x180   :  { %1926 = vmatpush1.bf16.msra.mxu0 %v9600_v59  ;;  %v9624_v59 = vld [vmem:[%s12440_s1 + $0x130] ss:$48 sps:$4 sm:$0xff]  }
 0x181   :  { %1967 = vmatpush1.bf16.msra.mxu1 %v9606_v63  ;;  %1927 = vmatprep.subr.bf16.mxu0 %v9612_v27  ;;  %12806 = vst [vmem:[#allocation131_spill] sm:$0xff] %v9624_v59  ;;  %v9630_v63 = vld [vmem:[%s12440_s1 + $0x138] ss:$48 sps:$4 sm:$0xff]   ;;  %v9636_v27 = vld [vmem:[%s12440_s1 + $0xd4] ss:$48 sps:$4 sm:$0xff]  }
 0x182   :  { %1968 = vmatprep.subr.bf16.mxu1 %v9618_v34  ;;  %12807 = vst [vmem:[#allocation132_spill] sm:$0xff] %v9630_v63  ;;  %12808 = vst [vmem:[#allocation133_spill] sm:$0xff] %v9636_v27  ;;  %v9642_v34 = vld [vmem:[%s12440_s1 + $0xdc] ss:$48 sps:$4 sm:$0xff]  }
 0x183   :  { %12809 = vst [vmem:[#allocation134_spill] sm:$0xff] %v9642_v34 }
 0x184   :  { %1928 = vmatpush1.bf16.msra.mxu0 %v9624_v59  ;;  %v9648_v59 = vld [vmem:[%s12440_s1 + $0xd0] ss:$48 sps:$4 sm:$0xff]  }
 0x185   :  { %1969 = vmatpush1.bf16.msra.mxu1 %v9630_v63  ;;  %1929 = vmatprep.subr.bf16.mxu0 %v9636_v27  ;;  %12810 = vst [vmem:[#allocation135_spill] sm:$0xff] %v9648_v59  ;;  %v9654_v63 = vld [vmem:[%s12440_s1 + $0xd8] ss:$48 sps:$4 sm:$0xff]   ;;  %v9660_v27 = vld [vmem:[%s12440_s1 + $0x74] ss:$48 sps:$4 sm:$0xff]  }
 0x186   :  { %1970 = vmatprep.subr.bf16.mxu1 %v9642_v34  ;;  %12811 = vst [vmem:[#allocation136_spill] sm:$0xff] %v9654_v63  ;;  %12812 = vst [vmem:[#allocation137_spill] sm:$0xff] %v9660_v27  ;;  %v9666_v34 = vld [vmem:[%s12440_s1 + $0x7c] ss:$48 sps:$4 sm:$0xff]  }
 0x187   :  { %12813 = vst [vmem:[#allocation138_spill] sm:$0xff] %v9666_v34 }
 0x188   :  { %1930 = vmatpush1.bf16.msra.mxu0 %v9648_v59  ;;  %v9672_v59 = vld [vmem:[%s12440_s1 + $0x70] ss:$48 sps:$4 sm:$0xff]  }
 0x189   :  { %1971 = vmatpush1.bf16.msra.mxu1 %v9654_v63  ;;  %1931 = vmatprep.subr.bf16.mxu0 %v9660_v27  ;;  %12814 = vst [vmem:[#allocation139_spill] sm:$0xff] %v9672_v59  ;;  %v9678_v63 = vld [vmem:[%s12440_s1 + $0x78] ss:$48 sps:$4 sm:$0xff]   ;;  %v9684_v27 = vld [vmem:[%s12440_s1 + $0x14] ss:$48 sps:$4 sm:$0xff]  }
 0x18a   :  { %1972 = vmatprep.subr.bf16.mxu1 %v9666_v34  ;;  %12815 = vst [vmem:[#allocation140_spill] sm:$0xff] %v9678_v63  ;;  %12816 = vst [vmem:[#allocation141_spill] sm:$0xff] %v9684_v27  ;;  %v9690_v34 = vld [vmem:[%s12440_s1 + $0x1c] ss:$48 sps:$4 sm:$0xff]  }
 0x18b   :  { %12817 = vst [vmem:[#allocation142_spill] sm:$0xff] %v9690_v34 }
 0x18c   :  { %1932 = vmatpush1.bf16.msra.mxu0 %v9672_v59  ;;  %v9696_v59 = vld [vmem:[%s12440_s1 + $0x10] ss:$48 sps:$4 sm:$0xff]  }
 0x18d   :  { %1973 = vmatpush1.bf16.msra.mxu1 %v9678_v63  ;;  %1933 = vmatprep.subr.bf16.mxu0 %v9684_v27  ;;  %v9702_v63 = vld [vmem:[%s12440_s1 + $0x18] ss:$48 sps:$4 sm:$0xff]   ;;  %v9708_v27 = vld [vmem:[%s12440_s1 + $0x5b4] ss:$48 sps:$4 sm:$0x1f]  }
 0x18e   :  { %1974 = vmatprep.subr.bf16.mxu1 %v9690_v34  ;;  %12818 = vst [vmem:[#allocation143_spill] sm:$0xff] %v9702_v63  ;;  %12819 = vst [vmem:[#allocation144_spill] sm:$0xff] %v9708_v27  ;;  %v9715_v34 = vld [vmem:[%s12440_s1 + $0x5bc] ss:$48 sps:$4 sm:$0x1f]  }
 0x190   :  { %1934 = vmatpush1.bf16.msra.mxu0 %v9696_v59 }
 0x191   :  { %1975 = vmatpush1.bf16.msra.mxu1 %v9702_v63  ;;  %6111 = vmatprep.subr.msk.bf16.mxu0 %vm1520_vm0, %v9708_v27  ;;  %v9724_v63 = vld [vmem:[%s12440_s1 + $0x554] ss:$48 sps:$4 sm:$0xff]   ;;  %v9730_v27 = vld [vmem:[%s12440_s1 + $0x55c] ss:$48 sps:$4 sm:$0xff]  }
 0x192   :  { %6113 = vmatprep.subr.msk.bf16.mxu1 %vm1520_vm0, %v9715_v34 }
 0x194   :  { %1936 = vmatpush2.bf16.msra.mxu0 %v8406_v14  ;;  %v9736_v14 = vld [vmem:[%s12440_s1 + $0x550] ss:$48 sps:$4 sm:$0xff]  }
 0x195   :  { %1977 = vmatpush2.bf16.msra.mxu1 %v8409_v15  ;;  %1937 = vmatprep.subr.bf16.mxu0 %v9724_v63  ;;  %v9742_v15 = vld [vmem:[%s12440_s1 + $0x558] ss:$48 sps:$4 sm:$0xff]  }
 0x196   :  { %1978 = vmatprep.subr.bf16.mxu1 %v9730_v27 }
 0x198   :  { %1938 = vmatpush2.bf16.msra.mxu0 %v9736_v14 }
 0x199   :  { %1979 = vmatpush2.bf16.msra.mxu1 %v9742_v15  ;;  %1939 = vmatprep.subr.bf16.mxu0 %v8572_v37  ;;  %v438_v37 = vlaneseq }
 0x19a   :  { %1980 = vmatprep.subr.bf16.mxu1 %v8577_v43 }
 0x19b   :  { %v9762_v43 = vshrl.u32 %v438_v37, 7  ;;  %v12855_v37 = vld [vmem:[#allocation47_spill] sm:$0xff] }
 0x19c   :  { %1940 = vmatpush2.bf16.msra.mxu0 %v8584_v55 }
 0x19d   :  { %1981 = vmatpush2.bf16.msra.mxu1 %v8589_v31  ;;  %1941 = vmatprep.subr.bf16.mxu0 %v8594_v46  ;;  %v12592_v55 = vsub.s32 3, %v9762_v43  ;;  %v456_v31 = vsub.s32 4, %v9762_v43  ;;  %v9774_v46 = vld [vmem:[%s12441_s2] sm:$0xff] }
 0x19e   :  { %1982 = vmatprep.subr.bf16.mxu1 %v8599_v39 }
 0x19f   :  { %v9779_v39 = vrot.slane %v9774_v46, %v12592_v55  ;;  %v468_v55 = vsub.s32 7, %v9762_v43 }
 0x1a0   :  { %1942 = vmatpush2.bf16.msra.mxu0 %v8606_v47  ;;  %v9783_v47 = vrot.slane %v9774_v46, %v456_v31  ;;  %v12856_v31 = vld [vmem:[#allocation48_spill] sm:$0xff] }
 0x1a1   :  { %1983 = vmatpush2.bf16.msra.mxu1 %v8611_v50  ;;  %1943 = vmatprep.subr.bf16.mxu0 %v8616_v51 }
 0x1a2   :  { %1984 = vmatprep.subr.bf16.mxu1 %v8621_v28  ;;  %12820 = vst [vmem:[#allocation145_spill] sm:$0xff] %v9783_v47  ;;  %v9793_v28 = vadd.f32 %v9533_v58, %v9779_v39  ;;  %v12854_v58 = vld [vmem:[#allocation46_spill] sm:$0xff] }
 0x1a4   :  { %1944 = vmatpush2.bf16.msra.mxu0 %v8630_v53  ;;  %12821 = vst [vmem:[#allocation146_spill] sm:$0xff] %v9793_v28 }
 0x1a5   :  { %1985 = vmatpush2.bf16.msra.mxu1 %v8635_v25  ;;  %1945 = vmatprep.subr.bf16.mxu0 %v8640_v29 }
 0x1a6   :  { %1986 = vmatprep.subr.bf16.mxu1 %v8645_v32 }
 0x1a8   :  { %1946 = vmatpush2.bf16.msra.mxu0 %v8654_v22 }
 0x1a9   :  { %1987 = vmatpush2.bf16.msra.mxu1 %v8659_v56  ;;  %1947 = vmatprep.subr.bf16.mxu0 %v8664_v48 }
 0x1aa   :  { %1988 = vmatprep.subr.bf16.mxu1 %v8669_v57 }
 0x1ac   :  { %1948 = vmatpush2.bf16.msra.mxu0 %v8678_v61  ;;  %v12823_v61 = vld [vmem:[#allocation13_spill] sm:$0xff] }
 0x1ad   :  { %1989 = vmatpush2.bf16.msra.mxu1 %v8683_v41  ;;  %1949 = vmatprep.subr.bf16.mxu0 %v8688_v62  ;;  %v12824_v41 = vld [vmem:[#allocation14_spill] sm:$0xff]  ;;  %v12825_v62 = vld [vmem:[#allocation15_spill] sm:$0xff] }
 0x1ae   :  { %1990 = vmatprep.subr.bf16.mxu1 %v8693_v2  ;;  %v12826_v2 = vld [vmem:[#allocation16_spill] sm:$0xff] }
 0x1b0   :  { %1950 = vmatpush2.bf16.msra.mxu0 %v8702_v3  ;;  %v12827_v3 = vld [vmem:[#allocation17_spill] sm:$0xff] }
 0x1b1   :  { %1991 = vmatpush2.bf16.msra.mxu1 %v8707_v4  ;;  %2001 = vmatprep.subr.bf16.mxu0 %v8712_v7  ;;  %v12828_v4 = vld [vmem:[#allocation18_spill] sm:$0xff]  ;;  %v12829_v7 = vld [vmem:[#allocation19_spill] sm:$0xff] }
 0x1b2   :  { %2042 = vmatprep.subr.bf16.mxu1 %v8717_v5  ;;  %v12830_v5 = vld [vmem:[#allocation20_spill] sm:$0xff] }
 0x1b3   :  { %v1673_v50 = vpop.f32.mrf.mxu0  ;;  %v9788_v51 = vpop.f32.mrf.mxu1  ;;  %1952 = vmatmul.mubr.bf16.vlgmr.msra.gmra.mxu0 %v9497_v0 }
 0x1b4   :  { %v9796_v53 = vadd.f32 %v1673_v50, %v9783_v47  ;;  %1993 = vmatmul.mubr.bf16.vlgmr.msra.gmra.mxu1 %v9497_v0  ;;  %2002 = vmatpush1.bf16.msra.mxu0 %v8726_v44  ;;  %v12831_v44 = vld [vmem:[#allocation21_spill] sm:$0xff] }
 0x1b5   :  { %6116 = vmatprep.mubr.msk.bf16.mxu0 %vm1516_vm12, %v9124_v24  ;;  %2043 = vmatpush1.bf16.msra.mxu1 %v8731_v45  ;;  %v9803_v25 = vpop.f32.mrf.mxu0  ;;  %v9805_v29 = vpop.f32.mrf.mxu1  ;;  %v12832_v45 = vld [vmem:[#allocation22_spill] sm:$0xff]  ;;  %v12857_v50 = vld [vmem:[#allocation49_spill] sm:$0xff] }
 0x1b6   :  { %12822 = vst [vmem:[#allocation147_spill] sm:$0xff] %v9796_v53  ;;  %v6886_v32 = vpack.i.bf16 %v9796_v53, %v9793_v28  ;;  %6118 = vmatprep.mubr.msk.bf16.mxu1 %vm1516_vm12, %v9124_v24  ;;  %2003 = vmatprep.subr.bf16.mxu0 %v8738_v8  ;;  %v12833_v8 = vld [vmem:[#allocation23_spill] sm:$0xff]  ;;  %v12853_v24 = vld [vmem:[#allocation45_spill] sm:$0xff] }
 0x1b7   :  { %v1677_v22 = vpop.f32.mrf.mxu0  ;;  %v1718_v56 = vpop.f32.mrf.mxu1  ;;  %2044 = vmatprep.subr.bf16.mxu1 %v8743_v11  ;;  %v12834_v11 = vld [vmem:[#allocation24_spill] sm:$0xff] }
 0x1b8   :  { %2004 = vmatpush1.bf16.msra.mxu0 %v8750_v6  ;;  %6887 = vrot.lane.b32.xlu0 %v6886_v32, %s7884_s0  ;;  %v12835_v6 = vld [vmem:[#allocation27_spill] sm:$0xff]  ;;  %v12858_v32 = vld [vmem:[#allocation50_spill] sm:$0xff]  ;;  %v12860_v56 = vld [vmem:[#allocation52_spill] sm:$0xff] }
 0x1b9   :  { %2045 = vmatpush1.bf16.msra.mxu1 %v8757_v10  ;;  %v1678_v48 = vpop.f32.mrf.mxu0  ;;  %v1719_v57 = vpop.f32.mrf.mxu1  ;;  %2005 = vmatprep.subr.bf16.mxu0 %v8765_v12  ;;  %v12836_v10 = vld [vmem:[#allocation28_spill] sm:$0xff]  ;;  %v12837_v12 = vld [vmem:[#allocation29_spill] sm:$0xff]  ;;  %v12859_v22 = vld [vmem:[#allocation51_spill] sm:$0xff] }
 0x1ba   :  { %2046 = vmatprep.subr.bf16.mxu1 %v8773_v9  ;;  %v12838_v9 = vld [vmem:[#allocation30_spill] sm:$0xff]  ;;  %v12861_v48 = vld [vmem:[#allocation9_spill] sm:$0xff] }
 0x1bb   :  { %v9881_v57 = vpack.c.b16 %v12861_v48, %v12861_v48  ;;  %v12892_v48 = vld [vmem:[#allocation83_spill] sm:$0xff] }
 0x1bc   :  { %2006 = vmatpush1.bf16.msra.mxu0 %v8780_v54  ;;  %v12840_v54 = vld [vmem:[#allocation32_spill] sm:$0xff] }
 0x1bd   :  { %2047 = vmatpush1.bf16.msra.mxu1 %v8785_v13  ;;  %2007 = vmatprep.subr.bf16.mxu0 %v8790_v38  ;;  %v12841_v13 = vld [vmem:[#allocation33_spill] sm:$0xff]  ;;  %v12842_v38 = vld [vmem:[#allocation34_spill] sm:$0xff] }
 0x1be   :  { %2048 = vmatprep.subr.bf16.mxu1 %v8796_v16  ;;  %v12843_v16 = vld [vmem:[#allocation35_spill] sm:$0xff] }
 0x1c0   :  { %2008 = vmatpush1.bf16.msra.mxu0 %v8804_v17  ;;  %v12844_v17 = vld [vmem:[#allocation36_spill] sm:$0xff] }
 0x1c1   :  { %2049 = vmatpush1.bf16.msra.mxu1 %v8809_v18  ;;  %2009 = vmatprep.subr.bf16.mxu0 %v8814_v40  ;;  %v12845_v18 = vld [vmem:[#allocation37_spill] sm:$0xff]  ;;  %v12846_v40 = vld [vmem:[#allocation38_spill] sm:$0xff] }
 0x1c2   :  { %2050 = vmatprep.subr.bf16.mxu1 %v8820_v52  ;;  %v12847_v52 = vld [vmem:[#allocation39_spill] sm:$0xff] }
 0x1c4   :  { %2010 = vmatpush1.bf16.msra.mxu0 %v8828_v20  ;;  %v12848_v20 = vld [vmem:[#allocation40_spill] sm:$0xff] }
 0x1c5   :  { %2051 = vmatpush1.bf16.msra.mxu1 %v8833_v21  ;;  %2011 = vmatprep.subr.bf16.mxu0 %v8838_v1  ;;  %v12849_v21 = vld [vmem:[#allocation41_spill] sm:$0xff]  ;;  %v12850_v1 = vld [vmem:[#allocation42_spill] sm:$0xff] }
 0x1c6   :  { %2052 = vmatprep.subr.bf16.mxu1 %v8844_v19  ;;  %v12851_v19 = vld [vmem:[#allocation43_spill] sm:$0xff] }
 0x1c8   :  { %2012 = vmatpush1.bf16.msra.mxu0 %v12823_v61  ;;  %v12862_v61 = vld [vmem:[#allocation53_spill] sm:$0xff] }
 0x1c9   :  { %2053 = vmatpush1.bf16.msra.mxu1 %v12824_v41  ;;  %2013 = vmatprep.subr.bf16.mxu0 %v12825_v62  ;;  %v12863_v41 = vld [vmem:[#allocation54_spill] sm:$0xff] }
 0x1ca   :  { %2054 = vmatprep.subr.bf16.mxu1 %v12826_v2 }
 0x1cc   :  { %2014 = vmatpush1.bf16.msra.mxu0 %v12827_v3  ;;  %v12864_v3 = vld [vmem:[#allocation55_spill] sm:$0xff] }
 0x1cd   :  { %2055 = vmatpush1.bf16.msra.mxu1 %v8881_v30  ;;  %2015 = vmatprep.subr.bf16.mxu0 %v12828_v4  ;;  %v12852_v30 = vld [vmem:[#allocation44_spill] sm:$0xff] }
 0x1ce   :  { %2056 = vmatprep.subr.bf16.mxu1 %v12829_v7  ;;  %v12865_v7 = vld [vmem:[#allocation56_spill] sm:$0xff] }
 0x1d0   :  { %2016 = vmatpush1.bf16.msra.mxu0 %v12830_v5  ;;  %v12866_v5 = vld [vmem:[#allocation57_spill] sm:$0xff] }
 0x1d1   :  { %2057 = vmatpush1.bf16.msra.mxu1 %v12831_v44  ;;  %6115 = vmatprep.subr.msk.bf16.mxu0 %vm1520_vm0, %v8910_v60  ;;  %v12839_v60 = vld [vmem:[#allocation31_spill] sm:$0xff]  ;;  %v12867_v44 = vld [vmem:[#allocation58_spill] sm:$0xff] }
 0x1d2   :  { %6117 = vmatprep.subr.msk.bf16.mxu1 %vm1520_vm0, %v12832_v45 }
 0x1d4   :  { %2018 = vmatpush2.bf16.msra.mxu0 %v8942_v36 }
 0x1d5   :  { %2059 = vmatpush2.bf16.msra.mxu1 %v8947_v23  ;;  %2019 = vmatprep.subr.bf16.mxu0 %v12833_v8  ;;  %v12868_v8 = vld [vmem:[#allocation59_spill] sm:$0xff] }
 0x1d6   :  { %2060 = vmatprep.subr.bf16.mxu1 %v12834_v11 }
 0x1d8   :  { %2020 = vmatpush2.bf16.msra.mxu0 %v12835_v6  ;;  %v12869_v6 = vld [vmem:[#allocation60_spill] sm:$0xff] }
 0x1d9   :  { %2061 = vmatpush2.bf16.msra.mxu1 %v12836_v10  ;;  %2021 = vmatprep.subr.bf16.mxu0 %v12837_v12  ;;  %v12870_v10 = vld [vmem:[#allocation61_spill] sm:$0xff]  ;;  %v12871_v12 = vld [vmem:[#allocation62_spill] sm:$0xff] }
 0x1da   :  { %2062 = vmatprep.subr.bf16.mxu1 %v12838_v9  ;;  %v12872_v9 = vld [vmem:[#allocation63_spill] sm:$0xff] }
 0x1dc   :  { %2022 = vmatpush2.bf16.msra.mxu0 %v12839_v60  ;;  %v12873_v60 = vld [vmem:[#allocation64_spill] sm:$0xff] }
 0x1dd   :  { %2063 = vmatpush2.bf16.msra.mxu1 %v12840_v54  ;;  %2023 = vmatprep.subr.bf16.mxu0 %v12841_v13  ;;  %v12874_v54 = vld [vmem:[#allocation65_spill] sm:$0xff]  ;;  %v12875_v13 = vld [vmem:[#allocation66_spill] sm:$0xff] }
 0x1de   :  { %2064 = vmatprep.subr.bf16.mxu1 %v12842_v38  ;;  %v12876_v38 = vld [vmem:[#allocation67_spill] sm:$0xff] }
 0x1e0   :  { %2024 = vmatpush2.bf16.msra.mxu0 %v12843_v16  ;;  %v12877_v16 = vld [vmem:[#allocation68_spill] sm:$0xff] }
 0x1e1   :  { %2065 = vmatpush2.bf16.msra.mxu1 %v12844_v17  ;;  %2025 = vmatprep.subr.bf16.mxu0 %v12845_v18  ;;  %v12878_v17 = vld [vmem:[#allocation69_spill] sm:$0xff]  ;;  %v12879_v18 = vld [vmem:[#allocation70_spill] sm:$0xff] }
 0x1e2   :  { %2066 = vmatprep.subr.bf16.mxu1 %v12846_v40  ;;  %v12880_v40 = vld [vmem:[#allocation71_spill] sm:$0xff] }
 0x1e4   :  { %2026 = vmatpush2.bf16.msra.mxu0 %v12847_v52  ;;  %v12881_v52 = vld [vmem:[#allocation72_spill] sm:$0xff] }
 0x1e5   :  { %2067 = vmatpush2.bf16.msra.mxu1 %v12848_v20  ;;  %2027 = vmatprep.subr.bf16.mxu0 %v12849_v21  ;;  %v12882_v20 = vld [vmem:[#allocation73_spill] sm:$0xff]  ;;  %v12883_v21 = vld [vmem:[#allocation74_spill] sm:$0xff] }
 0x1e6   :  { %2068 = vmatprep.subr.bf16.mxu1 %v12850_v1  ;;  %v12884_v1 = vld [vmem:[#allocation75_spill] sm:$0xff] }
 0x1e8   :  { %2028 = vmatpush2.bf16.msra.mxu0 %v12851_v19  ;;  %v12885_v19 = vld [vmem:[#allocation76_spill] sm:$0xff] }
 0x1e9   :  { %2069 = vmatpush2.bf16.msra.mxu1 %v9056_v26  ;;  %2029 = vmatprep.subr.bf16.mxu0 %v12852_v30  ;;  %v12886_v30 = vld [vmem:[#allocation77_spill] sm:$0xff] }
 0x1ea   :  { %2070 = vmatprep.subr.bf16.mxu1 %v12853_v24  ;;  %v12887_v24 = vld [vmem:[#allocation78_spill] sm:$0xff] }
 0x1ec   :  { %2030 = vmatpush2.bf16.msra.mxu0 %v12854_v58  ;;  %v12888_v58 = vld [vmem:[#allocation79_spill] sm:$0xff] }
 0x1ed   :  { %2071 = vmatpush2.bf16.msra.mxu1 %v9080_v42  ;;  %2031 = vmatprep.subr.bf16.mxu0 %v12855_v37  ;;  %v12889_v37 = vld [vmem:[#allocation80_spill] sm:$0xff] }
 0x1ee   :  { %2072 = vmatprep.subr.bf16.mxu1 %v12856_v31  ;;  %v12890_v31 = vld [vmem:[#allocation81_spill] sm:$0xff] }
 0x1f0   :  { %2032 = vmatpush2.bf16.msra.mxu0 %v12857_v50  ;;  %v12891_v50 = vld [vmem:[#allocation82_spill] sm:$0xff] }
 0x1f1   :  { %2073 = vmatpush2.bf16.msra.mxu1 %v12858_v32  ;;  %2117 = vmatprep.subr.bf16.mxu0 %v12859_v22 }
 0x1f2   :  { %2158 = vmatprep.subr.bf16.mxu1 %v12860_v56 }
 0x1f3   :  { %v9876_v26 = vpop.f32.mrf.mxu0  ;;  %2034 = vmatmul.mubr.bf16.vlgmr.msra.gmra.mxu0 %v9497_v0 }
 0x1f4   :  { %v9883_v42 = vpop.f32.mrf.mxu1  ;;  %2075 = vmatmul.mubr.bf16.vlgmr.msra.gmra.mxu1 %v9497_v0  ;;  %2118 = vmatpush1.bf16.msra.mxu0 %v12862_v61  ;;  %v12893_v61 = vld [vmem:[#allocation84_spill] sm:$0xff] }
 0x1f5   :  { %6120 = vmatprep.mubr.msk.bf16.mxu0 %vm1516_vm12, %v9881_v57  ;;  %2159 = vmatpush1.bf16.msra.mxu1 %v12863_v41  ;;  %v9890_v62 = vpop.f32.mrf.mxu0  ;;  %v12894_v41 = vld [vmem:[#allocation5_spill] sm:$0xff] }
 0x1f6   :  { %6122 = vmatprep.mubr.msk.bf16.mxu1 %vm1516_vm12, %v9881_v57  ;;  %v9894_v2 = vpop.f32.mrf.mxu1  ;;  %2119 = vmatprep.subr.bf16.mxu0 %v12864_v3  ;;  %v12895_v3 = vld [vmem:[#allocation6_spill] sm:$0xff] }
 0x1f7   :  { %v1759_v4 = vpop.f32.mrf.mxu0  ;;  %2160 = vmatprep.subr.bf16.mxu1 %v12865_v7  ;;  %v12897_v7 = vld [vmem:[#allocation86_spill] sm:$0xff] }
 0x1f8   :  { %v1800_v0 = vpop.f32.mrf.mxu1  ;;  %2120 = vmatpush1.bf16.msra.mxu0 %v12866_v5  ;;  %v12896_v4 = vld [vmem:[#allocation85_spill] sm:$0xff]  ;;  %v12899_v5 = vld [vmem:[#allocation88_spill] sm:$0xff] }
 0x1f9   :  { %2161 = vmatpush1.bf16.msra.mxu1 %v12867_v44  ;;  %v1760_v45 = vpop.f32.mrf.mxu0  ;;  %2121 = vmatprep.subr.bf16.mxu0 %v12868_v8  ;;  %v12898_v0 = vld [vmem:[#allocation87_spill] sm:$0xff]  ;;  %v12900_v44 = vld [vmem:[#allocation89_spill] sm:$0xff] }
 0x1fa   :  { %v1801_v11 = vpop.f32.mrf.mxu1  ;;  %2162 = vmatprep.subr.bf16.mxu1 %v12869_v6  ;;  %v12901_v45 = vld [vmem:[#allocation90_spill] sm:$0xff]  ;;  %v12902_v8 = vld [vmem:[#allocation91_spill] sm:$0xff]  ;;  %v12904_v6 = vld [vmem:[#allocation93_spill] sm:$0xff] }
 0x1fb   :  { %v12903_v11 = vld [vmem:[#allocation92_spill] sm:$0xff] }
 0x1fc   :  { %2122 = vmatpush1.bf16.msra.mxu0 %v12870_v10  ;;  %v12905_v10 = vld [vmem:[#allocation94_spill] sm:$0xff] }
 0x1fd   :  { %2163 = vmatpush1.bf16.msra.mxu1 %v12871_v12  ;;  %2123 = vmatprep.subr.bf16.mxu0 %v12872_v9  ;;  %v12906_v12 = vld [vmem:[#allocation95_spill] sm:$0xff]  ;;  %v12907_v9 = vld [vmem:[#allocation96_spill] sm:$0xff] }
 0x1fe   :  { %2164 = vmatprep.subr.bf16.mxu1 %v12873_v60  ;;  %v12908_v60 = vld [vmem:[#allocation97_spill] sm:$0xff] }
 0x200   :  { %2124 = vmatpush1.bf16.msra.mxu0 %v12874_v54  ;;  %v12909_v54 = vld [vmem:[#allocation98_spill] sm:$0xff] }
 0x201   :  { %2165 = vmatpush1.bf16.msra.mxu1 %v12875_v13  ;;  %2125 = vmatprep.subr.bf16.mxu0 %v12876_v38  ;;  %v12910_v13 = vld [vmem:[#allocation99_spill] sm:$0xff]  ;;  %v12911_v38 = vld [vmem:[#allocation100_spill] sm:$0xff] }
 0x202   :  { %2166 = vmatprep.subr.bf16.mxu1 %v12877_v16  ;;  %v12912_v16 = vld [vmem:[#allocation101_spill] sm:$0xff] }
 0x204   :  { %2126 = vmatpush1.bf16.msra.mxu0 %v12878_v17  ;;  %v12913_v17 = vld [vmem:[#allocation102_spill] sm:$0xff] }
 0x205   :  { %2167 = vmatpush1.bf16.msra.mxu1 %v12879_v18  ;;  %2127 = vmatprep.subr.bf16.mxu0 %v12880_v40  ;;  %v12914_v18 = vld [vmem:[#allocation103_spill] sm:$0xff]  ;;  %v12915_v40 = vld [vmem:[#allocation104_spill] sm:$0xff] }
 0x206   :  { %2168 = vmatprep.subr.bf16.mxu1 %v12881_v52  ;;  %v12916_v52 = vld [vmem:[#allocation105_spill] sm:$0xff] }
 0x208   :  { %2128 = vmatpush1.bf16.msra.mxu0 %v12882_v20  ;;  %v12917_v20 = vld [vmem:[#allocation106_spill] sm:$0xff] }
 0x209   :  { %2169 = vmatpush1.bf16.msra.mxu1 %v12883_v21  ;;  %2129 = vmatprep.subr.bf16.mxu0 %v12884_v1  ;;  %v12918_v21 = vld [vmem:[#allocation107_spill] sm:$0xff]  ;;  %v12591_v1 = vsub.s32 2, %v9762_v43 }
 0x20a   :  { %2170 = vmatprep.subr.bf16.mxu1 %v12885_v19  ;;  %v12919_v19 = vld [vmem:[#allocation108_spill] sm:$0xff] }
 0x20c   :  { %2130 = vmatpush1.bf16.msra.mxu0 %v12886_v30  ;;  %v12920_v30 = vld [vmem:[#allocation109_spill] sm:$0xff] }
 0x20d   :  { %2171 = vmatpush1.bf16.msra.mxu1 %v12887_v24  ;;  %2131 = vmatprep.subr.bf16.mxu0 %v12888_v58  ;;  %v12921_v24 = vld [vmem:[#allocation110_spill] sm:$0xff]  ;;  %v12922_v58 = vld [vmem:[#allocation111_spill] sm:$0xff] }
 0x20e   :  { %2172 = vmatprep.subr.bf16.mxu1 %v12889_v37  ;;  %v9959_v37 = vsub.s32 0, %v9762_v43 }
 0x210   :  { %2132 = vmatpush1.bf16.msra.mxu0 %v12890_v31  ;;  %12923 = vst [vmem:[#allocation13_spill] sm:$0xff] %v9959_v37  ;;  %v9964_v31 = vrot.slane %v9774_v46, %v12591_v1 }
 0x211   :  { %2173 = vmatpush1.bf16.msra.mxu1 %v12891_v50  ;;  %6119 = vmatprep.subr.msk.bf16.mxu0 %vm1520_vm0, %v12892_v48  ;;  %v12925_v50 = vld [vmem:[#allocation112_spill] sm:$0xff]  ;;  %v12926_v48 = vld [vmem:[#allocation10_spill] sm:$0xff] }
 0x212   :  { %6121 = vmatprep.subr.msk.bf16.mxu1 %vm1520_vm0, %v12893_v61  ;;  %12924 = vst [vmem:[#allocation14_spill] sm:$0xff] %v9964_v31  ;;  %v9969_v61 = vpack.c.b16 %v12926_v48, %v12926_v48  ;;  %v12948_v48 = vld [vmem:[#allocation130_spill] sm:$0xff] }
 0x214   :  { %2134 = vmatpush2.bf16.msra.mxu0 %v12894_v41 }
 0x215   :  { %2175 = vmatpush2.bf16.msra.mxu1 %v12895_v3  ;;  %2135 = vmatprep.subr.bf16.mxu0 %v12896_v4  ;;  %v12927_v4 = vld [vmem:[#allocation113_spill] sm:$0xff] }
 0x216   :  { %2176 = vmatprep.subr.bf16.mxu1 %v12897_v7  ;;  %v12928_v7 = vld [vmem:[#allocation114_spill] sm:$0xff] }
 0x218   :  { %2136 = vmatpush2.bf16.msra.mxu0 %v12898_v0 }
 0x219   :  { %2177 = vmatpush2.bf16.msra.mxu1 %v12899_v5  ;;  %2137 = vmatprep.subr.bf16.mxu0 %v12900_v44  ;;  %v12929_v44 = vld [vmem:[#allocation117_spill] sm:$0xff] }
 0x21a   :  { %2178 = vmatprep.subr.bf16.mxu1 %v12901_v45  ;;  %v9978_v45 = vrot.slane %v9774_v46, %v9959_v37 }
 0x21c   :  { %2138 = vmatpush2.bf16.msra.mxu0 %v12902_v8  ;;  %12930 = vst [vmem:[#allocation15_spill] sm:$0xff] %v9978_v45  ;;  %v12931_v8 = vld [vmem:[#allocation116_spill] sm:$0xff] }
 0x21d   :  { %2179 = vmatpush2.bf16.msra.mxu1 %v12903_v11  ;;  %2139 = vmatprep.subr.bf16.mxu0 %v12904_v6  ;;  %v9982_v11 = vadd.f32 %v12931_v8, %v9964_v31  ;;  %v12954_v8 = vld [vmem:[#allocation136_spill] sm:$0xff] }
 0x21e   :  { %2180 = vmatprep.subr.bf16.mxu1 %v12905_v10  ;;  %v12934_v10 = vld [vmem:[#allocation118_spill] sm:$0xff] }
 0x21f   :  { %12932 = vst [vmem:[#allocation16_spill] sm:$0xff] %v9982_v11 }
 0x220   :  { %2140 = vmatpush2.bf16.msra.mxu0 %v12906_v12 }
 0x221   :  { %2181 = vmatpush2.bf16.msra.mxu1 %v12907_v9  ;;  %2141 = vmatprep.subr.bf16.mxu0 %v12908_v60  ;;  %v12935_v60 = vld [vmem:[#allocation120_spill] sm:$0xff] }
 0x222   :  { %2182 = vmatprep.subr.bf16.mxu1 %v12909_v54 }
 0x224   :  { %2142 = vmatpush2.bf16.msra.mxu0 %v12910_v13 }
 0x225   :  { %2183 = vmatpush2.bf16.msra.mxu1 %v12911_v38  ;;  %2143 = vmatprep.subr.bf16.mxu0 %v12912_v16 }
 0x226   :  { %2184 = vmatprep.subr.bf16.mxu1 %v12913_v17  ;;  %v12937_v17 = vld [vmem:[#allocation115_spill] sm:$0xff] }
 0x228   :  { %2144 = vmatpush2.bf16.msra.mxu0 %v12914_v18  ;;  %v10006_v18 = vadd.f32 %v12937_v17, %v9978_v45  ;;  %v12960_v17 = vld [vmem:[#allocation142_spill] sm:$0xff] }
 0x229   :  { %2185 = vmatpush2.bf16.msra.mxu1 %v12915_v40  ;;  %2145 = vmatprep.subr.bf16.mxu0 %v12916_v52  ;;  %v12939_v40 = vld [vmem:[#allocation121_spill] sm:$0xff] }
 0x22a   :  { %2186 = vmatprep.subr.bf16.mxu1 %v12917_v20  ;;  %12938 = vst [vmem:[#allocation19_spill] sm:$0xff] %v10006_v18 }
 0x22c   :  { %2146 = vmatpush2.bf16.msra.mxu0 %v12918_v21  ;;  %v12940_v21 = vld [vmem:[#allocation122_spill] sm:$0xff] }
 0x22d   :  { %2187 = vmatpush2.bf16.msra.mxu1 %v12919_v19  ;;  %2147 = vmatprep.subr.bf16.mxu0 %v12920_v30  ;;  %v12941_v19 = vld [vmem:[#allocation123_spill] sm:$0xff]  ;;  %v12943_v30 = vld [vmem:[#allocation125_spill] sm:$0xff] }
 0x22e   :  { %2188 = vmatprep.subr.bf16.mxu1 %v12921_v24  ;;  %v12944_v24 = vld [vmem:[#allocation126_spill] sm:$0xff] }
 0x230   :  { %2148 = vmatpush2.bf16.msra.mxu0 %v12922_v58  ;;  %v12945_v58 = vld [vmem:[#allocation127_spill] sm:$0xff] }
 0x231   :  { %2189 = vmatpush2.bf16.msra.mxu1 %v12925_v50  ;;  %2199 = vmatprep.subr.bf16.mxu0 %v12927_v4  ;;  %v12946_v50 = vld [vmem:[#allocation128_spill] sm:$0xff]  ;;  %v12949_v4 = vld [vmem:[#allocation131_spill] sm:$0xff] }
 0x232   :  { %2240 = vmatprep.subr.bf16.mxu1 %v12928_v7  ;;  %v12950_v7 = vld [vmem:[#allocation132_spill] sm:$0xff] }
 0x233   :  { %v1871_v0 = vpop.f32.mrf.mxu0  ;;  %2150 = vmatmul.mubr.bf16.vlgmr.msra.gmra.mxu0 %v9969_v61 }
 0x234   :  { %v1912_v5 = vpop.f32.mrf.mxu1  ;;  %2191 = vmatmul.mubr.bf16.vlgmr.msra.gmra.mxu1 %v9969_v61  ;;  %2200 = vmatpush1.bf16.msra.mxu0 %v12929_v44  ;;  %v9998_v54 = vadd.f32 %v1871_v0, %v9978_v45  ;;  %v12951_v0 = vld [vmem:[#allocation133_spill] sm:$0xff]  ;;  %v12953_v44 = vld [vmem:[#allocation135_spill] sm:$0xff] }
 0x235   :  { %v9985_v6 = vadd.f32 %v1912_v5, %v9964_v31  ;;  %6124 = vmatprep.mubr.msk.bf16.mxu0 %vm1516_vm12, %v9881_v57  ;;  %2241 = vmatpush1.bf16.msra.mxu1 %v12934_v10  ;;  %v9990_v12 = vpop.f32.mrf.mxu0  ;;  %v12952_v5 = vld [vmem:[#allocation134_spill] sm:$0xff]  ;;  %v12955_v10 = vld [vmem:[#allocation137_spill] sm:$0xff] }
 0x236   :  { %6126 = vmatprep.mubr.msk.bf16.mxu1 %vm1516_vm12, %v9881_v57  ;;  %v9994_v9 = vpop.f32.mrf.mxu1  ;;  %2201 = vmatprep.subr.bf16.mxu0 %v12935_v60  ;;  %12936 = vst [vmem:[#allocation18_spill] sm:$0xff] %v9998_v54  ;;  %v12956_v60 = vld [vmem:[#allocation138_spill] sm:$0xff] }
 0x237   :  { %12933 = vst [vmem:[#allocation17_spill] sm:$0xff] %v9985_v6  ;;  %v6896_v13 = vpack.i.bf16 %v9985_v6, %v9982_v11  ;;  %v1875_v38 = vpop.f32.mrf.mxu0  ;;  %2242 = vmatprep.subr.bf16.mxu1 %v9546_v35  ;;  %v6906_v35 = vpack.i.bf16 %v9998_v54, %v10006_v18  ;;  %v10219_v45 = vadd.f32 %v9994_v9, %v9779_v39  ;;  %v10228_v11 = vld [vmem:[%s12440_s1 + $0x2c0] ss:$48 sps:$4 sm:$0xff]   ;;  %v10236_v9 = vld [vmem:[%s12440_s1 + $0x2c8] ss:$48 sps:$4 sm:$0xff]  }
 0x238   :  { %v1916_v16 = vpop.f32.mrf.mxu1  ;;  %2202 = vmatpush1.bf16.msra.mxu0 %v9552_v49  ;;  %v12942_v49 = vld [vmem:[#allocation124_spill] sm:$0xff]  ;;  %12969 = vst [vmem:[#allocation24_spill] sm:$0xff] %v10228_v11  ;;  %12970 = vst [vmem:[#allocation27_spill] sm:$0xff] %v10236_v9 }
 0x239   :  { %2243 = vmatpush1.bf16.msra.mxu1 %v12939_v40  ;;  %6897 = vrot.lane.b32.xlu0 %v6896_v13, %s7884_s0  ;;  %v1876_v52 = vpop.f32.mrf.mxu0  ;;  %v12957_v13 = vld [vmem:[#allocation139_spill] sm:$0xff]  ;;  %v12958_v38 = vld [vmem:[#allocation140_spill] sm:$0xff]  ;;  %v12959_v16 = vld [vmem:[#allocation141_spill] sm:$0xff]  ;;  %12967 = vst [vmem:[#allocation22_spill] sm:$0xff] %v10219_v45 }
 0x23a   :  { %v1917_v20 = vpop.f32.mrf.mxu1  ;;  %2203 = vmatprep.subr.bf16.mxu0 %v9564_v33  ;;  %2244 = vmatprep.subr.bf16.mxu1 %v12940_v21  ;;  %v12947_v33 = vld [vmem:[#allocation129_spill] sm:$0xff]  ;;  %v12961_v40 = vld [vmem:[#allocation143_spill] sm:$0xff]  ;;  %v12962_v52 = vld [vmem:[#allocation144_spill] sm:$0xff] }
 0x23b   :  { %v12963_v20 = vld [vmem:[#allocation7_spill] sm:$0xff]  ;;  %v12964_v21 = vld [vmem:[#allocation8_spill] sm:$0xff] }
 0x23c   :  { %2204 = vmatpush1.bf16.msra.mxu0 %v12941_v19  ;;  %v10092_v19 = vld [vmem:[%s12440_s1 + $0x498] ss:$48 sps:$4 sm:$0xff]  }
 0x23d   :  { %2245 = vmatpush1.bf16.msra.mxu1 %v12942_v49  ;;  %6907 = vrot.lane.b32.xlu0 %v6906_v35, %s7884_s0  ;;  %v10086_v35 = vld [vmem:[%s12440_s1 + $0x490] ss:$48 sps:$4 sm:$0xff]   ;;  %v10098_v49 = vld [vmem:[%s12440_s1 + $0x434] ss:$48 sps:$4 sm:$0xff]  }
 0x23e   :  { %2205 = vmatprep.subr.bf16.mxu0 %v12943_v30  ;;  %2246 = vmatprep.subr.bf16.mxu1 %v12944_v24  ;;  %v10104_v30 = vld [vmem:[%s12440_s1 + $0x43c] ss:$48 sps:$4 sm:$0xff]   ;;  %v10110_v24 = vld [vmem:[%s12440_s1 + $0x430] ss:$48 sps:$4 sm:$0xff]  }
 0x240   :  { %2206 = vmatpush1.bf16.msra.mxu0 %v12945_v58  ;;  %v10116_v58 = vld [vmem:[%s12440_s1 + $0x438] ss:$48 sps:$4 sm:$0xff]  }
 0x241   :  { %2247 = vmatpush1.bf16.msra.mxu1 %v12946_v50  ;;  %2207 = vmatprep.subr.bf16.mxu0 %v12947_v33  ;;  %v10122_v50 = vld [vmem:[%s12440_s1 + $0x3d4] ss:$48 sps:$4 sm:$0xff]   ;;  %v10128_v33 = vld [vmem:[%s12440_s1 + $0x3dc] ss:$48 sps:$4 sm:$0xff]  }
 0x242   :  { %2248 = vmatprep.subr.bf16.mxu1 %v12948_v48  ;;  %v10134_v48 = vld [vmem:[%s12440_s1 + $0x3d0] ss:$48 sps:$4 sm:$0xff]  }
 0x244   :  { %2208 = vmatpush1.bf16.msra.mxu0 %v12949_v4  ;;  %v10140_v4 = vld [vmem:[%s12440_s1 + $0x3d8] ss:$48 sps:$4 sm:$0xff]  }
 0x245   :  { %2249 = vmatpush1.bf16.msra.mxu1 %v12950_v7  ;;  %2209 = vmatprep.subr.bf16.mxu0 %v12951_v0  ;;  %v10146_v7 = vld [vmem:[%s12440_s1 + $0x374] ss:$48 sps:$4 sm:$0xff]   ;;  %v10152_v0 = vld [vmem:[%s12440_s1 + $0x37c] ss:$48 sps:$4 sm:$0xff]  }
 0x246   :  { %2250 = vmatprep.subr.bf16.mxu1 %v12952_v5  ;;  %v10158_v5 = vld [vmem:[%s12440_s1 + $0x370] ss:$48 sps:$4 sm:$0xff]  }
 0x248   :  { %2210 = vmatpush1.bf16.msra.mxu0 %v12953_v44  ;;  %v10164_v44 = vld [vmem:[%s12440_s1 + $0x378] ss:$48 sps:$4 sm:$0xff]  }
 0x249   :  { %2251 = vmatpush1.bf16.msra.mxu1 %v12954_v8  ;;  %2211 = vmatprep.subr.bf16.mxu0 %v12955_v10  ;;  %v10170_v8 = vld [vmem:[%s12440_s1 + $0x314] ss:$48 sps:$4 sm:$0xff]   ;;  %v10176_v10 = vld [vmem:[%s12440_s1 + $0x31c] ss:$48 sps:$4 sm:$0xff]  }
 0x24a   :  { %2252 = vmatprep.subr.bf16.mxu1 %v12956_v60  ;;  %v10180_v60 = vsub.s32 1, %v9762_v43 }
 0x24c   :  { %2212 = vmatpush1.bf16.msra.mxu0 %v12957_v13  ;;  %12965 = vst [vmem:[#allocation20_spill] sm:$0xff] %v10180_v60  ;;  %v10185_v13 = vld [vmem:[%s12440_s1 + $0x310] ss:$48 sps:$4 sm:$0xff]   ;;  %v10214_v1 = vrot.slane %v9774_v46, %v10180_v60 }
 0x24d   :  { %2253 = vmatpush1.bf16.msra.mxu1 %v12958_v38  ;;  %2213 = vmatprep.subr.bf16.mxu0 %v12959_v16  ;;  %v10191_v38 = vld [vmem:[%s12440_s1 + $0x318] ss:$48 sps:$4 sm:$0xff]   ;;  %v10197_v16 = vld [vmem:[%s12440_s1 + $0x2c4] ss:$48 sps:$4 sm:$0xff]  }
 0x24e   :  { %2254 = vmatprep.subr.bf16.mxu1 %v12960_v17  ;;  %v10203_v17 = vld [vmem:[%s12440_s1 + $0x2cc] ss:$48 sps:$4 sm:$0xff]   ;;  %12966 = vst [vmem:[#allocation21_spill] sm:$0xff] %v10214_v1  ;;  %v10247_v54 = vadd.f32 %v9990_v12, %v10214_v1 }
 0x24f   :  { %v10264_v12 = vld [vmem:[%s12440_s1 + $0x26c] ss:$48 sps:$4 sm:$0xff]  }
 0x250   :  { %2214 = vmatpush1.bf16.msra.mxu0 %v9696_v59  ;;  %v10050_v59 = vld [vmem:[%s12440_s1 + $0x4f4] ss:$48 sps:$4 sm:$0xff]   ;;  %12971 = vst [vmem:[#allocation28_spill] sm:$0xff] %v10247_v54 }
 0x251   :  { %2255 = vmatpush1.bf16.msra.mxu1 %v12961_v40  ;;  %6123 = vmatprep.subr.msk.bf16.mxu0 %vm1520_vm0, %v12962_v52  ;;  %v10209_v40 = vld [vmem:[%s12441_s2 + $0x8] sm:$0xf] }
 0x252   :  { %6125 = vmatprep.subr.msk.bf16.mxu1 %vm1520_vm0, %v9715_v34  ;;  %v10056_v34 = vld [vmem:[%s12440_s1 + $0x4fc] ss:$48 sps:$4 sm:$0xff]   ;;  %v10243_v6 = vrot.slane %v10209_v40, %v9959_v37 }
 0x254   :  { %2216 = vmatpush2.bf16.msra.mxu0 %v12963_v20 }
 0x255   :  { %2257 = vmatpush2.bf16.msra.mxu1 %v12964_v21  ;;  %2217 = vmatprep.subr.bf16.mxu0 %v9724_v63  ;;  %v10074_v63 = vld [vmem:[%s12440_s1 + $0x494] ss:$48 sps:$4 sm:$0xff]  }
 0x256   :  { %2258 = vmatprep.subr.bf16.mxu1 %v9730_v27  ;;  %v10080_v27 = vld [vmem:[%s12440_s1 + $0x49c] ss:$48 sps:$4 sm:$0xff]  }
 0x258   :  { %2218 = vmatpush2.bf16.msra.mxu0 %v9736_v14  ;;  %v10062_v14 = vld [vmem:[%s12440_s1 + $0x4f0] ss:$48 sps:$4 sm:$0xff]  }
 0x259   :  { %2259 = vmatpush2.bf16.msra.mxu1 %v9742_v15  ;;  %2219 = vmatprep.subr.bf16.mxu0 %v10050_v59  ;;  %v10068_v15 = vld [vmem:[%s12440_s1 + $0x4f8] ss:$48 sps:$4 sm:$0xff]  }
 0x25a   :  { %2260 = vmatprep.subr.bf16.mxu1 %v10056_v34 }
 0x25c   :  { %2220 = vmatpush2.bf16.msra.mxu0 %v10062_v14 }
 0x25d   :  { %2261 = vmatpush2.bf16.msra.mxu1 %v10068_v15  ;;  %2221 = vmatprep.subr.bf16.mxu0 %v10074_v63 }
 0x25e   :  { %2262 = vmatprep.subr.bf16.mxu1 %v10080_v27 }
 0x260   :  { %2222 = vmatpush2.bf16.msra.mxu0 %v10086_v35 }
 0x261   :  { %2263 = vmatpush2.bf16.msra.mxu1 %v10092_v19  ;;  %2223 = vmatprep.subr.bf16.mxu0 %v10098_v49 }
 0x262   :  { %2264 = vmatprep.subr.bf16.mxu1 %v10104_v30 }
 0x264   :  { %2224 = vmatpush2.bf16.msra.mxu0 %v10110_v24 }
 0x265   :  { %2265 = vmatpush2.bf16.msra.mxu1 %v10116_v58  ;;  %2225 = vmatprep.subr.bf16.mxu0 %v10122_v50 }
 0x266   :  { %2266 = vmatprep.subr.bf16.mxu1 %v10128_v33 }
 0x268   :  { %2226 = vmatpush2.bf16.msra.mxu0 %v10134_v48 }
 0x269   :  { %2267 = vmatpush2.bf16.msra.mxu1 %v10140_v4  ;;  %2227 = vmatprep.subr.bf16.mxu0 %v10146_v7 }
 0x26a   :  { %2268 = vmatprep.subr.bf16.mxu1 %v10152_v0 }
 0x26c   :  { %2228 = vmatpush2.bf16.msra.mxu0 %v10158_v5 }
 0x26d   :  { %2269 = vmatpush2.bf16.msra.mxu1 %v10164_v44  ;;  %2229 = vmatprep.subr.bf16.mxu0 %v10170_v8 }
 0x26e   :  { %2270 = vmatprep.subr.bf16.mxu1 %v10176_v10 }
 0x270   :  { %2230 = vmatpush2.bf16.msra.mxu0 %v10185_v13 }
 0x271   :  { %2271 = vmatpush2.bf16.msra.mxu1 %v10191_v38  ;;  %2281 = vmatprep.subr.bf16.mxu0 %v10197_v16 }
 0x272   :  { %2322 = vmatprep.subr.bf16.mxu1 %v10203_v17 }
 0x273   :  { %v1953_v52 = vpop.f32.mrf.mxu0  ;;  %2232 = vmatmul.mubr.bf16.vlgmr.msra.gmra.mxu0 %v9969_v61 }
 0x274   :  { %v10222_v31 = vadd.f32 %v1953_v52, %v9783_v47  ;;  %v1994_v53 = vpop.f32.mrf.mxu1  ;;  %2273 = vmatmul.mubr.bf16.vlgmr.msra.gmra.mxu1 %v9969_v61  ;;  %2282 = vmatpush1.bf16.msra.mxu0 %v10228_v11  ;;  %v10273_v11 = vrot.slane %v9774_v46, %v468_v55  ;;  %v10291_v55 = vld [vmem:[%s12440_s1 + $0x204] ss:$48 sps:$4 sm:$0xff]  }
 0x275   :  { %6128 = vmatprep.mubr.msk.bf16.mxu0 %vm1516_vm12, %v9881_v57  ;;  %2323 = vmatpush1.bf16.msra.mxu1 %v10236_v9  ;;  %v10239_v52 = vpop.f32.mrf.mxu0  ;;  %v10258_v9 = vld [vmem:[%s12440_s1 + $0x264] ss:$48 sps:$4 sm:$0xff]   ;;  %12977 = vst [vmem:[#allocation33_spill] sm:$0xff] %v10291_v55 }
 0x276   :  { %12968 = vst [vmem:[#allocation23_spill] sm:$0xff] %v10222_v31  ;;  %v6891_v18 = vpack.i.bf16 %v10222_v31, %v10219_v45  ;;  %6130 = vmatprep.mubr.msk.bf16.mxu1 %vm1516_vm12, %v9881_v57  ;;  %v10253_v28 = vpop.f32.mrf.mxu1  ;;  %2283 = vmatprep.subr.bf16.mxu0 %v10258_v9  ;;  %v12972_v31 = vld [vmem:[#allocation119_spill] sm:$0xff]  ;;  %v464_v45 = vsub.s32 6, %v9762_v43  ;;  %12974 = vst [vmem:[#allocation30_spill] sm:$0xff] %v10273_v11 }
 0x277   :  { %v1957_v37 = vpop.f32.mrf.mxu0  ;;  %2324 = vmatprep.subr.bf16.mxu1 %v10264_v12  ;;  %v10269_v57 = vadd.f32 %v12972_v31, %v10214_v1  ;;  %v10285_v31 = vld [vmem:[%s12440_s1 + $0x268] ss:$48 sps:$4 sm:$0xff]  }
 0x278   :  { %v1998_v47 = vpop.f32.mrf.mxu1  ;;  %v10278_v37 = vld [vmem:[%s12440_s1 + $0x260] ss:$48 sps:$4 sm:$0xff]   ;;  %6892 = vrot.lane.b32.xlu1 %v6891_v18, %s7884_s0  ;;  %12976 = vst [vmem:[#allocation32_spill] sm:$0xff] %v10285_v31 }
 0x279   :  { %12973 = vst [vmem:[#allocation29_spill] sm:$0xff] %v10269_v57  ;;  %12975 = vst [vmem:[#allocation31_spill] sm:$0xff] %v10278_v37  ;;  %2284 = vmatpush1.bf16.msra.mxu0 %v10278_v37  ;;  %2325 = vmatpush1.bf16.msra.mxu1 %v10285_v31  ;;  %v1958_v1 = vpop.f32.mrf.mxu0  ;;  %v10296_v47 = vadd.f32 %v9876_v26, %v10243_v6  ;;  %v6901_v18 = vpack.i.bf16 %v10247_v54, %v10269_v57  ;;  %v10303_v31 = vld [vmem:[%s12440_s1 + $0x20c] ss:$48 sps:$4 sm:$0xff]   ;;  %v10316_v26 = vld [vmem:[%s12440_s1 + $0x200] ss:$48 sps:$4 sm:$0xff]  }
 0x27a   :  { %2285 = vmatprep.subr.bf16.mxu0 %v10291_v55  ;;  %v1999_v37 = vpop.f32.mrf.mxu1  ;;  %2326 = vmatprep.subr.bf16.mxu1 %v10303_v31  ;;  %v10307_v1 = vrot.slane %v9774_v46, %v464_v45  ;;  %v10311_v55 = vadd.f32 %v9805_v29, %v10273_v11  ;;  %v10329_v29 = vld [vmem:[%s12440_s1 + $0x1a4] ss:$48 sps:$4 sm:$0xff]   ;;  %v12983_v54 = vsub.s32 3, %v9762_v43 }
 0x27b   :  { %12978 = vst [vmem:[#allocation34_spill] sm:$0xff] %v10296_v47  ;;  %v10323_v37 = vld [vmem:[%s12440_s1 + $0x208] ss:$48 sps:$4 sm:$0xff]   ;;  %12982 = vst [vmem:[#allocation38_spill] sm:$0xff] %v10329_v29 }
 0x27c   :  { %12979 = vst [vmem:[#allocation35_spill] sm:$0xff] %v10307_v1  ;;  %12980 = vst [vmem:[#allocation36_spill] sm:$0xff] %v10311_v55  ;;  %6902 = vrot.lane.b32.xlu1 %v6901_v18, %s7884_s0  ;;  %v6911_v45 = vpack.i.bf16 %v10296_v47, %v10311_v55  ;;  %v10337_v18 = vrot.slane %v10209_v40, %v12983_v54  ;;  %v10340_v57 = vadd.f32 %v1994_v53, %v10307_v1  ;;  %v10360_v53 = vld [vmem:[%s12440_s1 + $0x1a0] ss:$48 sps:$4 sm:$0xff]   ;;  %v10367_v54 = vld [vmem:[%s12440_s1 + $0x1a8] ss:$48 sps:$4 sm:$0xff]  }
 0x27d   :  { %2286 = vmatpush1.bf16.msra.mxu0 %v10316_v26  ;;  %12981 = vst [vmem:[#allocation37_spill] sm:$0xff] %v10323_v37  ;;  %2327 = vmatpush1.bf16.msra.mxu1 %v10323_v37  ;;  %v10345_v37 = vld [vmem:[%s12440_s1 + $0x1ac] ss:$48 sps:$4 sm:$0xff]   ;;  %v12987_v47 = vsub.s32 2, %v9762_v43  ;;  %12988 = vst [vmem:[#allocation42_spill] sm:$0xff] %v10367_v54 }
 0x27e   :  { %2287 = vmatprep.subr.bf16.mxu0 %v10329_v29  ;;  %12984 = vst [vmem:[#allocation39_spill] sm:$0xff] %v10337_v18  ;;  %12985 = vst [vmem:[#allocation40_spill] sm:$0xff] %v10340_v57  ;;  %2328 = vmatprep.subr.bf16.mxu1 %v10345_v37  ;;  %v10350_v29 = vadd.f32 %v9788_v51, %v10307_v1  ;;  %v10373_v51 = vld [vmem:[%s12440_s1 + $0x144] ss:$48 sps:$4 sm:$0xff]   ;;  %v10385_v1 = vld [vmem:[%s12440_s1 + $0x14c] ss:$48 sps:$4 sm:$0xff]  }
 0x27f   :  { %v10355_v55 = vrot.slane %v10209_v40, %v12987_v47  ;;  %12989 = vst [vmem:[#allocation43_spill] sm:$0xff] %v10373_v51  ;;  %v10378_v47 = vadd.f32 %v9894_v2, %v10337_v18  ;;  %v10402_v2 = vld [vmem:[%s12440_s1 + $0x148] ss:$48 sps:$4 sm:$0xff]  }
 0x280   :  { %12986 = vst [vmem:[#allocation41_spill] sm:$0xff] %v10350_v29  ;;  %6912 = vrot.lane.b32.xlu1 %v6911_v45, %s7884_s0  ;;  %v6921_v45 = vpack.i.bf16 %v10340_v57, %v10350_v29  ;;  %v10422_v57 = vld [vmem:[%s12440_s1 + $0xe0] ss:$48 sps:$4 sm:$0xff]  }
 0x281   :  { %2288 = vmatpush1.bf16.msra.mxu0 %v10360_v53  ;;  %2329 = vmatpush1.bf16.msra.mxu1 %v10367_v54  ;;  %12990 = vst [vmem:[#allocation44_spill] sm:$0xff] %v10378_v47  ;;  %v10390_v54 = vadd.f32 %v9883_v42, %v10355_v55  ;;  %v10408_v42 = vld [vmem:[%s12440_s1 + $0xe4] ss:$48 sps:$4 sm:$0xff]   ;;  %12992 = vst [vmem:[#allocation46_spill] sm:$0xff] %v10422_v57 }
 0x282   :  { %2289 = vmatprep.subr.bf16.mxu0 %v10373_v51  ;;  %2330 = vmatprep.subr.bf16.mxu1 %v10385_v1  ;;  %v10395_v51 = vld [vmem:[%s12440_s1 + $0x140] ss:$48 sps:$4 sm:$0xff]  }
 0x283   :  { %12991 = vst [vmem:[#allocation45_spill] sm:$0xff] %v10390_v54  ;;  %v6931_v29 = vpack.i.bf16 %v10378_v47, %v10390_v54  ;;  %v10429_v54 = vld [vmem:[%s12440_s1 + $0xe8] ss:$48 sps:$4 sm:$0xff]   ;;  %v10435_v47 = vld [vmem:[%s12440_s1 + $0x84] ss:$48 sps:$4 sm:$0xff]  }
 0x284   :  { %6922 = vrot.lane.b32.xlu1 %v6921_v45, %s7884_s0  ;;  %v10416_v45 = vld [vmem:[%s12440_s1 + $0xec] ss:$48 sps:$4 sm:$0xff]   ;;  %12993 = vst [vmem:[#allocation47_spill] sm:$0xff] %v10429_v54  ;;  %12994 = vst [vmem:[#allocation48_spill] sm:$0xff] %v10435_v47 }
 0x285   :  { %2290 = vmatpush1.bf16.msra.mxu0 %v10395_v51  ;;  %2331 = vmatpush1.bf16.msra.mxu1 %v10402_v2 }
 0x286   :  { %2291 = vmatprep.subr.bf16.mxu0 %v10408_v42  ;;  %2332 = vmatprep.subr.bf16.mxu1 %v10416_v45 }
 0x288   :  { %6932 = vrot.lane.b32.xlu1 %v6931_v29, %s7884_s0  ;;  %v10447_v29 = vld [vmem:[%s12440_s1 + $0x80] ss:$48 sps:$4 sm:$0xff]  }
 0x289   :  { %2292 = vmatpush1.bf16.msra.mxu0 %v10422_v57  ;;  %2333 = vmatpush1.bf16.msra.mxu1 %v10429_v54  ;;  %v10441_v57 = vld [vmem:[%s12440_s1 + $0x8c] ss:$48 sps:$4 sm:$0xff]   ;;  %12996 = vst [vmem:[#allocation50_spill] sm:$0xff] %v10447_v29  ;;  %v10453_v54 = vld [vmem:[%s12440_s1 + $0x88] ss:$48 sps:$4 sm:$0xff]  }
 0x28a   :  { %2293 = vmatprep.subr.bf16.mxu0 %v10435_v47  ;;  %12995 = vst [vmem:[#allocation49_spill] sm:$0xff] %v10441_v57  ;;  %2334 = vmatprep.subr.bf16.mxu1 %v10441_v57  ;;  %12997 = vst [vmem:[#allocation51_spill] sm:$0xff] %v10453_v54  ;;  %v10459_v47 = vld [vmem:[%s12440_s1 + $0x24] ss:$48 sps:$4 sm:$0xff]   ;;  %v10465_v57 = vld [vmem:[%s12440_s1 + $0x2c] ss:$48 sps:$4 sm:$0xff]  }
 0x28b   :  { %12998 = vst [vmem:[#allocation52_spill] sm:$0xff] %v10459_v47  ;;  %12999 = vst [vmem:[#allocation9_spill] sm:$0xff] %v10465_v57 }
 0x28d   :  { %2294 = vmatpush1.bf16.msra.mxu0 %v10447_v29  ;;  %2335 = vmatpush1.bf16.msra.mxu1 %v10453_v54  ;;  %v10471_v29 = vld [vmem:[%s12440_s1 + $0x20] ss:$48 sps:$4 sm:$0xff]   ;;  %v10477_v54 = vld [vmem:[%s12440_s1 + $0x28] ss:$48 sps:$4 sm:$0xff]  }
 0x28e   :  { %2295 = vmatprep.subr.bf16.mxu0 %v10459_v47  ;;  %2336 = vmatprep.subr.bf16.mxu1 %v10465_v57  ;;  %13000 = vst [vmem:[#allocation53_spill] sm:$0xff] %v10471_v29  ;;  %13001 = vst [vmem:[#allocation54_spill] sm:$0xff] %v10477_v54  ;;  %v10483_v47 = vld [vmem:[%s12440_s1 + $0x5c4] ss:$48 sps:$4 sm:$0x1f]  }
 0x28f   :  { %13002 = vst [vmem:[#allocation55_spill] sm:$0xff] %v10483_v47  ;;  %v10490_v57 = vld [vmem:[%s12440_s1 + $0x5cc] ss:$48 sps:$4 sm:$0x1f]  }
 0x290   :  { %13003 = vst [vmem:[#allocation56_spill] sm:$0xff] %v10490_v57 }
 0x291   :  { %2296 = vmatpush1.bf16.msra.mxu0 %v10471_v29  ;;  %2337 = vmatpush1.bf16.msra.mxu1 %v10477_v54  ;;  %v10499_v54 = vld [vmem:[%s12440_s1 + $0x564] ss:$48 sps:$4 sm:$0xff]  }
 0x292   :  { %6127 = vmatprep.subr.msk.bf16.mxu0 %vm1520_vm0, %v10483_v47  ;;  %6129 = vmatprep.subr.msk.bf16.mxu1 %vm1520_vm0, %v10490_v57  ;;  %13004 = vst [vmem:[#allocation57_spill] sm:$0xff] %v10499_v54  ;;  %v10505_v47 = vld [vmem:[%s12440_s1 + $0x56c] ss:$48 sps:$4 sm:$0xff]   ;;  %v10661_v57 = vrot.slane %v10209_v40, %v10180_v60  ;;  %v10676_v40 = vadd.f32 %v10253_v28, %v10273_v11  ;;  %v7763_v11 = vld [vmem:[%s12440_s1 + $0x240] ss:$48 sps:$4 sm:$0xff]  }
 0x293   :  { %13005 = vst [vmem:[#allocation58_spill] sm:$0xff] %v10505_v47 }
 0x294   :  { %13030 = vst [vmem:[#allocation83_spill] sm:$0xff] %v10661_v57 }
 0x295   :  { %2298 = vmatpush2.bf16.msra.mxu0 %v8942_v36  ;;  %2339 = vmatpush2.bf16.msra.mxu1 %v8947_v23  ;;  %v10511_v36 = vld [vmem:[%s12440_s1 + $0x560] ss:$48 sps:$4 sm:$0xff]   ;;  %v10517_v23 = vld [vmem:[%s12440_s1 + $0x568] ss:$48 sps:$4 sm:$0xff]  }
 0x296   :  { %2299 = vmatprep.subr.bf16.mxu0 %v10499_v54  ;;  %2340 = vmatprep.subr.bf16.mxu1 %v10505_v47  ;;  %13006 = vst [vmem:[#allocation59_spill] sm:$0xff] %v10511_v36  ;;  %13007 = vst [vmem:[#allocation60_spill] sm:$0xff] %v10517_v23  ;;  %v10523_v54 = vld [vmem:[%s12440_s1 + $0x504] ss:$48 sps:$4 sm:$0xff]   ;;  %v10529_v47 = vld [vmem:[%s12440_s1 + $0x50c] ss:$48 sps:$4 sm:$0xff]  }
 0x297   :  { %13008 = vst [vmem:[#allocation61_spill] sm:$0xff] %v10523_v54  ;;  %13009 = vst [vmem:[#allocation62_spill] sm:$0xff] %v10529_v47 }
 0x299   :  { %2300 = vmatpush2.bf16.msra.mxu0 %v10511_v36  ;;  %2341 = vmatpush2.bf16.msra.mxu1 %v10517_v23  ;;  %v10535_v36 = vld [vmem:[%s12440_s1 + $0x500] ss:$48 sps:$4 sm:$0xff]   ;;  %v10541_v23 = vld [vmem:[%s12440_s1 + $0x508] ss:$48 sps:$4 sm:$0xff]  }
 0x29a   :  { %2301 = vmatprep.subr.bf16.mxu0 %v10523_v54  ;;  %2342 = vmatprep.subr.bf16.mxu1 %v10529_v47  ;;  %13010 = vst [vmem:[#allocation63_spill] sm:$0xff] %v10535_v36  ;;  %13011 = vst [vmem:[#allocation64_spill] sm:$0xff] %v10541_v23  ;;  %v10547_v54 = vld [vmem:[%s12440_s1 + $0x4a4] ss:$48 sps:$4 sm:$0xff]   ;;  %v10553_v47 = vld [vmem:[%s12440_s1 + $0x4ac] ss:$48 sps:$4 sm:$0xff]  }
 0x29b   :  { %13012 = vst [vmem:[#allocation65_spill] sm:$0xff] %v10547_v54  ;;  %13013 = vst [vmem:[#allocation66_spill] sm:$0xff] %v10553_v47 }
 0x29d   :  { %2302 = vmatpush2.bf16.msra.mxu0 %v10535_v36  ;;  %2343 = vmatpush2.bf16.msra.mxu1 %v10541_v23  ;;  %v10559_v36 = vld [vmem:[%s12440_s1 + $0x4a0] ss:$48 sps:$4 sm:$0xff]   ;;  %v10565_v23 = vld [vmem:[%s12440_s1 + $0x4a8] ss:$48 sps:$4 sm:$0xff]  }
 0x29e   :  { %2303 = vmatprep.subr.bf16.mxu0 %v10547_v54  ;;  %2344 = vmatprep.subr.bf16.mxu1 %v10553_v47  ;;  %13014 = vst [vmem:[#allocation67_spill] sm:$0xff] %v10559_v36  ;;  %13015 = vst [vmem:[#allocation68_spill] sm:$0xff] %v10565_v23  ;;  %v10571_v54 = vld [vmem:[%s12440_s1 + $0x444] ss:$48 sps:$4 sm:$0xff]   ;;  %v10577_v47 = vld [vmem:[%s12440_s1 + $0x44c] ss:$48 sps:$4 sm:$0xff]  }
 0x29f   :  { %13016 = vst [vmem:[#allocation69_spill] sm:$0xff] %v10571_v54  ;;  %13017 = vst [vmem:[#allocation70_spill] sm:$0xff] %v10577_v47 }
 0x2a1   :  { %2304 = vmatpush2.bf16.msra.mxu0 %v10559_v36  ;;  %2345 = vmatpush2.bf16.msra.mxu1 %v10565_v23  ;;  %v10583_v36 = vld [vmem:[%s12440_s1 + $0x440] ss:$48 sps:$4 sm:$0xff]   ;;  %v10589_v23 = vld [vmem:[%s12440_s1 + $0x448] ss:$48 sps:$4 sm:$0xff]  }
 0x2a2   :  { %2305 = vmatprep.subr.bf16.mxu0 %v10571_v54  ;;  %2346 = vmatprep.subr.bf16.mxu1 %v10577_v47  ;;  %13018 = vst [vmem:[#allocation71_spill] sm:$0xff] %v10583_v36  ;;  %13019 = vst [vmem:[#allocation72_spill] sm:$0xff] %v10589_v23  ;;  %v10595_v54 = vld [vmem:[%s12440_s1 + $0x3e4] ss:$48 sps:$4 sm:$0xff]   ;;  %v10601_v47 = vld [vmem:[%s12440_s1 + $0x3ec] ss:$48 sps:$4 sm:$0xff]  }
 0x2a3   :  { %13020 = vst [vmem:[#allocation73_spill] sm:$0xff] %v10595_v54  ;;  %13021 = vst [vmem:[#allocation74_spill] sm:$0xff] %v10601_v47 }
 0x2a5   :  { %2306 = vmatpush2.bf16.msra.mxu0 %v10583_v36  ;;  %2347 = vmatpush2.bf16.msra.mxu1 %v10589_v23  ;;  %v10607_v36 = vld [vmem:[%s12440_s1 + $0x3e0] ss:$48 sps:$4 sm:$0xff]   ;;  %v10613_v23 = vld [vmem:[%s12440_s1 + $0x3e8] ss:$48 sps:$4 sm:$0xff]  }
 0x2a6   :  { %2307 = vmatprep.subr.bf16.mxu0 %v10595_v54  ;;  %2348 = vmatprep.subr.bf16.mxu1 %v10601_v47  ;;  %13022 = vst [vmem:[#allocation75_spill] sm:$0xff] %v10607_v36  ;;  %13023 = vst [vmem:[#allocation76_spill] sm:$0xff] %v10613_v23  ;;  %v10619_v54 = vld [vmem:[%s12440_s1 + $0x384] ss:$48 sps:$4 sm:$0xff]   ;;  %v10625_v47 = vld [vmem:[%s12440_s1 + $0x38c] ss:$48 sps:$4 sm:$0xff]  }
 0x2a7   :  { %13024 = vst [vmem:[#allocation77_spill] sm:$0xff] %v10619_v54  ;;  %13025 = vst [vmem:[#allocation78_spill] sm:$0xff] %v10625_v47 }
 0x2a9   :  { %2308 = vmatpush2.bf16.msra.mxu0 %v10607_v36  ;;  %2349 = vmatpush2.bf16.msra.mxu1 %v10613_v23  ;;  %v10631_v36 = vld [vmem:[%s12440_s1 + $0x380] ss:$48 sps:$4 sm:$0xff]   ;;  %v10637_v23 = vld [vmem:[%s12440_s1 + $0x388] ss:$48 sps:$4 sm:$0xff]  }
 0x2aa   :  { %2309 = vmatprep.subr.bf16.mxu0 %v10619_v54  ;;  %2350 = vmatprep.subr.bf16.mxu1 %v10625_v47  ;;  %13026 = vst [vmem:[#allocation79_spill] sm:$0xff] %v10631_v36  ;;  %13027 = vst [vmem:[#allocation80_spill] sm:$0xff] %v10637_v23  ;;  %v10643_v54 = vld [vmem:[%s12440_s1 + $0x324] ss:$48 sps:$4 sm:$0xff]   ;;  %v10649_v47 = vld [vmem:[%s12440_s1 + $0x32c] ss:$48 sps:$4 sm:$0xff]  }
 0x2ab   :  { %13028 = vst [vmem:[#allocation81_spill] sm:$0xff] %v10643_v54  ;;  %13029 = vst [vmem:[#allocation82_spill] sm:$0xff] %v10649_v47 }
 0x2ad   :  { %2310 = vmatpush2.bf16.msra.mxu0 %v10631_v36  ;;  %2351 = vmatpush2.bf16.msra.mxu1 %v10637_v23  ;;  %v460_v36 = vsub.s32 5, %v9762_v43  ;;  %v10656_v23 = vld [vmem:[%s12440_s1 + $0x320] ss:$48 sps:$4 sm:$0xff]  }
 0x2ae   :  { %2311 = vmatprep.subr.bf16.mxu0 %v10643_v54  ;;  %2352 = vmatprep.subr.bf16.mxu1 %v10649_v47  ;;  %v13031_v43 = vld [vmem:[#allocation11_spill] sm:$0xff] }
 0x2af   :  { %v10669_v54 = vpack.c.b16 %v13031_v43, %v13031_v43  ;;  %v10672_v29 = vrot.slane %v9774_v46, %v460_v36  ;;  %v10687_v43 = vadd.f32 %v9890_v62, %v10661_v57  ;;  %v7760_v36 = vld [vmem:[%s12440_s1 + $0x2a8] ss:$48 sps:$4 sm:$0xff]  }
 0x2b1   :  { %2312 = vmatpush2.bf16.msra.mxu0 %v10656_v23  ;;  %2353 = vmatpush2.bf16.msra.mxu1 %v12858_v32  ;;  %13032 = vst [vmem:[#allocation84_spill] sm:$0xff] %v10672_v29  ;;  %v10696_v28 = vadd.f32 %v10239_v52, %v10672_v29  ;;  %v7762_v52 = vld [vmem:[%s12440_s1 + $0x24c] ss:$48 sps:$4 sm:$0xff]   ;;  %v10713_v60 = vadd.f32 %v9803_v25, %v10672_v29  ;;  %v7765_v25 = vld [vmem:[%s12440_s1 + $0x1e4] ss:$48 sps:$4 sm:$0xff]  }
 0x2b2   :  { %2397 = vmatprep.subr.bf16.mxu0 %v12859_v22  ;;  %2438 = vmatprep.subr.bf16.mxu1 %v12860_v56  ;;  %v7759_v56 = vld [vmem:[%s12440_s1 + $0x2a0] ss:$48 sps:$4 sm:$0xff]  }
 0x2b3   :  { %v2035_v47 = vpop.f32.mrf.mxu0 }
 0x2b4   :  { %2314 = vmatmul.mubr.bf16.vlgmr.msra.gmra.mxu0 %v9969_v61  ;;  %v10679_v32 = vadd.f32 %v2035_v47, %v10243_v6  ;;  %v2076_v22 = vpop.f32.mrf.mxu1  ;;  %2355 = vmatmul.mubr.bf16.vlgmr.msra.gmra.mxu1 %v9969_v61 }
 0x2b5   :  { %2398 = vmatpush1.bf16.msra.mxu0 %v7759_v56  ;;  %6132 = vmatprep.mubr.msk.bf16.mxu0 %vm1516_vm12, %v10669_v54  ;;  %v2037_v46 = vpop.f32.mrf.mxu0  ;;  %v7761_v56 = vld [vmem:[%s12440_s1 + $0x244] ss:$48 sps:$4 sm:$0xff]  }
 0x2b6   :  { %2439 = vmatpush1.bf16.msra.mxu1 %v7760_v36  ;;  %v6916_v61 = vpack.i.bf16 %v10679_v32, %v10676_v40  ;;  %6134 = vmatprep.mubr.msk.bf16.mxu1 %vm1516_vm12, %v10669_v54  ;;  %v10703_v62 = vadd.f32 %v2037_v46, %v10661_v57  ;;  %v2078_v47 = vpop.f32.mrf.mxu1 }
 0x2b7   :  { %2399 = vmatprep.subr.bf16.mxu0 %v7761_v56  ;;  %v2039_v36 = vpop.f32.mrf.mxu0  ;;  %2440 = vmatprep.subr.bf16.mxu1 %v7762_v52  ;;  %v7764_v56 = vld [vmem:[%s12440_s1 + $0x248] ss:$48 sps:$4 sm:$0xff]   ;;  %v10730_v52 = vadd.f32 %v2078_v47, %v10337_v18 }
 0x2b8   :  { %v6941_v46 = vpack.i.bf16 %v10703_v62, %v10687_v43  ;;  %v2080_v57 = vpop.f32.mrf.mxu1  ;;  %6917 = vrot.lane.b32.xlu0 %v6916_v61, %s7884_s0  ;;  %v7766_v61 = vld [vmem:[%s12440_s1 + $0x1ec] ss:$48 sps:$4 sm:$0xff]   ;;  %v7768_v47 = vld [vmem:[%s12440_s1 + $0x1e8] ss:$48 sps:$4 sm:$0xff]  }
 0x2b9   :  { %2400 = vmatpush1.bf16.msra.mxu0 %v7763_v11  ;;  %v2040_v36 = vpop.f32.mrf.mxu0  ;;  %v6926_v57 = vpack.i.bf16 %v10696_v28, %v10713_v60  ;;  %v7826_v18 = vld [vmem:[%s12440_s1 + $0x258] ss:$48 sps:$4 sm:$0xff]  }
 0x2ba   :  { %2441 = vmatpush1.bf16.msra.mxu1 %v7764_v56  ;;  %2401 = vmatprep.subr.bf16.mxu0 %v7765_v25  ;;  %v2081_v11 = vpop.f32.mrf.mxu1  ;;  %v10737_v56 = vadd.f32 %v2076_v22, %v10355_v55  ;;  %v7767_v36 = vld [vmem:[%s12440_s1 + $0x1e0] ss:$48 sps:$4 sm:$0xff]   ;;  %v7770_v25 = vld [vmem:[%s12440_s1 + $0x18c] ss:$48 sps:$4 sm:$0xff]  }
 0x2bb   :  { %6942 = vrot.lane.b32.xlu1 %v6941_v46, %s7884_s0  ;;  %2442 = vmatprep.subr.bf16.mxu1 %v7766_v61  ;;  %v7769_v46 = vld [vmem:[%s12440_s1 + $0x184] ss:$48 sps:$4 sm:$0xff]   ;;  %v7772_v11 = vld [vmem:[%s12440_s1 + $0x188] ss:$48 sps:$4 sm:$0xff]  }
 0x2bc   :  { %6927 = vrot.lane.b32.xlu0 %v6926_v57, %s7884_s0  ;;  %v6936_v22 = vpack.i.bf16 %v10730_v52, %v10737_v56  ;;  %v7771_v57 = vld [vmem:[%s12440_s1 + $0x180] ss:$48 sps:$4 sm:$0xff]   ;;  %v7773_v61 = vld [vmem:[%s12440_s1 + $0x124] ss:$48 sps:$4 sm:$0xff]  }
 0x2bd   :  { %2402 = vmatpush1.bf16.msra.mxu0 %v7767_v36  ;;  %v7774_v36 = vld [vmem:[%s12440_s1 + $0x12c] ss:$48 sps:$4 sm:$0xff]  }
 0x2be   :  { %2443 = vmatpush1.bf16.msra.mxu1 %v7768_v47  ;;  %2403 = vmatprep.subr.bf16.mxu0 %v7769_v46  ;;  %v7775_v47 = vld [vmem:[%s12440_s1 + $0x120] ss:$48 sps:$4 sm:$0xff]   ;;  %v7776_v46 = vld [vmem:[%s12440_s1 + $0x128] ss:$48 sps:$4 sm:$0xff]  }
 0x2bf   :  { %2444 = vmatprep.subr.bf16.mxu1 %v7770_v25  ;;  %v7778_v25 = vld [vmem:[%s12440_s1 + $0xcc] ss:$48 sps:$4 sm:$0xff]  }
 0x2c0   :  { %6937 = vrot.lane.b32.xlu0 %v6936_v22, %s7884_s0  ;;  %v7777_v22 = vld [vmem:[%s12440_s1 + $0xc4] ss:$48 sps:$4 sm:$0xff]  }
 0x2c1   :  { %2404 = vmatpush1.bf16.msra.mxu0 %v7771_v57  ;;  %v7779_v57 = vld [vmem:[%s12440_s1 + $0xc0] ss:$48 sps:$4 sm:$0xff]  }
 0x2c2   :  { %2445 = vmatpush1.bf16.msra.mxu1 %v7772_v11  ;;  %2405 = vmatprep.subr.bf16.mxu0 %v7773_v61  ;;  %v7780_v11 = vld [vmem:[%s12440_s1 + $0xc8] ss:$48 sps:$4 sm:$0xff]   ;;  %v7781_v61 = vld [vmem:[%s12440_s1 + $0x64] ss:$48 sps:$4 sm:$0xff]  }
 0x2c3   :  { %2446 = vmatprep.subr.bf16.mxu1 %v7774_v36  ;;  %v7782_v36 = vld [vmem:[%s12440_s1 + $0x6c] ss:$48 sps:$4 sm:$0xff]  }
 0x2c5   :  { %2406 = vmatpush1.bf16.msra.mxu0 %v7775_v47  ;;  %v7783_v47 = vld [vmem:[%s12440_s1 + $0x60] ss:$48 sps:$4 sm:$0xff]  }
 0x2c6   :  { %2447 = vmatpush1.bf16.msra.mxu1 %v7776_v46  ;;  %2407 = vmatprep.subr.bf16.mxu0 %v7777_v22  ;;  %v7784_v46 = vld [vmem:[%s12440_s1 + $0x68] ss:$48 sps:$4 sm:$0xff]   ;;  %v7785_v22 = vld [vmem:[%s12440_s1 + $0x4] ss:$48 sps:$4 sm:$0xff]  }
 0x2c7   :  { %2448 = vmatprep.subr.bf16.mxu1 %v7778_v25  ;;  %v7786_v25 = vld [vmem:[%s12440_s1 + $0xc] ss:$48 sps:$4 sm:$0xff]  }
 0x2c9   :  { %2408 = vmatpush1.bf16.msra.mxu0 %v7779_v57  ;;  %v7787_v57 = vld [vmem:[%s12440_s1] ss:$48 sps:$4 sm:$0xff]  }
 0x2ca   :  { %2449 = vmatpush1.bf16.msra.mxu1 %v7780_v11  ;;  %2409 = vmatprep.subr.bf16.mxu0 %v7781_v61  ;;  %v7788_v11 = vld [vmem:[%s12440_s1 + $0x8] ss:$48 sps:$4 sm:$0xff]   ;;  %v7789_v61 = vld [vmem:[%s12440_s1 + $0x5a4] ss:$48 sps:$4 sm:$0x1f]  }
 0x2cb   :  { %2450 = vmatprep.subr.bf16.mxu1 %v7782_v36  ;;  %v7790_v36 = vld [vmem:[%s12440_s1 + $0x5ac] ss:$48 sps:$4 sm:$0x1f]  }
 0x2cd   :  { %2410 = vmatpush1.bf16.msra.mxu0 %v7783_v47  ;;  %v7791_v47 = vld [vmem:[%s12440_s1 + $0x544] ss:$48 sps:$4 sm:$0xff]  }
 0x2ce   :  { %2451 = vmatpush1.bf16.msra.mxu1 %v7784_v46  ;;  %2411 = vmatprep.subr.bf16.mxu0 %v7785_v22  ;;  %v7792_v46 = vld [vmem:[%s12440_s1 + $0x54c] ss:$48 sps:$4 sm:$0xff]   ;;  %v7793_v22 = vld [vmem:[%s12440_s1 + $0x540] ss:$48 sps:$4 sm:$0xff]  }
 0x2cf   :  { %2452 = vmatprep.subr.bf16.mxu1 %v7786_v25  ;;  %v7796_v25 = vld [vmem:[%s12440_s1 + $0x4ec] ss:$48 sps:$4 sm:$0xff]  }
 0x2d1   :  { %2412 = vmatpush1.bf16.msra.mxu0 %v7787_v57  ;;  %v7797_v57 = vld [vmem:[%s12440_s1 + $0x4e0] ss:$48 sps:$4 sm:$0xff]  }
 0x2d2   :  { %2453 = vmatpush1.bf16.msra.mxu1 %v7788_v11  ;;  %6131 = vmatprep.subr.msk.bf16.mxu0 %vm1520_vm0, %v7789_v61  ;;  %v7798_v11 = vld [vmem:[%s12440_s1 + $0x4e8] ss:$48 sps:$4 sm:$0xff]   ;;  %v7799_v61 = vld [vmem:[%s12440_s1 + $0x484] ss:$48 sps:$4 sm:$0xff]  }
 0x2d3   :  { %6133 = vmatprep.subr.msk.bf16.mxu1 %vm1520_vm0, %v7790_v36  ;;  %v7800_v36 = vld [vmem:[%s12440_s1 + $0x48c] ss:$48 sps:$4 sm:$0xff]  }
 0x2d5   :  { %2414 = vmatpush2.bf16.msra.mxu0 %v12894_v41  ;;  %v7794_v41 = vld [vmem:[%s12440_s1 + $0x548] ss:$48 sps:$4 sm:$0xff]  }
 0x2d6   :  { %2455 = vmatpush2.bf16.msra.mxu1 %v12895_v3  ;;  %2415 = vmatprep.subr.bf16.mxu0 %v7791_v47  ;;  %v7795_v3 = vld [vmem:[%s12440_s1 + $0x4e4] ss:$48 sps:$4 sm:$0xff]   ;;  %v7801_v47 = vld [vmem:[%s12440_s1 + $0x480] ss:$48 sps:$4 sm:$0xff]  }
 0x2d7   :  { %2456 = vmatprep.subr.bf16.mxu1 %v7792_v46  ;;  %v7802_v46 = vld [vmem:[%s12440_s1 + $0x488] ss:$48 sps:$4 sm:$0xff]  }
 0x2d9   :  { %2416 = vmatpush2.bf16.msra.mxu0 %v7793_v22  ;;  %v7803_v22 = vld [vmem:[%s12440_s1 + $0x424] ss:$48 sps:$4 sm:$0xff]  }
 0x2da   :  { %2457 = vmatpush2.bf16.msra.mxu1 %v7794_v41  ;;  %2417 = vmatprep.subr.bf16.mxu0 %v7795_v3  ;;  %v7804_v41 = vld [vmem:[%s12440_s1 + $0x42c] ss:$48 sps:$4 sm:$0xff]   ;;  %v7805_v3 = vld [vmem:[%s12440_s1 + $0x420] ss:$48 sps:$4 sm:$0xff]  }
 0x2db   :  { %2458 = vmatprep.subr.bf16.mxu1 %v7796_v25  ;;  %v7806_v25 = vld [vmem:[%s12440_s1 + $0x428] ss:$48 sps:$4 sm:$0xff]  }
 0x2dd   :  { %2418 = vmatpush2.bf16.msra.mxu0 %v7797_v57  ;;  %v7807_v57 = vld [vmem:[%s12440_s1 + $0x3c4] ss:$48 sps:$4 sm:$0xff]  }
 0x2de   :  { %2459 = vmatpush2.bf16.msra.mxu1 %v7798_v11  ;;  %2419 = vmatprep.subr.bf16.mxu0 %v7799_v61  ;;  %v7808_v11 = vld [vmem:[%s12440_s1 + $0x3cc] ss:$48 sps:$4 sm:$0xff]   ;;  %v7809_v61 = vld [vmem:[%s12440_s1 + $0x3c0] ss:$48 sps:$4 sm:$0xff]  }
 0x2df   :  { %2460 = vmatprep.subr.bf16.mxu1 %v7800_v36  ;;  %v7810_v36 = vld [vmem:[%s12440_s1 + $0x3c8] ss:$48 sps:$4 sm:$0xff]  }
 0x2e1   :  { %2420 = vmatpush2.bf16.msra.mxu0 %v7801_v47  ;;  %v7811_v47 = vld [vmem:[%s12440_s1 + $0x364] ss:$48 sps:$4 sm:$0xff]  }
 0x2e2   :  { %2461 = vmatpush2.bf16.msra.mxu1 %v7802_v46  ;;  %2421 = vmatprep.subr.bf16.mxu0 %v7803_v22  ;;  %v7812_v46 = vld [vmem:[%s12440_s1 + $0x36c] ss:$48 sps:$4 sm:$0xff]   ;;  %v7813_v22 = vld [vmem:[%s12440_s1 + $0x360] ss:$48 sps:$4 sm:$0xff]  }
 0x2e3   :  { %2462 = vmatprep.subr.bf16.mxu1 %v7804_v41  ;;  %v7814_v41 = vld [vmem:[%s12440_s1 + $0x368] ss:$48 sps:$4 sm:$0xff]  }
 0x2e5   :  { %2422 = vmatpush2.bf16.msra.mxu0 %v7805_v3  ;;  %v7815_v3 = vld [vmem:[%s12440_s1 + $0x304] ss:$48 sps:$4 sm:$0xff]  }
 0x2e6   :  { %2463 = vmatpush2.bf16.msra.mxu1 %v7806_v25  ;;  %2423 = vmatprep.subr.bf16.mxu0 %v7807_v57  ;;  %v7816_v25 = vld [vmem:[%s12440_s1 + $0x30c] ss:$48 sps:$4 sm:$0xff]   ;;  %v7817_v57 = vld [vmem:[%s12440_s1 + $0x300] ss:$48 sps:$4 sm:$0xff]  }
 0x2e7   :  { %2464 = vmatprep.subr.bf16.mxu1 %v7808_v11  ;;  %v7818_v11 = vld [vmem:[%s12440_s1 + $0x308] ss:$48 sps:$4 sm:$0xff]  }
 0x2e9   :  { %2424 = vmatpush2.bf16.msra.mxu0 %v7809_v61  ;;  %v13033_v61 = vld [vmem:[#allocation12_spill] sm:$0xff] }
 0x2ea   :  { %2465 = vmatpush2.bf16.msra.mxu1 %v7810_v36  ;;  %2425 = vmatprep.subr.bf16.mxu0 %v7811_v47  ;;  %v10905_v36 = vpack.c.b16 %v13033_v61, %v13033_v61  ;;  %v7819_v47 = vld [vmem:[%s12440_s1 + $0x2b4] ss:$48 sps:$4 sm:$0xff]  }
 0x2eb   :  { %2466 = vmatprep.subr.bf16.mxu1 %v7812_v46  ;;  %v7820_v46 = vld [vmem:[%s12440_s1 + $0x2bc] ss:$48 sps:$4 sm:$0xff]   ;;  %v7823_v61 = vld [vmem:[%s12440_s1 + $0x254] ss:$48 sps:$4 sm:$0xff]  }
 0x2ed   :  { %2426 = vmatpush2.bf16.msra.mxu0 %v7813_v22 }
 0x2ee   :  { %2467 = vmatpush2.bf16.msra.mxu1 %v7814_v41  ;;  %2427 = vmatprep.subr.bf16.mxu0 %v7815_v3  ;;  %v7821_v3 = vld [vmem:[%s12440_s1 + $0x2b0] ss:$48 sps:$4 sm:$0xff]  }
 0x2ef   :  { %2468 = vmatprep.subr.bf16.mxu1 %v7816_v25  ;;  %v7822_v25 = vld [vmem:[%s12440_s1 + $0x2b8] ss:$48 sps:$4 sm:$0xff]  }
 0x2f1   :  { %2428 = vmatpush2.bf16.msra.mxu0 %v7817_v57 }
 0x2f2   :  { %2469 = vmatpush2.bf16.msra.mxu1 %v7818_v11  ;;  %2479 = vmatprep.subr.bf16.mxu0 %v7819_v47 }
 0x2f3   :  { %2520 = vmatprep.subr.bf16.mxu1 %v7820_v46  ;;  %v10913_v22 = vpop.f32.mrf.mxu0  ;;  %v7824_v46 = vld [vmem:[%s12440_s1 + $0x25c] ss:$48 sps:$4 sm:$0xff]  }
 0x2f4   :  { %2430 = vmatmul.mubr.bf16.vlgmr.msra.gmra.mxu0 %v10905_v36  ;;  %v10916_v41 = vpop.f32.mrf.mxu1 }
 0x2f5   :  { %2471 = vmatmul.mubr.bf16.vlgmr.msra.gmra.mxu1 %v10905_v36  ;;  %2480 = vmatpush1.bf16.msra.mxu0 %v7821_v3  ;;  %v10927_v57 = vpop.f32.mrf.mxu0 }
 0x2f6   :  { %6136 = vmatprep.mubr.msk.bf16.mxu0 %vm1516_vm12, %v10669_v54  ;;  %2521 = vmatpush1.bf16.msra.mxu1 %v7822_v25  ;;  %v10931_v11 = vpop.f32.mrf.mxu1  ;;  %v7825_v25 = vld [vmem:[%s12440_s1 + $0x250] ss:$48 sps:$4 sm:$0xff]  }
 0x2f7   :  { %6138 = vmatprep.mubr.msk.bf16.mxu1 %vm1516_vm12, %v10669_v54  ;;  %2481 = vmatprep.subr.bf16.mxu0 %v7823_v61  ;;  %v2155_v47 = vpop.f32.mrf.mxu0  ;;  %v7827_v61 = vld [vmem:[%s12440_s1 + $0x1f4] ss:$48 sps:$4 sm:$0xff]  }
 0x2f8   :  { %2522 = vmatprep.subr.bf16.mxu1 %v7824_v46  ;;  %v2196_v3 = vpop.f32.mrf.mxu1  ;;  %v7828_v46 = vld [vmem:[%s12440_s1 + $0x1fc] ss:$48 sps:$4 sm:$0xff]  }
 0x2f9   :  { %2482 = vmatpush1.bf16.msra.mxu0 %v7825_v25  ;;  %v2156_v29 = vpop.f32.mrf.mxu0  ;;  %v7829_v3 = vld [vmem:[%s12440_s1 + $0x1f0] ss:$48 sps:$4 sm:$0xff]   ;;  %v7832_v25 = vld [vmem:[%s12440_s1 + $0x19c] ss:$48 sps:$4 sm:$0xff]  }
 0x2fa   :  { %2523 = vmatpush1.bf16.msra.mxu1 %v7826_v18  ;;  %2483 = vmatprep.subr.bf16.mxu0 %v7827_v61  ;;  %v2197_v47 = vpop.f32.mrf.mxu1  ;;  %v7830_v18 = vld [vmem:[%s12440_s1 + $0x1f8] ss:$48 sps:$4 sm:$0xff]   ;;  %v7831_v29 = vld [vmem:[%s12440_s1 + $0x194] ss:$48 sps:$4 sm:$0xff]   ;;  %v7833_v61 = vld [vmem:[%s12440_s1 + $0x190] ss:$48 sps:$4 sm:$0xff]  }
 0x2fb   :  { %2524 = vmatprep.subr.bf16.mxu1 %v7828_v46  ;;  %v7834_v47 = vld [vmem:[%s12440_s1 + $0x198] ss:$48 sps:$4 sm:$0xff]   ;;  %v7835_v46 = vld [vmem:[%s12440_s1 + $0x134] ss:$48 sps:$4 sm:$0xff]  }
 0x2fd   :  { %2484 = vmatpush1.bf16.msra.mxu0 %v7829_v3  ;;  %v7836_v3 = vld [vmem:[%s12440_s1 + $0x13c] ss:$48 sps:$4 sm:$0xff]  }
 0x2fe   :  { %2525 = vmatpush1.bf16.msra.mxu1 %v7830_v18  ;;  %2485 = vmatprep.subr.bf16.mxu0 %v7831_v29  ;;  %v7837_v18 = vld [vmem:[%s12440_s1 + $0x130] ss:$48 sps:$4 sm:$0xff]   ;;  %v7838_v29 = vld [vmem:[%s12440_s1 + $0x138] ss:$48 sps:$4 sm:$0xff]  }
 0x2ff   :  { %2526 = vmatprep.subr.bf16.mxu1 %v7832_v25  ;;  %v7839_v25 = vld [vmem:[%s12440_s1 + $0xd4] ss:$48 sps:$4 sm:$0xff]  }
 0x301   :  { %2486 = vmatpush1.bf16.msra.mxu0 %v7833_v61  ;;  %v7840_v61 = vld [vmem:[%s12440_s1 + $0xdc] ss:$48 sps:$4 sm:$0xff]  }
 0x302   :  { %2527 = vmatpush1.bf16.msra.mxu1 %v7834_v47  ;;  %2487 = vmatprep.subr.bf16.mxu0 %v7835_v46  ;;  %v7841_v47 = vld [vmem:[%s12440_s1 + $0xd0] ss:$48 sps:$4 sm:$0xff]   ;;  %v7842_v46 = vld [vmem:[%s12440_s1 + $0xd8] ss:$48 sps:$4 sm:$0xff]  }
 0x303   :  { %2528 = vmatprep.subr.bf16.mxu1 %v7836_v3  ;;  %v7843_v3 = vld [vmem:[%s12440_s1 + $0x74] ss:$48 sps:$4 sm:$0xff]  }
 0x305   :  { %2488 = vmatpush1.bf16.msra.mxu0 %v7837_v18  ;;  %v7844_v18 = vld [vmem:[%s12440_s1 + $0x7c] ss:$48 sps:$4 sm:$0xff]  }
 0x306   :  { %2529 = vmatpush1.bf16.msra.mxu1 %v7838_v29  ;;  %2489 = vmatprep.subr.bf16.mxu0 %v7839_v25  ;;  %v7845_v29 = vld [vmem:[%s12440_s1 + $0x70] ss:$48 sps:$4 sm:$0xff]   ;;  %v7846_v25 = vld [vmem:[%s12440_s1 + $0x78] ss:$48 sps:$4 sm:$0xff]  }
 0x307   :  { %2530 = vmatprep.subr.bf16.mxu1 %v7840_v61  ;;  %v7847_v61 = vld [vmem:[%s12440_s1 + $0x14] ss:$48 sps:$4 sm:$0xff]  }
 0x309   :  { %2490 = vmatpush1.bf16.msra.mxu0 %v7841_v47  ;;  %v7848_v47 = vld [vmem:[%s12440_s1 + $0x1c] ss:$48 sps:$4 sm:$0xff]  }
 0x30a   :  { %2531 = vmatpush1.bf16.msra.mxu1 %v7842_v46  ;;  %2491 = vmatprep.subr.bf16.mxu0 %v7843_v3  ;;  %v7849_v46 = vld [vmem:[%s12440_s1 + $0x10] ss:$48 sps:$4 sm:$0xff]   ;;  %v7850_v3 = vld [vmem:[%s12440_s1 + $0x18] ss:$48 sps:$4 sm:$0xff]  }
 0x30b   :  { %2532 = vmatprep.subr.bf16.mxu1 %v7844_v18  ;;  %v7851_v18 = vld [vmem:[%s12440_s1 + $0x5b4] ss:$48 sps:$4 sm:$0x1f]  }
 0x30d   :  { %2492 = vmatpush1.bf16.msra.mxu0 %v7845_v29  ;;  %v7852_v29 = vld [vmem:[%s12440_s1 + $0x5bc] ss:$48 sps:$4 sm:$0x1f]  }
 0x30e   :  { %2533 = vmatpush1.bf16.msra.mxu1 %v7846_v25  ;;  %2493 = vmatprep.subr.bf16.mxu0 %v7847_v61  ;;  %v7853_v25 = vld [vmem:[%s12440_s1 + $0x554] ss:$48 sps:$4 sm:$0xff]   ;;  %v7854_v61 = vld [vmem:[%s12440_s1 + $0x55c] ss:$48 sps:$4 sm:$0xff]  }
 0x30f   :  { %2534 = vmatprep.subr.bf16.mxu1 %v7848_v47  ;;  %v7855_v47 = vld [vmem:[%s12440_s1 + $0x550] ss:$48 sps:$4 sm:$0xff]  }
 0x311   :  { %2494 = vmatpush1.bf16.msra.mxu0 %v7849_v46  ;;  %v13062_v46 = vld [vmem:[#allocation60_spill] sm:$0xff] }
 0x312   :  { %2535 = vmatpush1.bf16.msra.mxu1 %v7850_v3  ;;  %6135 = vmatprep.subr.msk.bf16.mxu0 %vm1520_vm0, %v7851_v18  ;;  %v13063_v3 = vld [vmem:[#allocation62_spill] sm:$0xff]  ;;  %v13064_v18 = vld [vmem:[#allocation63_spill] sm:$0xff] }
 0x313   :  { %6137 = vmatprep.subr.msk.bf16.mxu1 %vm1520_vm0, %v7852_v29  ;;  %v13065_v29 = vld [vmem:[#allocation65_spill] sm:$0xff] }
 0x315   :  { %2496 = vmatpush2.bf16.msra.mxu0 %v12963_v20  ;;  %v7856_v20 = vld [vmem:[%s12440_s1 + $0x558] ss:$48 sps:$4 sm:$0xff]  }
 0x316   :  { %2537 = vmatpush2.bf16.msra.mxu1 %v12964_v21  ;;  %2497 = vmatprep.subr.bf16.mxu0 %v7853_v25  ;;  %v11133_v25 = vpop.permute.xlu0 %6887 }
 0x317   :  { %2538 = vmatprep.subr.bf16.mxu1 %v7854_v61  ;;  %v13066_v61 = vld [vmem:[#allocation64_spill] sm:$0xff] }
 0x319   :  { %2498 = vmatpush2.bf16.msra.mxu0 %v7855_v47  ;;  %v13067_v47 = vld [vmem:[#allocation66_spill] sm:$0xff] }
 0x31a   :  { %2539 = vmatpush2.bf16.msra.mxu1 %v7856_v20  ;;  %2499 = vmatprep.subr.bf16.mxu0 %v10050_v59  ;;  %v11068_v59 = vadd.f32 %v10931_v11, %v9779_v39  ;;  %v11127_v11 = vpop.permute.xlu1 %6892 }
 0x31b   :  { %2540 = vmatprep.subr.bf16.mxu1 %v10056_v34  ;;  %v13034_v34 = vld [vmem:[#allocation145_spill] sm:$0xff] }
 0x31d   :  { %2500 = vmatpush2.bf16.msra.mxu0 %v10062_v14 }
 0x31e   :  { %2541 = vmatpush2.bf16.msra.mxu1 %v10068_v15  ;;  %2501 = vmatprep.subr.bf16.mxu0 %v10074_v63  ;;  %v13035_v63 = vld [vmem:[#allocation24_spill] sm:$0xff]  ;;  %v11137_v20 = vpop.permute.xlu1 %6902 }
 0x31f   :  { %2542 = vmatprep.subr.bf16.mxu1 %v10080_v27 }
 0x321   :  { %2502 = vmatpush2.bf16.msra.mxu0 %v10086_v35 }
 0x322   :  { %2543 = vmatpush2.bf16.msra.mxu1 %v10092_v19  ;;  %2503 = vmatprep.subr.bf16.mxu0 %v10098_v49  ;;  %v13036_v19 = vld [vmem:[#allocation27_spill] sm:$0xff] }
 0x323   :  { %2544 = vmatprep.subr.bf16.mxu1 %v10104_v30 }
 0x325   :  { %2504 = vmatpush2.bf16.msra.mxu0 %v10110_v24 }
 0x326   :  { %2545 = vmatpush2.bf16.msra.mxu1 %v10116_v58  ;;  %2505 = vmatprep.subr.bf16.mxu0 %v10122_v50  ;;  %v13037_v58 = vld [vmem:[#allocation31_spill] sm:$0xff] }
 0x327   :  { %2546 = vmatprep.subr.bf16.mxu1 %v10128_v33  ;;  %v13038_v33 = vld [vmem:[#allocation33_spill] sm:$0xff] }
 0x329   :  { %2506 = vmatpush2.bf16.msra.mxu0 %v10134_v48  ;;  %v13039_v48 = vld [vmem:[#allocation32_spill] sm:$0xff] }
 0x32a   :  { %2547 = vmatpush2.bf16.msra.mxu1 %v10140_v4  ;;  %2507 = vmatprep.subr.bf16.mxu0 %v10146_v7  ;;  %v13040_v7 = vld [vmem:[#allocation38_spill] sm:$0xff] }
 0x32b   :  { %2548 = vmatprep.subr.bf16.mxu1 %v10152_v0  ;;  %v13041_v0 = vld [vmem:[#allocation37_spill] sm:$0xff] }
 0x32d   :  { %2508 = vmatpush2.bf16.msra.mxu0 %v10158_v5  ;;  %v13042_v5 = vld [vmem:[#allocation43_spill] sm:$0xff] }
 0x32e   :  { %2549 = vmatpush2.bf16.msra.mxu1 %v10164_v44  ;;  %2509 = vmatprep.subr.bf16.mxu0 %v10170_v8  ;;  %v13043_v44 = vld [vmem:[#allocation42_spill] sm:$0xff] }
 0x32f   :  { %2550 = vmatprep.subr.bf16.mxu1 %v10176_v10  ;;  %v13044_v8 = vld [vmem:[#allocation46_spill] sm:$0xff]  ;;  %v13045_v10 = vld [vmem:[#allocation48_spill] sm:$0xff] }
 0x331   :  { %2510 = vmatpush2.bf16.msra.mxu0 %v10185_v13  ;;  %v13046_v13 = vld [vmem:[#allocation47_spill] sm:$0xff] }
 0x332   :  { %2551 = vmatpush2.bf16.msra.mxu1 %v10191_v38  ;;  %2561 = vmatprep.subr.bf16.mxu0 %v10197_v16  ;;  %v13047_v38 = vld [vmem:[#allocation49_spill] sm:$0xff]  ;;  %v13048_v16 = vld [vmem:[#allocation50_spill] sm:$0xff] }
 0x333   :  { %2602 = vmatprep.subr.bf16.mxu1 %v10203_v17  ;;  %v2233_v21 = vpop.f32.mrf.mxu0  ;;  %v13049_v17 = vld [vmem:[#allocation52_spill] sm:$0xff] }
 0x334   :  { %2512 = vmatmul.mubr.bf16.vlgmr.msra.gmra.mxu0 %v10905_v36  ;;  %v11071_v14 = vadd.f32 %v2233_v21, %v13034_v34  ;;  %v11073_v15 = vpop.f32.mrf.mxu1  ;;  %v13068_v21 = vld [vmem:[#allocation67_spill] sm:$0xff] }
 0x335   :  { %2553 = vmatmul.mubr.bf16.vlgmr.msra.gmra.mxu1 %v10905_v36  ;;  %2562 = vmatpush1.bf16.msra.mxu0 %v13035_v63  ;;  %v11079_v27 = vpop.f32.mrf.mxu0  ;;  %v13069_v63 = vld [vmem:[#allocation69_spill] sm:$0xff] }
 0x336   :  { %6140 = vmatprep.mubr.msk.bf16.mxu0 %vm1516_vm12, %v10669_v54  ;;  %v6946_v35 = vpack.i.bf16 %v11071_v14, %v11068_v59  ;;  %2603 = vmatpush1.bf16.msra.mxu1 %v13036_v19  ;;  %v11086_v49 = vpop.f32.mrf.mxu1  ;;  %v13070_v19 = vld [vmem:[#allocation68_spill] sm:$0xff] }
 0x337   :  { %6142 = vmatprep.mubr.msk.bf16.mxu1 %vm1516_vm12, %v10669_v54  ;;  %v2237_v30 = vpop.f32.mrf.mxu0  ;;  %2563 = vmatprep.subr.bf16.mxu0 %v10258_v9  ;;  %v13050_v9 = vld [vmem:[#allocation51_spill] sm:$0xff]  ;;  %v13057_v54 = vld [vmem:[#allocation57_spill] sm:$0xff] }
 0x338   :  { %2604 = vmatprep.subr.bf16.mxu1 %v10264_v12  ;;  %v2278_v24 = vpop.f32.mrf.mxu1  ;;  %6947 = vrot.lane.b32.xlu0 %v6946_v35, %s7884_s0  ;;  %v13051_v12 = vld [vmem:[#allocation9_spill] sm:$0xff]  ;;  %v11141_v35 = vpop.permute.xlu0 %6897  ;;  %v6905_v30 = vunpack.i.h.bf16 %v11137_v20 }
 0x339   :  { %2564 = vmatpush1.bf16.msra.mxu0 %v13037_v58  ;;  %v2238_v50 = vpop.f32.mrf.mxu0  ;;  %v6904_v24 = vunpack.i.l.bf16 %v11137_v20  ;;  %v13071_v58 = vld [vmem:[#allocation70_spill] sm:$0xff] }
 0x33a   :  { %2565 = vmatprep.subr.bf16.mxu0 %v13038_v33  ;;  %2605 = vmatpush1.bf16.msra.mxu1 %v13039_v48  ;;  %v2279_v4 = vpop.f32.mrf.mxu1  ;;  %v13072_v50 = vld [vmem:[#allocation71_spill] sm:$0xff]  ;;  %v6900_v33 = vunpack.i.h.bf16 %v11141_v35  ;;  %v6899_v48 = vunpack.i.l.bf16 %v11141_v35  ;;  %v7323_v35 = vld [vmem:[%s12442_s3 + $0xc0] sm:$0xff]  }
 0x33b   :  { %2606 = vmatprep.subr.bf16.mxu1 %v10303_v31  ;;  %v13052_v31 = vld [vmem:[#allocation53_spill] sm:$0xff]  ;;  %v6895_v4 = vunpack.i.h.bf16 %v11127_v11 }
 0x33d   :  { %2566 = vmatpush1.bf16.msra.mxu0 %v10316_v26  ;;  %v13054_v26 = vld [vmem:[#allocation54_spill] sm:$0xff] }
 0x33e   :  { %2567 = vmatprep.subr.bf16.mxu0 %v13040_v7  ;;  %2607 = vmatpush1.bf16.msra.mxu1 %v13041_v0  ;;  %v6894_v7 = vunpack.i.l.bf16 %v11127_v11  ;;  %v13073_v0 = vld [vmem:[#allocation73_spill] sm:$0xff] }
 0x33f   :  { %2608 = vmatprep.subr.bf16.mxu1 %v10345_v37  ;;  %v13055_v37 = vld [vmem:[#allocation56_spill] sm:$0xff] }
 0x341   :  { %2568 = vmatpush1.bf16.msra.mxu0 %v10360_v53  ;;  %v13056_v53 = vld [vmem:[#allocation25_spill] sm:$0xff] }
 0x342   :  { %2569 = vmatprep.subr.bf16.mxu0 %v13042_v5  ;;  %2609 = vmatpush1.bf16.msra.mxu1 %v13043_v44  ;;  %v13074_v5 = vld [vmem:[#allocation72_spill] sm:$0xff]  ;;  %v6890_v44 = vunpack.i.h.bf16 %v11133_v25 }
 0x343   :  { %2610 = vmatprep.subr.bf16.mxu1 %v10385_v1  ;;  %v13053_v1 = vld [vmem:[#allocation55_spill] sm:$0xff] }
 0x345   :  { %2570 = vmatpush1.bf16.msra.mxu0 %v10395_v51  ;;  %v13058_v51 = vld [vmem:[#allocation26_spill] sm:$0xff] }
 0x346   :  { %2571 = vmatprep.subr.bf16.mxu0 %v10408_v42  ;;  %2611 = vmatpush1.bf16.msra.mxu1 %v10402_v2  ;;  %v13059_v2 = vld [vmem:[#allocation58_spill] sm:$0xff]  ;;  %v13060_v42 = vld [vmem:[#allocation59_spill] sm:$0xff] }
 0x347   :  { %2612 = vmatprep.subr.bf16.mxu1 %v10416_v45  ;;  %v13061_v45 = vld [vmem:[#allocation61_spill] sm:$0xff] }
 0x349   :  { %2572 = vmatpush1.bf16.msra.mxu0 %v13044_v8  ;;  %v6889_v8 = vunpack.i.l.bf16 %v11133_v25  ;;  %v7351_v25 = vld [vmem:[%s12442_s3 + $0x1c8] sm:$0xff]  }
 0x34a   :  { %2573 = vmatprep.subr.bf16.mxu0 %v13045_v10  ;;  %2613 = vmatpush1.bf16.msra.mxu1 %v13046_v13  ;;  %v2752_v10 = vsel %vm2679_vm13, %v6905_v30, %v6900_v33  ;;  %v2681_v13 = vsel %vm2679_vm13, %v6904_v24, %v6899_v48 }
 0x34b   :  { %2614 = vmatprep.subr.bf16.mxu1 %v13047_v38  ;;  %v13075_v38 = vld [vmem:[#allocation74_spill] sm:$0xff] }
 0x34d   :  { %2574 = vmatpush1.bf16.msra.mxu0 %v13048_v16  ;;  %v13076_v16 = vld [vmem:[#allocation75_spill] sm:$0xff] }
 0x34e   :  { %2575 = vmatprep.subr.bf16.mxu0 %v13049_v17  ;;  %2615 = vmatpush1.bf16.msra.mxu1 %v13050_v9  ;;  %v2754_v17 = vsel %vm2679_vm13, %v6894_v7, %v6895_v4  ;;  %v13077_v9 = vld [vmem:[#allocation77_spill] sm:$0xff] }
 0x34f   :  { %2616 = vmatprep.subr.bf16.mxu1 %v13051_v12  ;;  %v13078_v12 = vld [vmem:[#allocation76_spill] sm:$0xff] }
 0x351   :  { %2576 = vmatpush1.bf16.msra.mxu0 %v13052_v31  ;;  %v13079_v31 = vld [vmem:[#allocation29_spill] sm:$0xff] }
 0x352   :  { %6139 = vmatprep.subr.msk.bf16.mxu0 %vm1520_vm0, %v13053_v1  ;;  %2617 = vmatpush1.bf16.msra.mxu1 %v13054_v26  ;;  %v2704_v1 = vmax.f32 %v13079_v31, %v2681_v13  ;;  %v13080_v26 = vld [vmem:[#allocation28_spill] sm:$0xff] }
 0x353   :  { %6141 = vmatprep.subr.msk.bf16.mxu1 %vm1520_vm0, %v13055_v37  ;;  %v2775_v37 = vmax.f32 %v13080_v26, %v2752_v10  ;;  %v7299_v10 = vld [vmem:[%s12442_s3 + $0xf0] sm:$0xff]   ;;  %vm5352_vm0 = vcmask 1041408  }
 0x355   :  { %2578 = vmatpush2.bf16.msra.mxu0 %v13056_v53  ;;  %v2683_v53 = vsel %vm2679_vm13, %v6889_v8, %v6890_v44 }
 0x356   :  { %2579 = vmatprep.subr.bf16.mxu0 %v13057_v54  ;;  %2619 = vmatpush2.bf16.msra.mxu1 %v13058_v51  ;;  %v13081_v54 = vld [vmem:[#allocation78_spill] sm:$0xff]  ;;  %v13082_v51 = vld [vmem:[#allocation79_spill] sm:$0xff] }
 0x357   :  { %2620 = vmatprep.subr.bf16.mxu1 %v13059_v2  ;;  %v13083_v2 = vld [vmem:[#allocation22_spill] sm:$0xff] }
 0x359   :  { %2580 = vmatpush2.bf16.msra.mxu0 %v13060_v42  ;;  %v2777_v42 = vmax.f32 %v13083_v2, %v2754_v17 }
 0x35a   :  { %2581 = vmatprep.subr.bf16.mxu0 %v13061_v45  ;;  %2621 = vmatpush2.bf16.msra.mxu1 %v13062_v46  ;;  %v13084_v45 = vld [vmem:[#allocation81_spill] sm:$0xff]  ;;  %v7294_v46 = vld [vmem:[%s12442_s3 + $0x78] sm:$0xff]  }
 0x35b   :  { %2622 = vmatprep.subr.bf16.mxu1 %v13063_v3  ;;  %v13085_v3 = vld [vmem:[#allocation80_spill] sm:$0xff] }
 0x35d   :  { %2582 = vmatpush2.bf16.msra.mxu0 %v13064_v18  ;;  %v2930_v18 = vmax.f32 %v2704_v1, %v2775_v37  ;;  %v7301_v1 = vld [vmem:[%s12442_s3 + $0xb0] sm:$0xff]  }
 0x35e   :  { %2583 = vmatprep.subr.bf16.mxu0 %v13065_v29  ;;  %2623 = vmatpush2.bf16.msra.mxu1 %v13066_v61  ;;  %v13086_v29 = vld [vmem:[#allocation146_spill] sm:$0xff] }
 0x35f   :  { %2624 = vmatprep.subr.bf16.mxu1 %v13067_v47  ;;  %v2706_v61 = vmax.f32 %v13086_v29, %v2683_v53  ;;  %v13087_v47 = vld [vmem:[#allocation82_spill] sm:$0xff]  ;;  %v7310_v29 = vld [vmem:[%s12442_s3 + $0x58] sm:$0xff]  }
 0x360   :  { %v7304_v53 = vld [vmem:[%s12442_s3 + $0x28] sm:$0xff]  }
 0x361   :  { %2584 = vmatpush2.bf16.msra.mxu0 %v13068_v21  ;;  %v7295_v21 = vld [vmem:[%s12442_s3 + $0xf8] sm:$0xff]  }
 0x362   :  { %2585 = vmatprep.subr.bf16.mxu0 %v13069_v63  ;;  %2625 = vmatpush2.bf16.msra.mxu1 %v13070_v19  ;;  %v7296_v63 = vld [vmem:[%s12442_s3 + $0x38] sm:$0xff]   ;;  %v2932_v19 = vmax.f32 %v2706_v61, %v2777_v42  ;;  %v7309_v61 = vld [vmem:[%s12442_s3 + $0xa0] sm:$0xff]  }
 0x363   :  { %2626 = vmatprep.subr.bf16.mxu1 %v13071_v58  ;;  %v7298_v58 = vld [vmem:[%s12442_s3 + $0x70] sm:$0xff]  }
 0x365   :  { %2586 = vmatpush2.bf16.msra.mxu0 %v13072_v50  ;;  %v7857_v50 = vld [vmem:[%s12440_s1 + $0x328] ss:$48 sps:$4 sm:$0xff]  }
 0x366   :  { %2587 = vmatprep.subr.bf16.mxu0 %v13073_v0  ;;  %2627 = vmatpush2.bf16.msra.mxu1 %v13074_v5  ;;  %v2942_v0 = vpack.c.bf16 %v2930_v18, %v2930_v18  ;;  %v7308_v18 = vld [vmem:[%s12442_s3 + $0x20] sm:$0xff]  }
 0x367   :  { %2628 = vmatprep.subr.bf16.mxu1 %v13075_v38  ;;  %v2944_v38 = vpack.c.bf16 %v2932_v19, %v2932_v19  ;;  %v7314_v19 = vld [vmem:[%s12442_s3 + $0x50] sm:$0xff]  }
 0x369   :  { %2588 = vmatpush2.bf16.msra.mxu0 %v13076_v16  ;;  %v7300_v16 = vld [vmem:[%s12442_s3 + $0x30] sm:$0xff]  }
 0x36a   :  { %2589 = vmatprep.subr.bf16.mxu0 %v13077_v9  ;;  %2629 = vmatpush2.bf16.msra.mxu1 %v13078_v12  ;;  %v7302_v9 = vld [vmem:[%s12442_s3 + $0x68] sm:$0xff]   ;;  %v6908_v12 = vpop.permute.xlu0 %6907 }
 0x36b   :  { %2630 = vmatprep.subr.bf16.mxu1 %v13081_v54 }
 0x36d   :  { %2590 = vmatpush2.bf16.msra.mxu0 %v13082_v51  ;;  %v7306_v51 = vld [vmem:[%s12442_s3 + $0x60] sm:$0xff]  }
 0x36e   :  { %2591 = vmatprep.subr.bf16.mxu0 %v13084_v45  ;;  %2631 = vmatpush2.bf16.msra.mxu1 %v13085_v3  ;;  %v11239_v2 = vpop.permute.xlu0 %6917  ;;  %v7305_v45 = vld [vmem:[%s12442_s3 + $0xa8] sm:$0xff]   ;;  %v11247_v3 = vpop.permute.xlu1 %6912 }
 0x36f   :  { %2632 = vmatprep.subr.bf16.mxu1 %v13087_v47  ;;  %v7311_v47 = vld [vmem:[%s12442_s3 + $0xd8] sm:$0xff]  }
 0x371   :  { %2592 = vmatpush2.bf16.msra.mxu0 %v10656_v23  ;;  %v7297_v23 = vld [vmem:[%s12442_s3 + $0xb8] sm:$0xff]  }
 0x372   :  { %6548 = vmatprep.subr.bf16.mxu0 %v7294_v46  ;;  %2633 = vmatpush2.bf16.msra.mxu1 %v7857_v50  ;;  %v7307_v46 = vld [vmem:[%s12442_s3 + $0xe0] sm:$0xff]   ;;  %v7313_v50 = vld [vmem:[%s12442_s3 + $0x98] sm:$0xff]  }
 0x373   :  { %6570 = vmatprep.subr.bf16.mxu1 %v7295_v21  ;;  %v11261_v21 = vpop.permute.xlu0 %6927 }
 0x374   :  { %v11208_v5 = vpop.f32.mrf.mxu0  ;;  %2594 = vmatmul.mubr.bf16.vlgmr.msra.gmra.mxu0 %v10905_v36  ;;  %v11214_v13 = vpop.f32.mrf.mxu1 }
 0x375   :  { %6549 = vmatpush3.bf16.msra.mxu0 %v7296_v63  ;;  %3709 = vmatprep.mubr.bf16.mxu0 %v2942_v0  ;;  %v7312_v63 = vld [vmem:[%s12442_s3 + $0x18] sm:$0xff]   ;;  %v6930_v0 = vunpack.i.h.bf16 %v11261_v21 }
 0x376   :  { %2635 = vmatmul.mubr.bf16.vlgmr.msra.gmra.mxu1 %v10905_v36  ;;  %v11220_v17 = vpop.f32.mrf.mxu0  ;;  %6550 = vmatprep.subr.bf16.mxu0 %v7298_v58  ;;  %v11225_v31 = vpop.f32.mrf.mxu1  ;;  %v7303_v36 = vld [vmem:[%s12442_s3 + $0xe8] sm:$0xff]  }
 0x377   :  { %6571 = vmatpush3.bf16.msra.mxu1 %v7297_v23  ;;  %3749 = vmatprep.mubr.bf16.mxu1 %v2944_v38  ;;  %v11269_v58 = vpop.permute.xlu1 %6922  ;;  %v6929_v23 = vunpack.i.l.bf16 %v11261_v21  ;;  %v6910_v38 = vunpack.i.h.bf16 %v6908_v12  ;;  %v7352_v21 = vld [vmem:[%s12442_s3 + $0x108] sm:$0xff]  }
 0x378   :  { %v2319_v26 = vpop.f32.mrf.mxu0  ;;  %6572 = vmatprep.subr.bf16.mxu1 %v7299_v10  ;;  %v2360_v37 = vpop.f32.mrf.mxu1  ;;  %v7315_v10 = vld [vmem:[%s12442_s3 + $0xd0] sm:$0xff]  }
 0x379   :  { %6551 = vmatpush3.bf16.msra.mxu0 %v7300_v16  ;;  %v6909_v16 = vunpack.i.l.bf16 %v6908_v12  ;;  %v6924_v26 = vunpack.i.l.bf16 %v11269_v58  ;;  %v6919_v37 = vunpack.i.l.bf16 %v11239_v2 }
 0x37a   :  { %v2320_v54 = vpop.f32.mrf.mxu0  ;;  %6552 = vmatprep.subr.bf16.mxu0 %v7302_v9  ;;  %v2361_v42 = vpop.f32.mrf.mxu1  ;;  %v7316_v9 = vld [vmem:[%s12442_s3 + $0x10] sm:$0xff]  }
 0x37b   :  { %6573 = vmatpush3.bf16.msra.mxu1 %v7301_v1  ;;  %v6925_v1 = vunpack.i.h.bf16 %v11269_v58  ;;  %v2680_v12 = vsel %vm2679_vm13, %v6909_v16, %v6904_v24  ;;  %v2751_v54 = vsel %vm2679_vm13, %v6910_v38, %v6905_v30  ;;  %v6915_v42 = vunpack.i.h.bf16 %v11247_v3  ;;  %v7319_v30 = vld [vmem:[%s12442_s3 + $0xc8] sm:$0xff]  }
 0x37c   :  { %6574 = vmatprep.subr.bf16.mxu1 %v7303_v36  ;;  %v6920_v36 = vunpack.i.h.bf16 %v11239_v2  ;;  %v2685_v20 = vsel %vm2679_vm13, %v6929_v23, %v6924_v26  ;;  %v2753_v24 = vsel %vm2679_vm13, %v6900_v33, %v6894_v7  ;;  %v7322_v33 = vld [vmem:[%s12442_s3 + $0x40] sm:$0xff]   ;;  %v2682_v7 = vsel %vm2679_vm13, %v6899_v48, %v6889_v8 }
 0x37d   :  { %6553 = vmatpush3.bf16.msra.mxu0 %v7304_v53  ;;  %v7318_v53 = vld [vmem:[%s12442_s3 + $0x48] sm:$0xff]   ;;  %v13091_v48 = vld [vmem:[#allocation16_spill] sm:$0xff] }
 0x37e   :  { %6554 = vmatprep.subr.bf16.mxu0 %v7306_v51  ;;  %v7317_v51 = vld [vmem:[%s12442_s3 + $0x90] sm:$0xff]   ;;  %v13090_v16 = vld [vmem:[#allocation17_spill] sm:$0xff]  ;;  %v2705_v8 = vmax.f32 %v13091_v48, %v2682_v7 }
 0x37f   :  { %6575 = vmatpush3.bf16.msra.mxu1 %v7305_v45  ;;  %v6914_v45 = vunpack.i.l.bf16 %v11247_v3  ;;  %v7331_v7 = vld [vmem:[%s12442_s3 + $0x1f0] sm:$0xff]   ;;  %v7340_v48 = vld [vmem:[%s12442_s3 + $0x120] sm:$0xff]   ;;  %v7377_v3 = vld [vmem:[%s12442_s3 + $0x208] sm:$0xff]  }
 0x380   :  { %6576 = vmatprep.subr.bf16.mxu1 %v7307_v46  ;;  %v2756_v46 = vsel %vm2679_vm13, %v6930_v0, %v6925_v1  ;;  %v7379_v2 = vld [vmem:[%s12442_s3 + $0x240] sm:$0xff]  }
 0x381   :  { %6555 = vmatpush3.bf16.msra.mxu0 %v7308_v18  ;;  %v7320_v18 = vld [vmem:[%s12442_s3 + $0x8] sm:$0xff]   ;;  %v2779_v38 = vmax.f32 %v10696_v28, %v2756_v46 }
 0x382   :  { %6556 = vmatprep.subr.bf16.mxu0 %v7310_v29  ;;  %v13088_v29 = vld [vmem:[#allocation19_spill] sm:$0xff] }
 0x383   :  { %6577 = vmatpush3.bf16.msra.mxu1 %v7309_v61  ;;  %v2703_v61 = vmax.f32 %v13088_v29, %v2680_v12 }
 0x384   :  { %6578 = vmatprep.subr.bf16.mxu1 %v7311_v47  ;;  %v13089_v47 = vld [vmem:[#allocation18_spill] sm:$0xff] }
 0x385   :  { %6557 = vmatpush3.bf16.msra.mxu0 %v7312_v63  ;;  %v2774_v63 = vmax.f32 %v13089_v47, %v2751_v54  ;;  %v7326_v54 = vld [vmem:[%s12442_s3 + $0x178] sm:$0xff]   ;;  %v7330_v47 = vld [vmem:[%s12442_s3 + $0x170] sm:$0xff]  }
 0x386   :  { %6558 = vmatprep.subr.bf16.mxu0 %v7314_v19  ;;  %v2758_v19 = vsel %vm2679_vm13, %v6919_v37, %v6920_v36 }
 0x387   :  { %6579 = vmatpush3.bf16.msra.mxu1 %v7313_v50  ;;  %v7321_v50 = vld [vmem:[%s12442_s3 + $0x88] sm:$0xff]   ;;  %v2781_v28 = vmax.f32 %v10676_v40, %v2758_v19  ;;  %v2929_v12 = vmax.f32 %v2703_v61, %v2774_v63  ;;  %v7327_v40 = vld [vmem:[%s12442_s3 + $0x1f8] sm:$0xff]  }
 0x388   :  { %6580 = vmatprep.subr.bf16.mxu1 %v7315_v10  ;;  %v2708_v10 = vmax.f32 %v10713_v60, %v2685_v20  ;;  %v7324_v60 = vld [vmem:[%s12442_s3] sm:$0xff]   ;;  %v7329_v19 = vld [vmem:[%s12442_s3 + $0x1b8] sm:$0xff]  }
 0x389   :  { %6559 = vmatpush3.bf16.msra.mxu0 %v7316_v9  ;;  %v2776_v9 = vmax.f32 %v13090_v16, %v2753_v24  ;;  %v13092_v20 = vld [vmem:[#allocation36_spill] sm:$0xff]  ;;  %v2941_v61 = vpack.c.bf16 %v2929_v12, %v2929_v12  ;;  %v7333_v16 = vld [vmem:[%s12442_s3 + $0x1b0] sm:$0xff]   ;;  %v11407_v12 = vpop.permute.xlu1 %6932 }
 0x38a   :  { %6560 = vmatprep.subr.bf16.mxu0 %v7318_v53  ;;  %v2687_v53 = vsel %vm2679_vm13, %v6914_v45, %v6915_v42  ;;  %v2934_v46 = vmax.f32 %v2708_v10, %v2779_v38  ;;  %v7332_v10 = vld [vmem:[%s12442_s3 + $0x130] sm:$0xff]   ;;  %v7334_v38 = vld [vmem:[%s12442_s3 + $0x168] sm:$0xff]  }
 0x38b   :  { %6581 = vmatpush3.bf16.msra.mxu1 %v7317_v51  ;;  %v7325_v51 = vld [vmem:[%s12442_s3 + $0x80] sm:$0xff]   ;;  %v2931_v24 = vmax.f32 %v2705_v8, %v2776_v9  ;;  %v7335_v9 = vld [vmem:[%s12442_s3 + $0x1e8] sm:$0xff]   ;;  %v7342_v8 = vld [vmem:[%s12442_s3 + $0x158] sm:$0xff]  }
 0x38c   :  { %6582 = vmatprep.subr.bf16.mxu1 %v7319_v30  ;;  %v2710_v30 = vmax.f32 %v13092_v20, %v2687_v53  ;;  %v2946_v63 = vpack.c.bf16 %v2934_v46, %v2934_v46  ;;  %v7336_v53 = vld [vmem:[%s12442_s3 + $0x128] sm:$0xff]   ;;  %v11415_v46 = vpop.permute.xlu0 %6937  ;;  %v7344_v20 = vld [vmem:[%s12442_s3 + $0x118] sm:$0xff]  }
 0x38d   :  { %6561 = vmatpush3.bf16.msra.mxu0 %v7320_v18  ;;  %v7328_v18 = vld [vmem:[%s12442_s3 + $0x138] sm:$0xff]  }
 0x38e   :  { %6562 = vmatprep.subr.bf16.mxu0 %v7322_v33  ;;  %v2936_v29 = vmax.f32 %v2710_v30, %v2781_v28  ;;  %v2943_v33 = vpack.c.bf16 %v2931_v24, %v2931_v24  ;;  %v7339_v28 = vld [vmem:[%s12442_s3 + $0x1e0] sm:$0xff]   ;;  %v7346_v30 = vld [vmem:[%s12442_s3 + $0x150] sm:$0xff]   ;;  %v11423_v24 = vpop.permute.xlu1 %6942 }
 0x38f   :  { %6583 = vmatpush3.bf16.msra.mxu1 %v7321_v50 }
 0x390   :  { %6584 = vmatprep.subr.bf16.mxu1 %v7323_v35  ;;  %v2948_v50 = vpack.c.bf16 %v2936_v29, %v2936_v29  ;;  %v7338_v35 = vld [vmem:[%s12442_s3 + $0x160] sm:$0xff]   ;;  %v7347_v29 = vld [vmem:[%s12442_s3 + $0x1d0] sm:$0xff]  }
 0x391   :  { %6563 = vmatpush3.bf16.msra.mxu0 %v7324_v60  ;;  %v7337_v60 = vld [vmem:[%s12442_s3 + $0x1a8] sm:$0xff]  }
 0x392   :  { %6592 = vmatprep.subr.bf16.mxu0 %v7326_v54  ;;  %v7341_v54 = vld [vmem:[%s12442_s3 + $0x1a0] sm:$0xff]  }
 0x393   :  { %6585 = vmatpush3.bf16.msra.mxu1 %v7325_v51  ;;  %v7343_v51 = vld [vmem:[%s12442_s3 + $0x1d8] sm:$0xff]  }
 0x394   :  { %3710 = vmatmul.mubr.bf16.vlgmr.msra.gmra.mxu0 %v2941_v61  ;;  %6614 = vmatprep.subr.bf16.mxu1 %v7327_v40  ;;  %v7345_v40 = vld [vmem:[%s12442_s3 + $0x198] sm:$0xff]   ;;  %v7348_v61 = vld [vmem:[%s12442_s3 + $0x110] sm:$0xff]  }
 0x395   :  { %6593 = vmatpush3.bf16.msra.mxu0 %v7328_v18  ;;  %3789 = vmatprep.mubr.bf16.mxu0 %v2946_v63  ;;  %v6939_v18 = vunpack.i.l.bf16 %v11415_v46  ;;  %v6944_v63 = vunpack.i.l.bf16 %v11423_v24 }
 0x396   :  { %3750 = vmatmul.mubr.bf16.vlgmr.msra.gmra.mxu1 %v2943_v33  ;;  %6594 = vmatprep.subr.bf16.mxu0 %v7330_v47  ;;  %v6945_v47 = vunpack.i.h.bf16 %v11423_v24  ;;  %v2755_v33 = vsel %vm2679_vm13, %v6895_v4, %v6930_v0  ;;  %v2757_v4 = vsel %vm2679_vm13, %v6925_v1, %v6919_v37  ;;  %v7354_v1 = vld [vmem:[%s12442_s3 + $0x140] sm:$0xff]   ;;  %v2686_v37 = vsel %vm2679_vm13, %v6924_v26, %v6914_v45 }
 0x397   :  { %6615 = vmatpush3.bf16.msra.mxu1 %v7329_v19  ;;  %3829 = vmatprep.mubr.bf16.mxu1 %v2948_v50  ;;  %v7350_v19 = vld [vmem:[%s12442_s3 + $0x148] sm:$0xff]   ;;  %v7349_v50 = vld [vmem:[%s12442_s3 + $0x190] sm:$0xff]   ;;  %v7356_v26 = vld [vmem:[%s12442_s3 + $0x100] sm:$0xff]  }
 0x398   :  { %6616 = vmatprep.subr.bf16.mxu1 %v7331_v7  ;;  %v2684_v7 = vsel %vm2679_vm13, %v6890_v44, %v6929_v23  ;;  %v2760_v11 = vsel %vm2679_vm13, %v6945_v47, %v6939_v18  ;;  %v6940_v44 = vunpack.i.h.bf16 %v11415_v46  ;;  %v13093_v23 = vld [vmem:[#allocation23_spill] sm:$0xff]  ;;  %v13101_v46 = vld [vmem:[#allocation45_spill] sm:$0xff] }
 0x399   :  { %6595 = vmatpush3.bf16.msra.mxu0 %v7332_v10  ;;  %v6934_v10 = vunpack.i.l.bf16 %v11407_v12 }
 0x39a   :  { %6596 = vmatprep.subr.bf16.mxu0 %v7334_v38  ;;  %v2778_v38 = vmax.f32 %v13093_v23, %v2755_v33  ;;  %v2785_v58 = vmax.f32 %v10730_v52, %v6940_v44  ;;  %v7357_v52 = vld [vmem:[%s12442_s3 + $0x180] sm:$0xff]  }
 0x39b   :  { %6617 = vmatpush3.bf16.msra.mxu1 %v7333_v16  ;;  %v2689_v0 = vsel %vm2679_vm13, %v6944_v63, %v6934_v10  ;;  %v13094_v16 = vld [vmem:[#allocation147_spill] sm:$0xff] }
 0x39c   :  { %6618 = vmatprep.subr.bf16.mxu1 %v7335_v9  ;;  %v2707_v9 = vmax.f32 %v13094_v16, %v2684_v7  ;;  %v2712_v45 = vmax.f32 %v10687_v43, %v2689_v0  ;;  %v7361_v7 = vld [vmem:[%s12442_s3 + $0x270] sm:$0xff]  }
 0x39d   :  { %6597 = vmatpush3.bf16.msra.mxu0 %v7336_v53  ;;  %v6935_v53 = vunpack.i.h.bf16 %v11407_v12  ;;  %v13098_v16 = vld [vmem:[#allocation14_spill] sm:$0xff] }
 0x39e   :  { %6598 = vmatprep.subr.bf16.mxu0 %v7338_v35  ;;  %v7353_v35 = vld [vmem:[%s12442_s3 + $0x188] sm:$0xff]  }
 0x39f   :  { %6619 = vmatpush3.bf16.msra.mxu1 %v7337_v60  ;;  %v2783_v60 = vmax.f32 %v10703_v62, %v2760_v11  ;;  %v7360_v11 = vld [vmem:[%s12442_s3 + $0x2b8] sm:$0xff]  }
 0x3a0   :  { %6620 = vmatprep.subr.bf16.mxu1 %v7339_v28  ;;  %v13095_v28 = vld [vmem:[#allocation40_spill] sm:$0xff] }
 0x3a1   :  { %6599 = vmatpush3.bf16.msra.mxu0 %v7340_v48  ;;  %v2780_v48 = vmax.f32 %v13095_v28, %v2757_v4  ;;  %v13099_v28 = vld [vmem:[#allocation15_spill] sm:$0xff] }
 0x3a2   :  { %6600 = vmatprep.subr.bf16.mxu0 %v7342_v8  ;;  %v7355_v8 = vld [vmem:[%s12442_s3 + $0x1c0] sm:$0xff]  }
 0x3a3   :  { %6621 = vmatpush3.bf16.msra.mxu1 %v7341_v54  ;;  %v13096_v54 = vld [vmem:[#allocation41_spill] sm:$0xff] }
 0x3a4   :  { %6622 = vmatprep.subr.bf16.mxu1 %v7343_v51  ;;  %v2709_v62 = vmax.f32 %v13096_v54, %v2686_v37  ;;  %v2933_v51 = vmax.f32 %v2707_v9, %v2778_v38  ;;  %v7362_v38 = vld [vmem:[%s12442_s3 + $0x230] sm:$0xff]   ;;  %v11527_v9 = vadd.f32 %v10916_v41, %v13098_v16  ;;  %v11554_v54 = vadd.f32 %v10913_v22, %v13099_v28  ;;  %v7368_v22 = vld [vmem:[%s12442_s3 + $0x220] sm:$0xff]  }
 0x3a5   :  { %6601 = vmatpush3.bf16.msra.mxu0 %v7344_v20  ;;  %v7358_v20 = vld [vmem:[%s12442_s3 + $0x278] sm:$0xff]   ;;  %v7363_v41 = vld [vmem:[%s12442_s3 + $0x2b0] sm:$0xff]  }
 0x3a6   :  { %6602 = vmatprep.subr.bf16.mxu0 %v7346_v30  ;;  %v13097_v30 = vld [vmem:[#allocation44_spill] sm:$0xff]  ;;  %v2935_v43 = vmax.f32 %v2709_v62, %v2780_v48  ;;  %v2945_v33 = vpack.c.bf16 %v2933_v51, %v2933_v51 }
 0x3a7   :  { %6623 = vmatpush3.bf16.msra.mxu1 %v7345_v40  ;;  %v2714_v40 = vmax.f32 %v13097_v30, %v6935_v53  ;;  %v7367_v51 = vld [vmem:[%s12442_s3 + $0x260] sm:$0xff]   ;;  %v7366_v30 = vld [vmem:[%s12442_s3 + $0x2a8] sm:$0xff]  }
 0x3a8   :  { %6624 = vmatprep.subr.bf16.mxu1 %v7347_v29  ;;  %v2938_v29 = vmax.f32 %v2712_v45, %v2783_v60  ;;  %v2947_v4 = vpack.c.bf16 %v2935_v43, %v2935_v43  ;;  %v7365_v45 = vld [vmem:[%s12442_s3 + $0x228] sm:$0xff]   ;;  %v7371_v43 = vld [vmem:[%s12442_s3 + $0x218] sm:$0xff]  }
 0x3a9   :  { %6603 = vmatpush3.bf16.msra.mxu0 %v7348_v61  ;;  %v2940_v61 = vmax.f32 %v2714_v40, %v2785_v58 }
 0x3aa   :  { %6604 = vmatprep.subr.bf16.mxu0 %v7350_v19  ;;  %v7359_v19 = vld [vmem:[%s12442_s3 + $0x238] sm:$0xff]  }
 0x3ab   :  { %6625 = vmatpush3.bf16.msra.mxu1 %v7349_v50  ;;  %v2950_v50 = vpack.c.bf16 %v2938_v29, %v2938_v29  ;;  %v2952_v0 = vpack.c.bf16 %v2940_v61, %v2940_v61  ;;  %v7369_v29 = vld [vmem:[%s12442_s3 + $0x2a0] sm:$0xff]   ;;  %v7373_v61 = vld [vmem:[%s12442_s3 + $0x250] sm:$0xff]  }
 0x3ac   :  { %6626 = vmatprep.subr.bf16.mxu1 %v7351_v25 }
 0x3ad   :  { %6605 = vmatpush3.bf16.msra.mxu0 %v7352_v21  ;;  %v7885_v21 = vmov 0  }
 0x3ae   :  { %6606 = vmatprep.subr.bf16.mxu0 %v7354_v1 }
 0x3af   :  { %6627 = vmatpush3.bf16.msra.mxu1 %v7353_v35  ;;  %v7364_v35 = vld [vmem:[%s12442_s3 + $0x268] sm:$0xff]  }
 0x3b0   :  { %6628 = vmatprep.subr.bf16.mxu1 %v7355_v8 }
 0x3b1   :  { %6607 = vmatpush3.bf16.msra.mxu0 %v7356_v26 }
 0x3b2   :  { %6636 = vmatprep.subr.bf16.mxu0 %v7358_v20 }
 0x3b3   :  { %6629 = vmatpush3.bf16.msra.mxu1 %v7357_v52  ;;  %v7370_v52 = vld [vmem:[%s12442_s3 + $0x258] sm:$0xff]  }
 0x3b4   :  { %v2431_v25 = vpop.f32.mrf.mxu0  ;;  %3790 = vmatmul.mubr.bf16.vlgmr.msra.gmra.mxu0 %v2945_v33  ;;  %3877 = vmatprep.subr.bf16.mxu1 %v7885_v21  ;;  %v7374_v33 = vld [vmem:[%s12442_s3 + $0x210] sm:$0xff]  }
 0x3b5   :  { %v2472_v23 = vpop.f32.mrf.mxu1  ;;  %6637 = vmatpush3.bf16.msra.mxu0 %v7359_v19  ;;  %3869 = vmatprep.mubr.bf16.mxu0 %v2950_v50  ;;  %v11544_v48 = vadd.f32 %v2431_v25, %v13099_v28  ;;  %v7372_v19 = vld [vmem:[%s12442_s3 + $0x298] sm:$0xff]   ;;  %v2688_v50 = vsel %vm2679_vm13, %v6915_v42, %v6944_v63  ;;  %v7375_v25 = vld [vmem:[%s12442_s3 + $0x290] sm:$0xff]   ;;  %v7387_v28 = vld [vmem:[%s12442_s3 + $0x3c0] sm:$0xff]  }
 0x3b6   :  { %v11530_v1 = vadd.f32 %v2472_v23, %v13098_v16  ;;  %3830 = vmatmul.mubr.bf16.vlgmr.msra.gmra.mxu1 %v2947_v4  ;;  %v11532_v37 = vpop.f32.mrf.mxu0  ;;  %6638 = vmatprep.subr.bf16.mxu0 %v7361_v7  ;;  %v7376_v7 = vld [vmem:[%s12442_s3 + $0x248] sm:$0xff]  }
 0x3b7   :  { %3878 = vmatpush1.bf16.msra.mxu1 %v7360_v11  ;;  %6233 = vmatprep.mubr.msk.bf16.mxu1 %vm3673_vm14, %v2952_v0  ;;  %v11538_v60 = vpop.f32.mrf.mxu1  ;;  %v6966_v40 = vpack.i.bf16 %v11544_v48, %v11554_v54  ;;  %v2759_v11 = vsel %vm2679_vm13, %v6920_v36, %v6945_v47  ;;  %v13100_v4 = vld [vmem:[#allocation34_spill] sm:$0xff]  ;;  %v7380_v47 = vld [vmem:[%s12442_s3 + $0x200] sm:$0xff]   ;;  %v2761_v0 = vsel %vm2679_vm13, %v6939_v18, %v6940_v44 }
 0x3b8   :  { %v6951_v8 = vpack.i.bf16 %v11530_v1, %v11527_v9  ;;  %v2435_v58 = vpop.f32.mrf.mxu0  ;;  %3879 = vmatprep.subr.bf16.mxu1 %v7885_v21  ;;  %v2711_v42 = vmax.f32 %v13100_v4, %v2688_v50  ;;  %v2782_v24 = vmax.f32 %v10679_v32, %v2759_v11  ;;  %v7378_v36 = vld [vmem:[%s12442_s3 + $0x288] sm:$0xff]   ;;  %v7381_v32 = vld [vmem:[%s12442_s3 + $0x280] sm:$0xff]   ;;  %v7409_v4 = vld [vmem:[%s12442_s3 + $0x358] sm:$0xff]  }
 0x3b9   :  { %v2476_v26 = vpop.f32.mrf.mxu1  ;;  %6639 = vmatpush3.bf16.msra.mxu0 %v7362_v38  ;;  %v2690_v38 = vsel %vm2679_vm13, %v6934_v10, %v6935_v53  ;;  %v7382_v16 = vld [vmem:[%s12442_s3 + $0x2c8] sm:$0xff]   ;;  %v7383_v44 = vld [vmem:[%s12442_s3 + $0x2c0] sm:$0xff]  }
 0x3ba   :  { %6952 = vrot.lane.b32.xlu0 %v6951_v8, %s7884_s0  ;;  %v2436_v62 = vpop.f32.mrf.mxu0  ;;  %6640 = vmatprep.subr.bf16.mxu0 %v7364_v35  ;;  %v2937_v63 = vmax.f32 %v2711_v42, %v2782_v24  ;;  %v2784_v35 = vmax.f32 %v10737_v56, %v2761_v0  ;;  %v2713_v18 = vmax.f32 %v13101_v46, %v2690_v38  ;;  %v7384_v10 = vld [vmem:[%s12442_s3 + $0x3c8] sm:$0xff]   ;;  %v7390_v58 = vld [vmem:[%s12442_s3 + $0x340] sm:$0xff]   ;;  %v7410_v42 = vld [vmem:[%s12442_s3 + $0x318] sm:$0xff]  }
 0x3bb   :  { %3880 = vmatpush1.bf16.msra.mxu1 %v7363_v41  ;;  %v2477_v20 = vpop.f32.mrf.mxu1  ;;  %v7385_v56 = vld [vmem:[%s12442_s3 + $0x388] sm:$0xff]   ;;  %v7389_v26 = vld [vmem:[%s12442_s3 + $0x380] sm:$0xff]   ;;  %v7391_v62 = vld [vmem:[%s12442_s3 + $0x3b8] sm:$0xff]  }
 0x3bc   :  { %3881 = vmatprep.subr.bf16.mxu1 %v7885_v21  ;;  %v2949_v23 = vpack.c.bf16 %v2937_v63, %v2937_v63  ;;  %v2939_v12 = vmax.f32 %v2713_v18, %v2784_v35  ;;  %v7386_v41 = vld [vmem:[%s12442_s3 + $0x348] sm:$0xff]   ;;  %v7393_v20 = vld [vmem:[%s12442_s3 + $0x378] sm:$0xff]   ;;  %v7405_v50 = vld [vmem:[%s12442_s3 + $0x360] sm:$0xff]   ;;  %v11756_v18 = vadd.f32 %v11208_v5, %v10243_v6 }
 0x3bd   :  { %6641 = vmatpush3.bf16.msra.mxu0 %v7365_v45  ;;  %v7388_v8 = vld [vmem:[%s12442_s3 + $0x308] sm:$0xff]   ;;  %v7392_v45 = vld [vmem:[%s12442_s3 + $0x300] sm:$0xff]   ;;  %v7412_v0 = vld [vmem:[%s12442_s3 + $0x2d8] sm:$0xff]  }
 0x3be   :  { %6967 = vrot.lane.b32.xlu0 %v6966_v40, %s7884_s0  ;;  %6642 = vmatprep.subr.bf16.mxu0 %v7367_v51  ;;  %v2951_v53 = vpack.c.bf16 %v2939_v12, %v2939_v12  ;;  %v7394_v51 = vld [vmem:[%s12442_s3 + $0x338] sm:$0xff]   ;;  %v7395_v40 = vld [vmem:[%s12442_s3 + $0x3b0] sm:$0xff]   ;;  %v7406_v11 = vld [vmem:[%s12442_s3 + $0x320] sm:$0xff]  }
 0x3bf   :  { %3882 = vmatpush1.bf16.msra.mxu1 %v7366_v30  ;;  %v7396_v30 = vld [vmem:[%s12442_s3 + $0x2f8] sm:$0xff]  }
 0x3c0   :  { %3883 = vmatprep.subr.bf16.mxu1 %v7885_v21 }
 0x3c1   :  { %6643 = vmatpush3.bf16.msra.mxu0 %v7368_v22  ;;  %v7398_v22 = vld [vmem:[%s12442_s3 + $0x330] sm:$0xff]  }
 0x3c2   :  { %6644 = vmatprep.subr.bf16.mxu0 %v7370_v52  ;;  %v7397_v52 = vld [vmem:[%s12442_s3 + $0x370] sm:$0xff]  }
 0x3c3   :  { %3884 = vmatpush1.bf16.msra.mxu1 %v7369_v29  ;;  %v7400_v29 = vld [vmem:[%s12442_s3 + $0x2f0] sm:$0xff]  }
 0x3c4   :  { %3885 = vmatprep.subr.bf16.mxu1 %v7885_v21 }
 0x3c5   :  { %6645 = vmatpush3.bf16.msra.mxu0 %v7371_v43  ;;  %v7399_v43 = vld [vmem:[%s12442_s3 + $0x3a8] sm:$0xff]  }
 0x3c6   :  { %6646 = vmatprep.subr.bf16.mxu0 %v7373_v61  ;;  %v7402_v61 = vld [vmem:[%s12442_s3 + $0x328] sm:$0xff]  }
 0x3c7   :  { %3886 = vmatpush1.bf16.msra.mxu1 %v7372_v19  ;;  %v7401_v19 = vld [vmem:[%s12442_s3 + $0x368] sm:$0xff]  }
 0x3c8   :  { %3887 = vmatprep.subr.bf16.mxu1 %v7885_v21 }
 0x3c9   :  { %6647 = vmatpush3.bf16.msra.mxu0 %v7374_v33  ;;  %v7403_v33 = vld [vmem:[%s12442_s3 + $0x3a0] sm:$0xff]  }
 0x3ca   :  { %6648 = vmatprep.subr.bf16.mxu0 %v7376_v7  ;;  %v7404_v7 = vld [vmem:[%s12442_s3 + $0x2e8] sm:$0xff]  }
 0x3cb   :  { %3888 = vmatpush1.bf16.msra.mxu1 %v7375_v25  ;;  %v7407_v25 = vld [vmem:[%s12442_s3 + $0x398] sm:$0xff]  }
 0x3cc   :  { %3889 = vmatprep.subr.bf16.mxu1 %v7885_v21 }
 0x3cd   :  { %6649 = vmatpush3.bf16.msra.mxu0 %v7377_v3  ;;  %v7408_v3 = vld [vmem:[%s12442_s3 + $0x2e0] sm:$0xff]  }
 0x3ce   :  { %6650 = vmatprep.subr.bf16.mxu0 %v7379_v2  ;;  %v7411_v2 = vld [vmem:[%s12442_s3 + $0x390] sm:$0xff]  }
 0x3cf   :  { %3890 = vmatpush1.bf16.msra.mxu1 %v7378_v36  ;;  %v11732_v36 = vadd.f32 %v11538_v60, %v9779_v39 }
 0x3d0   :  { %3891 = vmatprep.subr.bf16.mxu1 %v7885_v21 }
 0x3d1   :  { %6651 = vmatpush3.bf16.msra.mxu0 %v7380_v47 }
 0x3d2   :  { %6658 = vmatprep.subr.bf16.mxu0 %v7386_v41  ;;  %v13104_v41 = vld [vmem:[#allocation35_spill] sm:$0xff] }
 0x3d3   :  { %3892 = vmatpush1.bf16.msra.mxu1 %v7381_v32 }
 0x3d4   :  { %3870 = vmatmul.mubr.bf16.vlgmr.msra.gmra.mxu0 %v2949_v23  ;;  %3905 = vmatprep.subr.bf16.mxu1 %v7885_v21  ;;  %v13102_v23 = vld [vmem:[#allocation21_spill] sm:$0xff] }
 0x3d5   :  { %6659 = vmatpush3.bf16.msra.mxu0 %v7388_v8  ;;  %v11742_v38 = vadd.f32 %v11532_v37, %v13102_v23  ;;  %v11751_v35 = vadd.f32 %v10927_v57, %v13102_v23  ;;  %v7415_v57 = vld [vmem:[%s12442_s3 + $0x2d0] sm:$0xff]   ;;  %v11778_v8 = vadd.f32 %v11073_v15, %v13104_v41  ;;  %v7416_v15 = vld [vmem:[%s12442_s3 + $0x4c8] sm:$0xff]  }
 0x3d6   :  { %6660 = vmatprep.subr.bf16.mxu0 %v7390_v58  ;;  %v13105_v58 = vld [vmem:[#allocation83_spill] sm:$0xff] }
 0x3d7   :  { %3906 = vmatpush2.bf16.msra.mxu1 %v7382_v16 }
 0x3d8   :  { %3907 = vmatprep.subr.bf16.mxu1 %v7885_v21 }
 0x3d9   :  { %6661 = vmatpush3.bf16.msra.mxu0 %v7392_v45  ;;  %v11789_v45 = vadd.f32 %v11214_v13, %v10355_v55 }
 0x3da   :  { %6662 = vmatprep.subr.bf16.mxu0 %v7394_v51 }
 0x3db   :  { %3908 = vmatpush2.bf16.msra.mxu1 %v7383_v44  ;;  %v6961_v44 = vpack.i.bf16 %v11742_v38, %v11751_v35 }
 0x3dc   :  { %6680 = vmatprep.subr.bf16.mxu1 %v7384_v10  ;;  %v7414_v10 = vld [vmem:[%s12442_s3 + $0x310] sm:$0xff]  }
 0x3dd   :  { %6663 = vmatpush3.bf16.msra.mxu0 %v7396_v30 }
 0x3de   :  { %3910 = vmatmul.mubr.bf16.vlgmr.msra.gmra.mxu1 %v2951_v53  ;;  %6664 = vmatprep.subr.bf16.mxu0 %v7398_v22  ;;  %v13106_v22 = vld [vmem:[#allocation84_spill] sm:$0xff] }
 0x3df   :  { %6681 = vmatpush3.bf16.msra.mxu1 %v7385_v56  ;;  %v13103_v56 = vld [vmem:[#allocation30_spill] sm:$0xff] }
 0x3e0   :  { %6682 = vmatprep.subr.bf16.mxu1 %v7387_v28  ;;  %v11768_v53 = vadd.f32 %v11086_v49, %v13103_v56  ;;  %v11783_v49 = vadd.f32 %v11220_v17, %v13105_v58  ;;  %v7418_v17 = vld [vmem:[%s12442_s3 + $0x448] sm:$0xff]  }
 0x3e1   :  { %6665 = vmatpush3.bf16.msra.mxu0 %v7400_v29 }
 0x3e2   :  { %6666 = vmatprep.subr.bf16.mxu0 %v7402_v61  ;;  %v6971_v5 = vpack.i.bf16 %v11756_v18, %v11768_v53 }
 0x3e3   :  { %6683 = vmatpush3.bf16.msra.mxu1 %v7389_v26 }
 0x3e4   :  { %6684 = vmatprep.subr.bf16.mxu1 %v7391_v62  ;;  %v6991_v62 = vpack.i.bf16 %v11789_v45, %v11783_v49 }
 0x3e5   :  { %6667 = vmatpush3.bf16.msra.mxu0 %v7404_v7 }
 0x3e6   :  { %6668 = vmatprep.subr.bf16.mxu0 %v7406_v11 }
 0x3e7   :  { %6685 = vmatpush3.bf16.msra.mxu1 %v7393_v20 }
 0x3e8   :  { %6686 = vmatprep.subr.bf16.mxu1 %v7395_v40 }
 0x3e9   :  { %6669 = vmatpush3.bf16.msra.mxu0 %v7408_v3 }
 0x3ea   :  { %6670 = vmatprep.subr.bf16.mxu0 %v7410_v42 }
 0x3eb   :  { %6687 = vmatpush3.bf16.msra.mxu1 %v7397_v52 }
 0x3ec   :  { %6688 = vmatprep.subr.bf16.mxu1 %v7399_v43 }
 0x3ed   :  { %6671 = vmatpush3.bf16.msra.mxu0 %v7412_v0 }
 0x3ee   :  { %6672 = vmatprep.subr.bf16.mxu0 %v7414_v10 }
 0x3ef   :  { %6689 = vmatpush3.bf16.msra.mxu1 %v7401_v19  ;;  %v11814_v19 = vadd.f32 %v11079_v27, %v13106_v22 }
 0x3f0   :  { %6690 = vmatprep.subr.bf16.mxu1 %v7403_v33  ;;  %v13107_v33 = vld [vmem:[#allocation39_spill] sm:$0xff] }
 0x3f1   :  { %6673 = vmatpush3.bf16.msra.mxu0 %v7415_v57  ;;  %v11818_v7 = vadd.f32 %v11225_v31, %v13107_v33 }
 0x3f2   :  { %6702 = vmatprep.subr.bf16.mxu0 %v7418_v17 }
 0x3f3   :  { %6691 = vmatpush3.bf16.msra.mxu1 %v7405_v50 }
 0x3f4   :  { %v2513_v24 = vpop.f32.mrf.mxu0  ;;  %6692 = vmatprep.subr.bf16.mxu1 %v7407_v25 }
 0x3f5   :  { %v11735_v47 = vadd.f32 %v2513_v24, %v13034_v34  ;;  %v2554_v63 = vpop.f32.mrf.mxu1  ;;  %v7413_v34 = vld [vmem:[%s12442_s3 + $0x350] sm:$0xff]  }
 0x3f6   :  { %v2515_v32 = vpop.f32.mrf.mxu0  ;;  %v11774_v28 = vadd.f32 %v2554_v63, %v13104_v41 }
 0x3f7   :  { %v6956_v16 = vpack.i.bf16 %v11735_v47, %v11732_v36  ;;  %v2556_v39 = vpop.f32.mrf.mxu1  ;;  %6693 = vmatpush3.bf16.msra.mxu1 %v7409_v4  ;;  %v11808_v52 = vadd.f32 %v2515_v32, %v13106_v22 }
 0x3f8   :  { %v2517_v60 = vpop.f32.mrf.mxu0  ;;  %6694 = vmatprep.subr.bf16.mxu1 %v7411_v2  ;;  %v6976_v26 = vpack.i.bf16 %v11774_v28, %v11778_v8  ;;  %v11802_v13 = vadd.f32 %v2556_v39, %v13103_v56 }
 0x3f9   :  { %v2558_v46 = vpop.f32.mrf.mxu1  ;;  %6957 = vrot.lane.b32.xlu1 %v6956_v16, %s7884_s0  ;;  %v6986_v25 = vpack.i.bf16 %v11808_v52, %v11814_v19 }
 0x3fa   :  { %v2518_v37 = vpop.f32.mrf.mxu0  ;;  %v11839_v46 = vpop.permute.xlu0 %6947 }
 0x3fb   :  { %v2559_v12 = vpop.f32.mrf.mxu1  ;;  %6695 = vmatpush3.bf16.msra.mxu1 %v7413_v34 }
 0x3fc   :  { %6724 = vmatprep.subr.bf16.mxu1 %v7416_v15  ;;  %v6949_v12 = vunpack.i.l.bf16 %v11839_v46 }
 0x3fd   :  { %6962 = vrot.lane.b32.xlu1 %v6961_v44, %s7884_s0  ;;  %v6950_v44 = vunpack.i.h.bf16 %v11839_v46 }
 0x3ff   :  { %v2825_v57 = vsel %vm2679_vm13, %v6949_v12, %v6950_v44 }
 0x400   :  { %v2848_v22 = vmax.f32 %v11068_v59, %v2825_v57  ;;  %v7423_v57 = vld [vmem:[%s12442_s3 + $0x4b8] sm:$0xff]  }
 0x401   :  { %6972 = vrot.lane.b32.xlu1 %v6971_v5, %s7884_s0 }
 0x405   :  { %6977 = vrot.lane.b32.xlu1 %v6976_v26, %s7884_s0 }
 0x409   :  { %6992 = vrot.lane.b32.xlu1 %v6991_v62, %s7884_s0 }
 0x42c   :  { %v6953_v37 = vpop.permute.xlu0 %6952 }
 0x42d   :  { %v6954_v10 = vunpack.i.l.bf16 %v6953_v37  ;;  %v6955_v5 = vunpack.i.h.bf16 %v6953_v37  ;;  %v7421_v37 = vld [vmem:[%s12442_s3 + $0x480] sm:$0xff]  }
 0x42f   :  { %v2824_v41 = vsel %vm2679_vm13, %v6954_v10, %v6949_v12 }
 0x430   :  { %v6968_v62 = vpop.permute.xlu0 %6967 }
 0x434   :  { %v2595_v51 = vpop.f32.mrf.mxu0 }
 0x435   :  { %v11805_v20 = vadd.f32 %v2595_v51, %v10243_v6  ;;  %v2847_v51 = vmax.f32 %v11527_v9, %v2824_v41 }
 0x436   :  { %v2636_v30 = vpop.f32.mrf.mxu1  ;;  %v2597_v40 = vpop.f32.mrf.mxu0 }
 0x437   :  { %v6981_v29 = vpack.i.bf16 %v11805_v20, %v11802_v13  ;;  %v11827_v3 = vadd.f32 %v2597_v40, %v13105_v58  ;;  %v11832_v31 = vadd.f32 %v2636_v30, %v10355_v55 }
 0x438   :  { %v2638_v43 = vpop.f32.mrf.mxu1  ;;  %v2599_v61 = vpop.f32.mrf.mxu0 }
 0x439   :  { %v11821_v6 = vadd.f32 %v2638_v43, %v13107_v33  ;;  %6982 = vrot.lane.b32.xlu0 %v6981_v29, %s7884_s0  ;;  %v6996_v42 = vpack.i.bf16 %v11832_v31, %v11827_v3  ;;  %v6970_v43 = vunpack.i.h.bf16 %v6968_v62  ;;  %v6969_v61 = vunpack.i.l.bf16 %v6968_v62 }
 0x43a   :  { %v2640_v50 = vpop.f32.mrf.mxu1  ;;  %v2600_v11 = vpop.f32.mrf.mxu0 }
 0x43b   :  { %v7001_v27 = vpack.i.bf16 %v11821_v6, %v11818_v7 }
 0x43c   :  { %v2641_v4 = vpop.f32.mrf.mxu1 }
 0x43d   :  { %7002 = vrot.lane.b32.xlu1 %v7001_v27, %s7884_s0  ;;  %6987 = vrot.lane.b32.xlu0 %v6986_v25, %s7884_s0 }
 0x441   :  { %6997 = vrot.lane.b32.xlu0 %v6996_v42, %s7884_s0 }
 0x454   :  { %v6564_v24 = vpop.f32.mrf.mxu0 }
 0x456   :  { %v6586_v2 = vpop.f32.mrf.mxu1  ;;  %v6565_v63 = vpop.f32.mrf.mxu0 }
 0x457   :  { %v6566_v32 = vadd.f32 %v6565_v63, %v6564_v24 }
 0x458   :  { %v6587_v0 = vpop.f32.mrf.mxu1  ;;  %v6567_v23 = vpop.f32.mrf.mxu0 }
 0x459   :  { %v6588_v16 = vadd.f32 %v6587_v0, %v6586_v2  ;;  %v7417_v2 = vld [vmem:[%s12442_s3 + $0x488] sm:$0xff]   ;;  %v7419_v23 = vld [vmem:[%s12442_s3 + $0x4c0] sm:$0xff]  }
 0x45a   :  { %v6589_v39 = vpop.f32.mrf.mxu1  ;;  %v6568_v34 = vpop.f32.mrf.mxu0 }
 0x45b   :  { %v3752_v55 = vadd.f32 %v6588_v16, %v6566_v32 }
 0x45c   :  { %v6590_v60 = vpop.f32.mrf.mxu1 }
 0x46b   :  { %v11846_v56 = vpop.permute.xlu1 %6957 }
 0x46c   :  { %v6960_v58 = vunpack.i.h.bf16 %v11846_v56  ;;  %v6959_v26 = vunpack.i.l.bf16 %v11846_v56 }
 0x46e   :  { %v2895_v15 = vsel %vm2679_vm13, %v6955_v5, %v6959_v26  ;;  %v2896_v17 = vsel %vm2679_vm13, %v6959_v26, %v6960_v58  ;;  %v7422_v26 = vld [vmem:[%s12442_s3 + $0x440] sm:$0xff]  }
 0x46f   :  { %v2918_v30 = vmax.f32 %v11530_v1, %v2895_v15  ;;  %v6963_v40 = vpop.permute.xlu1 %6962  ;;  %v2919_v29 = vmax.f32 %v11732_v36, %v2896_v17 }
 0x470   :  { %v6965_v33 = vunpack.i.h.bf16 %v6963_v40  ;;  %v6964_v50 = vunpack.i.l.bf16 %v6963_v40  ;;  %v7427_v40 = vld [vmem:[%s12442_s3 + $0x4b0] sm:$0xff]  }
 0x471   :  { %v3927_v11 = vmax.f32 %v2848_v22, %v2919_v29  ;;  %v3926_v25 = vmax.f32 %v2847_v51, %v2918_v30  ;;  %v7425_v51 = vld [vmem:[%s12442_s3 + $0x478] sm:$0xff]   ;;  %v7429_v29 = vld [vmem:[%s12442_s3 + $0x470] sm:$0xff]  }
 0x472   :  { %v2822_v27 = vsel %vm2679_vm13, %v6969_v61, %v6964_v50  ;;  %v2823_v4 = vsel %vm2679_vm13, %v6964_v50, %v6954_v10  ;;  %v2893_v42 = vsel %vm2679_vm13, %v6970_v43, %v6965_v33  ;;  %v2894_v9 = vsel %vm2679_vm13, %v6965_v33, %v6955_v5  ;;  %v7420_v10 = vld [vmem:[%s12442_s3 + $0x408] sm:$0xff]   ;;  %v7426_v22 = vld [vmem:[%s12442_s3 + $0x438] sm:$0xff]   ;;  %v7430_v33 = vld [vmem:[%s12442_s3 + $0x430] sm:$0xff]  }
 0x473   :  { %v2845_v1 = vmax.f32 %v11554_v54, %v2822_v27  ;;  %v2916_v59 = vmax.f32 %v11544_v48, %v2893_v42  ;;  %v3939_v24 = vpack.c.bf16 %v3927_v11, %v3927_v11  ;;  %v3938_v36 = vpack.c.bf16 %v3926_v25, %v3926_v25  ;;  %v7428_v43 = vld [vmem:[%s12442_s3 + $0x3f8] sm:$0xff]   ;;  %v7431_v61 = vld [vmem:[%s12442_s3 + $0x4a8] sm:$0xff]   ;;  %v7432_v11 = vld [vmem:[%s12442_s3 + $0x3f0] sm:$0xff]  }
 0x474   :  { %v6608_v63 = vpop.f32.mrf.mxu0  ;;  %v2846_v32 = vmax.f32 %v11751_v35, %v2823_v4  ;;  %v2917_v0 = vmax.f32 %v11742_v38, %v2894_v9  ;;  %v7433_v50 = vld [vmem:[%s12442_s3 + $0x468] sm:$0xff]   ;;  %v7435_v25 = vld [vmem:[%s12442_s3 + $0x4a0] sm:$0xff]   ;;  %v7439_v9 = vld [vmem:[%s12442_s3 + $0x498] sm:$0xff]  }
 0x475   :  { %4744 = vmatprep.mubr.bf16.mxu1 %v3939_v24  ;;  %v3924_v16 = vmax.f32 %v2845_v1, %v2916_v59  ;;  %v7434_v27 = vld [vmem:[%s12442_s3 + $0x428] sm:$0xff]   ;;  %v7437_v4 = vld [vmem:[%s12442_s3 + $0x460] sm:$0xff]   ;;  %v7441_v59 = vld [vmem:[%s12442_s3 + $0x458] sm:$0xff]  }
 0x476   :  { %v6630_v54 = vpop.f32.mrf.mxu1  ;;  %v6609_v39 = vpop.f32.mrf.mxu0  ;;  %4745 = vmatmul.mubr.bf16.vlgmr.msra.gmra.mxu1 %v3938_v36  ;;  %v3925_v48 = vmax.f32 %v2846_v32, %v2917_v0  ;;  %v7436_v42 = vld [vmem:[%s12442_s3 + $0x3e8] sm:$0xff]   ;;  %v7438_v1 = vld [vmem:[%s12442_s3 + $0x420] sm:$0xff]   ;;  %v7443_v36 = vld [vmem:[%s12442_s3 + $0x490] sm:$0xff]  }
 0x477   :  { %v6610_v34 = vadd.f32 %v6609_v39, %v6608_v63  ;;  %v3936_v60 = vpack.c.bf16 %v3924_v16, %v3924_v16  ;;  %6725 = vmatpush3.bf16.msra.mxu1 %v7417_v2  ;;  %v7440_v24 = vld [vmem:[%s12442_s3 + $0x3e0] sm:$0xff]   ;;  %v7442_v2 = vld [vmem:[%s12442_s3 + $0x418] sm:$0xff]   ;;  %v7445_v63 = vld [vmem:[%s12442_s3 + $0x450] sm:$0xff]  }
 0x478   :  { %v6631_v35 = vpop.f32.mrf.mxu1  ;;  %v6611_v12 = vpop.f32.mrf.mxu0  ;;  %v3937_v38 = vpack.c.bf16 %v3925_v48, %v3925_v48  ;;  %6726 = vmatprep.subr.bf16.mxu1 %v7419_v23  ;;  %v7444_v32 = vld [vmem:[%s12442_s3 + $0x3d8] sm:$0xff]   ;;  %v7446_v0 = vld [vmem:[%s12442_s3 + $0x410] sm:$0xff]  }
 0x479   :  { %v3792_v5 = vadd.f32 %v6610_v34, %v3752_v55  ;;  %v6632_v41 = vadd.f32 %v6631_v35, %v6630_v54  ;;  %v7424_v55 = vld [vmem:[%s12442_s3 + $0x400] sm:$0xff]   ;;  %v7447_v16 = vld [vmem:[%s12442_s3 + $0x3d0] sm:$0xff]   ;;  %v7449_v54 = vld [vmem:[%s12442_s3 + $0x548] sm:$0xff]   ;;  %v11961_v35 = vpop.permute.xlu1 %6972 }
 0x47a   :  { %v6633_v62 = vpop.f32.mrf.mxu1  ;;  %4704 = vmatprep.mubr.bf16.mxu0 %v3937_v38  ;;  %v6612_v15 = vpop.f32.mrf.mxu0 }
 0x47b   :  { %v3832_v17 = vadd.f32 %v6632_v41, %v3792_v5  ;;  %4705 = vmatmul.mubr.bf16.vlgmr.msra.gmra.mxu0 %v3936_v60  ;;  %6727 = vmatpush3.bf16.msra.mxu1 %v7421_v37  ;;  %v6974_v62 = vunpack.i.l.bf16 %v11961_v35 }
 0x47c   :  { %v6634_v30 = vpop.f32.mrf.mxu1  ;;  %6703 = vmatpush3.bf16.msra.mxu0 %v7420_v10  ;;  %6728 = vmatprep.subr.bf16.mxu1 %v7423_v57 }
 0x47d   :  { %6704 = vmatprep.subr.bf16.mxu0 %v7422_v26  ;;  %v6978_v5 = vpop.permute.xlu1 %6977  ;;  %v6975_v26 = vunpack.i.h.bf16 %v11961_v35  ;;  %v7470_v35 = vld [vmem:[%s12442_s3 + $0x510] sm:$0xff]  }
 0x47e   :  { %v6979_v15 = vunpack.i.l.bf16 %v6978_v5 }
 0x47f   :  { %6729 = vmatpush3.bf16.msra.mxu1 %v7425_v51 }
 0x480   :  { %6705 = vmatpush3.bf16.msra.mxu0 %v7424_v55  ;;  %6730 = vmatprep.subr.bf16.mxu1 %v7427_v40  ;;  %v2828_v51 = vsel %vm2679_vm13, %v6979_v15, %v6974_v62  ;;  %v6980_v40 = vunpack.i.h.bf16 %v6978_v5  ;;  %v7450_v5 = vld [vmem:[%s12442_s3 + $0x508] sm:$0xff]  }
 0x481   :  { %6706 = vmatprep.subr.bf16.mxu0 %v7426_v22  ;;  %v11971_v30 = vpop.permute.xlu1 %6992 }
 0x483   :  { %6731 = vmatpush3.bf16.msra.mxu1 %v7429_v29 }
 0x484   :  { %6707 = vmatpush3.bf16.msra.mxu0 %v7428_v43  ;;  %6732 = vmatprep.subr.bf16.mxu1 %v7431_v61  ;;  %v2851_v43 = vmax.f32 %v11778_v8, %v2828_v51  ;;  %v7457_v51 = vld [vmem:[%s12442_s3 + $0x570] sm:$0xff]  }
 0x485   :  { %6708 = vmatprep.subr.bf16.mxu0 %v7430_v33 }
 0x487   :  { %6733 = vmatpush3.bf16.msra.mxu1 %v7433_v50 }
 0x488   :  { %6709 = vmatpush3.bf16.msra.mxu0 %v7432_v11  ;;  %6734 = vmatprep.subr.bf16.mxu1 %v7435_v25  ;;  %v6995_v11 = vunpack.i.h.bf16 %v11971_v30  ;;  %v6994_v25 = vunpack.i.l.bf16 %v11971_v30 }
 0x489   :  { %6710 = vmatprep.subr.bf16.mxu0 %v7434_v27 }
 0x48b   :  { %6735 = vmatpush3.bf16.msra.mxu1 %v7437_v4 }
 0x48c   :  { %6711 = vmatpush3.bf16.msra.mxu0 %v7436_v42  ;;  %6736 = vmatprep.subr.bf16.mxu1 %v7439_v9 }
 0x48d   :  { %6712 = vmatprep.subr.bf16.mxu0 %v7438_v1 }
 0x48f   :  { %6737 = vmatpush3.bf16.msra.mxu1 %v7441_v59 }
 0x490   :  { %6713 = vmatpush3.bf16.msra.mxu0 %v7440_v24  ;;  %6738 = vmatprep.subr.bf16.mxu1 %v7443_v36 }
 0x491   :  { %6714 = vmatprep.subr.bf16.mxu0 %v7442_v2 }
 0x493   :  { %6739 = vmatpush3.bf16.msra.mxu1 %v7445_v63  ;;  %v2831_v63 = vsel %vm2679_vm13, %v6994_v25, %v6995_v11 }
 0x494   :  { %v6652_v23 = vpop.f32.mrf.mxu0  ;;  %6715 = vmatpush3.bf16.msra.mxu0 %v7444_v32  ;;  %4872 = vmatprep.subr.bf16.mxu1 %v7885_v21 }
 0x495   :  { %6716 = vmatprep.subr.bf16.mxu0 %v7446_v0 }
 0x496   :  { %v6653_v39 = vpop.f32.mrf.mxu0 }
 0x497   :  { %v6654_v48 = vadd.f32 %v6653_v39, %v6652_v23 }
 0x498   :  { %v6655_v34 = vpop.f32.mrf.mxu0  ;;  %6717 = vmatpush3.bf16.msra.mxu0 %v7447_v16 }
 0x499   :  { %v3872_v60 = vadd.f32 %v6654_v48, %v3832_v17  ;;  %6746 = vmatprep.subr.bf16.mxu0 %v7449_v54  ;;  %v2829_v17 = vsel %vm2679_vm13, %v6974_v62, %v6975_v26  ;;  %v7454_v62 = vld [vmem:[%s12442_s3 + $0x578] sm:$0xff]  }
 0x49a   :  { %v6656_v37 = vpop.f32.mrf.mxu0  ;;  %v2852_v50 = vmax.f32 %v11768_v53, %v2829_v17  ;;  %v7455_v17 = vld [vmem:[%s12442_s3 + $0x538] sm:$0xff]  }
 0x49e   :  { %v3911_v12 = vpop.f32.mrf.mxu1 }
 0x49f   :  { %v11963_v38 = vadd.f32 %v3911_v12, %v3872_v60  ;;  %v2854_v12 = vmax.f32 %v11783_v49, %v2831_v63  ;;  %v7452_v49 = vld [vmem:[%s12442_s3 + $0x540] sm:$0xff]   ;;  %v7476_v63 = vld [vmem:[%s12444_s5 + $0x34] ss:$8 sps:$4 sm:$0xff]  }
 0x4a0   :  { %v3913_v10 = vpop.f32.mrf.mxu1 }
 0x4a2   :  { %v3914_v57 = vpop.f32.mrf.mxu1 }
 0x4a4   :  { %v3915_v41 = vpop.f32.mrf.mxu1 }
 0x4ab   :  { %v11973_v55 = vpop.permute.xlu0 %6982 }
 0x4ac   :  { %v6985_v22 = vunpack.i.h.bf16 %v11973_v55  ;;  %v6984_v29 = vunpack.i.l.bf16 %v11973_v55  ;;  %v7468_v55 = vld [vmem:[%s12442_s3 + $0x4d8] sm:$0xff]  }
 0x4ae   :  { %v2899_v61 = vsel %vm2679_vm13, %v6980_v40, %v6984_v29  ;;  %v2900_v33 = vsel %vm2679_vm13, %v6984_v29, %v6985_v22  ;;  %v7458_v29 = vld [vmem:[%s12442_s3 + $0x530] sm:$0xff]  }
 0x4af   :  { %v2922_v27 = vmax.f32 %v11774_v28, %v2899_v61  ;;  %v11986_v4 = vpop.permute.xlu1 %7002  ;;  %v6988_v42 = vpop.permute.xlu0 %6987  ;;  %v2923_v9 = vmax.f32 %v11802_v13, %v2900_v33  ;;  %v7459_v61 = vld [vmem:[%s12442_s3 + $0x4f0] sm:$0xff]   ;;  %v7461_v33 = vld [vmem:[%s12442_s3 + $0x528] sm:$0xff]  }
 0x4b0   :  { %v7005_v8 = vunpack.i.h.bf16 %v11986_v4  ;;  %v7004_v1 = vunpack.i.l.bf16 %v11986_v4  ;;  %v6990_v59 = vunpack.i.h.bf16 %v6988_v42  ;;  %v6989_v24 = vunpack.i.l.bf16 %v6988_v42  ;;  %v7464_v42 = vld [vmem:[%s12442_s3 + $0x520] sm:$0xff]  }
 0x4b1   :  { %v3931_v36 = vmax.f32 %v2852_v50, %v2923_v9  ;;  %v3930_v2 = vmax.f32 %v2851_v43, %v2922_v27  ;;  %v7460_v43 = vld [vmem:[%s12442_s3 + $0x568] sm:$0xff]   ;;  %v7463_v50 = vld [vmem:[%s12442_s3 + $0x560] sm:$0xff]   ;;  %v7466_v9 = vld [vmem:[%s12442_s3 + $0x558] sm:$0xff]  }
 0x4b2   :  { %v2927_v53 = vmax.f32 %v11821_v6, %v7005_v8  ;;  %v2856_v28 = vmax.f32 %v11818_v7, %v7004_v1  ;;  %v2897_v13 = vsel %vm2679_vm13, %v6960_v58, %v6990_v59  ;;  %v2898_v32 = vsel %vm2679_vm13, %v6990_v59, %v6980_v40  ;;  %v7456_v40 = vld [vmem:[%s12442_s3 + $0x4f8] sm:$0xff]   ;;  %v7462_v27 = vld [vmem:[%s12442_s3 + $0x4e8] sm:$0xff]   ;;  %v7465_v59 = vld [vmem:[%s12442_s3 + $0x4e0] sm:$0xff]  }
 0x4b3   :  { %v2920_v0 = vmax.f32 %v11735_v47, %v2897_v13  ;;  %v2826_v6 = vsel %vm2679_vm13, %v6950_v44, %v6989_v24  ;;  %v12010_v23 = vpop.permute.xlu0 %6997  ;;  %v2827_v56 = vsel %vm2679_vm13, %v6989_v24, %v6979_v15  ;;  %v3943_v39 = vpack.c.bf16 %v3931_v36, %v3931_v36  ;;  %v7448_v47 = vld [vmem:[%s12442_s3 + $0x588] sm:$0xff]   ;;  %v7453_v15 = vld [vmem:[%s12442_s3 + $0x500] sm:$0xff]   ;;  %v7467_v24 = vld [vmem:[%s12442_s3 + $0x518] sm:$0xff]  }
 0x4b4   :  { %v3935_v7 = vmax.f32 %v2856_v28, %v2927_v53  ;;  %v2849_v58 = vmax.f32 %v11071_v14, %v2826_v6  ;;  %v7000_v16 = vunpack.i.h.bf16 %v12010_v23  ;;  %v6999_v54 = vunpack.i.l.bf16 %v12010_v23  ;;  %v7482_v6 = vld [vmem:[%s12444_s5 + $0x14] ss:$8 sps:$4 sm:$0xff]   ;;  %v7480_v23 = vld [vmem:[%s12444_s5 + $0x10] ss:$8 sps:$4 sm:$0xff]  }
 0x4b5   :  { %v3942_v48 = vpack.c.bf16 %v3930_v2, %v3930_v2  ;;  %v2850_v46 = vmax.f32 %v11814_v19, %v2827_v56  ;;  %v2921_v34 = vmax.f32 %v11808_v52, %v2898_v32  ;;  %4824 = vmatprep.mubr.bf16.mxu1 %v3943_v39  ;;  %v7451_v52 = vld [vmem:[%s12442_s3 + $0x580] sm:$0xff]   ;;  %v7469_v2 = vld [vmem:[%s12442_s3 + $0x550] sm:$0xff]   ;;  %v2830_v53 = vsel %vm2679_vm13, %v6975_v26, %v6994_v25 }
 0x4b6   :  { %v3947_v44 = vpack.c.bf16 %v3935_v7, %v3935_v7  ;;  %v3928_v60 = vmax.f32 %v2849_v58, %v2920_v0  ;;  %v2902_v14 = vsel %vm2679_vm13, %v6999_v54, %v7000_v16  ;;  %v2901_v36 = vsel %vm2679_vm13, %v6985_v22, %v6999_v54  ;;  %v7477_v32 = vld [vmem:[%s12444_s5 + $0x20] ss:$8 sps:$4 sm:$0xff]   ;;  %v7479_v0 = vld [vmem:[%s12444_s5 + $0x24] ss:$8 sps:$4 sm:$0xff]   ;;  %v12163_v58 = vld [vmem:[%s12445_s6 + $0x34] ss:$8 sps:$4 sm:$0xff]  }
 0x4b7   :  { %4825 = vmatmul.mubr.bf16.vlgmr.msra.gmra.mxu1 %v3942_v48  ;;  %v3929_v37 = vmax.f32 %v2850_v46, %v2921_v34  ;;  %v2925_v10 = vmax.f32 %v11827_v3, %v2902_v14  ;;  %v2903_v22 = vsel %vm2679_vm13, %v7000_v16, %v7005_v8  ;;  %v2924_v28 = vmax.f32 %v11805_v20, %v2901_v36  ;;  %v7472_v8 = vld [vmem:[%s12442_s3 + $0x598] sm:$0xff]   ;;  %v7485_v7 = vld [vmem:[%s12444_s5 + $0x4] ss:$8 sps:$4 sm:$0xff]   ;;  %v7483_v56 = vld [vmem:[%s12444_s5] ss:$8 sps:$4 sm:$0xff]  }
 0x4b8   :  { %4873 = vmatpush1.bf16.msra.mxu1 %v7448_v47  ;;  %6505 = vmatprep.mubr.msk.bf16.mxu1 %vm3673_vm14, %v3947_v44  ;;  %v3940_v19 = vpack.c.bf16 %v3928_v60, %v3928_v60  ;;  %v2853_v26 = vmax.f32 %v11756_v18, %v2830_v53  ;;  %v2832_v25 = vsel %vm2679_vm13, %v6995_v11, %v7004_v1  ;;  %v7471_v18 = vld [vmem:[%s12442_s3 + $0x4d0] sm:$0xff]   ;;  %v12175_v54 = vld [vmem:[%s12445_s6 + $0x24] ss:$8 sps:$4 sm:$0xff]   ;;  %v12182_v39 = vld [vmem:[%s12445_s6 + $0x20] ss:$8 sps:$4 sm:$0xff]  }
 0x4b9   :  { %v3941_v57 = vpack.c.bf16 %v3929_v37, %v3929_v37  ;;  %4874 = vmatprep.subr.bf16.mxu1 %v7885_v21  ;;  %v3933_v41 = vmax.f32 %v2854_v12, %v2925_v10  ;;  %v2926_v20 = vmax.f32 %v11832_v31, %v2903_v22  ;;  %v2855_v30 = vmax.f32 %v11789_v45, %v2832_v25  ;;  %v7473_v11 = vld [vmem:[%s12442_s3 + $0x590] sm:$0xff]   ;;  %v12199_v46 = vld [vmem:[%s12445_s6 + $0x4] ss:$8 sps:$4 sm:$0xff]   ;;  %v12206_v34 = vld [vmem:[%s12445_s6] ss:$8 sps:$4 sm:$0xff]  }
 0x4ba   :  { %v3932_v4 = vmax.f32 %v2853_v26, %v2924_v28  ;;  %v7474_v45 = vld [vmem:[%s12444_s5 + $0x30] ss:$8 sps:$4 sm:$0xff]   ;;  %v12187_v48 = vld [vmem:[%s12445_s6 + $0x14] ss:$8 sps:$4 sm:$0xff]  }
 0x4bb   :  { %4784 = vmatprep.mubr.bf16.mxu0 %v3941_v57  ;;  %v3945_v3 = vpack.c.bf16 %v3933_v41, %v3933_v41  ;;  %v3934_v31 = vmax.f32 %v2855_v30, %v2926_v20  ;;  %v12168_v16 = vld [vmem:[%s12445_s6 + $0x30] ss:$8 sps:$4 sm:$0xff]   ;;  %v4922_v30 = vld [vmem:[%s12446_s7] sm:$0x3]  ;;  %s7886_s7 = smov 64  }
 0x4bc   :  { %4785 = vmatmul.mubr.bf16.vlgmr.msra.gmra.mxu0 %v3940_v19  ;;  %4875 = vmatpush1.bf16.msra.mxu1 %v7451_v52  ;;  %v3944_v1 = vpack.c.bf16 %v3932_v4, %v3932_v4  ;;  %v12194_v47 = vld [vmem:[%s12445_s6 + $0x10] ss:$8 sps:$4 sm:$0xff]  }
 0x4bd   :  { %6747 = vmatpush3.bf16.msra.mxu0 %v7450_v5  ;;  %4864 = vmatprep.mubr.bf16.mxu0 %v3945_v3  ;;  %v3946_v13 = vpack.c.bf16 %v3934_v31, %v3934_v31 }
 0x4be   :  { %6748 = vmatprep.subr.bf16.mxu0 %v7452_v49  ;;  %4876 = vmatprep.subr.bf16.mxu1 %v7885_v21 }
 0x4c0   :  { %4877 = vmatpush1.bf16.msra.mxu1 %v7454_v62 }
 0x4c1   :  { %6749 = vmatpush3.bf16.msra.mxu0 %v7453_v15  ;;  %4878 = vmatprep.subr.bf16.mxu1 %v7885_v21 }
 0x4c2   :  { %6750 = vmatprep.subr.bf16.mxu0 %v7455_v17 }
 0x4c4   :  { %4879 = vmatpush1.bf16.msra.mxu1 %v7457_v51 }
 0x4c5   :  { %6751 = vmatpush3.bf16.msra.mxu0 %v7456_v40  ;;  %4880 = vmatprep.subr.bf16.mxu1 %v7885_v21 }
 0x4c6   :  { %6752 = vmatprep.subr.bf16.mxu0 %v7458_v29 }
 0x4c8   :  { %4881 = vmatpush1.bf16.msra.mxu1 %v7460_v43 }
 0x4c9   :  { %6753 = vmatpush3.bf16.msra.mxu0 %v7459_v61  ;;  %4882 = vmatprep.subr.bf16.mxu1 %v7885_v21 }
 0x4ca   :  { %6754 = vmatprep.subr.bf16.mxu0 %v7461_v33 }
 0x4cc   :  { %4883 = vmatpush1.bf16.msra.mxu1 %v7463_v50 }
 0x4cd   :  { %6755 = vmatpush3.bf16.msra.mxu0 %v7462_v27  ;;  %4884 = vmatprep.subr.bf16.mxu1 %v7885_v21 }
 0x4ce   :  { %6756 = vmatprep.subr.bf16.mxu0 %v7464_v42 }
 0x4d0   :  { %4885 = vmatpush1.bf16.msra.mxu1 %v7466_v9 }
 0x4d1   :  { %6757 = vmatpush3.bf16.msra.mxu0 %v7465_v59  ;;  %4886 = vmatprep.subr.bf16.mxu1 %v7885_v21 }
 0x4d2   :  { %6758 = vmatprep.subr.bf16.mxu0 %v7467_v24  ;;  %v6234_v24 = vld [vmem:[%s12443_s4] ss:$0 sm:$0xff] }
 0x4d3   :  { %v3923_v22 = vadd.f32 %v6234_v24, %v11963_v38 }
 0x4d4   :  { %4887 = vmatpush1.bf16.msra.mxu1 %v7469_v2 }
 0x4d5   :  { %6759 = vmatpush3.bf16.msra.mxu0 %v7468_v55  ;;  %4900 = vmatprep.subr.bf16.mxu1 %v7885_v21 }
 0x4d6   :  { %6760 = vmatprep.subr.bf16.mxu0 %v7470_v35 }
 0x4d8   :  { %4901 = vmatpush2.bf16.msra.mxu1 %v7472_v8 }
 0x4d9   :  { %6761 = vmatpush3.bf16.msra.mxu0 %v7471_v18  ;;  %4902 = vmatprep.subr.bf16.mxu1 %v7885_v21 }
 0x4da   :  { %4986 = vmatprep.subr.bf16.mxu0 %v7476_v63 }
 0x4dc   :  { %4865 = vmatmul.mubr.bf16.vlgmr.msra.gmra.mxu0 %v3944_v1  ;;  %4903 = vmatpush2.bf16.msra.mxu1 %v7473_v11  ;;  %v13108_v11 = vld [vmem:[#allocation13_spill] sm:$0xff]  ;;  %v13109_v1 = vld [vmem:[#allocation20_spill] sm:$0xff] }
 0x4dd   :  { %5010 = vmatprep.mubr.bf16.mxu0 %v7885_v21  ;;  %4987 = vmatpush1.bf16.msra.mxu0 %v7474_v45  ;;  %v4927_v31 = vrot.slane %v4922_v30, %v13108_v11 }
 0x4de   :  { %4988 = vmatprep.subr.bf16.mxu0 %v7479_v0  ;;  %5143 = vmatprep.subr.bf16.mxu1 %v12163_v58 }
 0x4df   :  { %4905 = vmatmul.mubr.bf16.vlgmr.msra.gmra.mxu1 %v3946_v13  ;;  %v4931_v13 = vrot.slane %v4922_v30, %v13109_v1 }
 0x4e0   :  { %5167 = vmatprep.mubr.bf16.mxu1 %v7885_v21  ;;  %5144 = vmatpush1.bf16.msra.mxu1 %v12168_v16 }
 0x4e1   :  { %4989 = vmatpush1.bf16.msra.mxu0 %v7477_v32  ;;  %5145 = vmatprep.subr.bf16.mxu1 %v12175_v54 }
 0x4e2   :  { %4990 = vmatprep.subr.bf16.mxu0 %v7482_v6 }
 0x4e4   :  { %5146 = vmatpush1.bf16.msra.mxu1 %v12182_v39 }
 0x4e5   :  { %4991 = vmatpush1.bf16.msra.mxu0 %v7480_v23  ;;  %5147 = vmatprep.subr.bf16.mxu1 %v12187_v48 }
 0x4e6   :  { %4992 = vmatprep.subr.bf16.mxu0 %v7485_v7 }
 0x4e8   :  { %5148 = vmatpush1.bf16.msra.mxu1 %v12194_v47 }
 0x4e9   :  { %4993 = vmatpush1.bf16.msra.mxu0 %v7483_v56  ;;  %5149 = vmatprep.subr.bf16.mxu1 %v12199_v46 }
 0x4ea   :  { %5078 = vmatprep.subr.bf16.mxu0 %v12163_v58 }
 0x4ec   :  { %5150 = vmatpush1.bf16.msra.mxu1 %v12206_v34 }
 0x4ed   :  { %5293 = vmatprep.subr.bf16.mxu1 %v12163_v58 }
 0x536   :  { %v6696_v44 = vpop.f32.mrf.mxu1 }
 0x538   :  { %v6697_v60 = vpop.f32.mrf.mxu1 }
 0x539   :  { %v6698_v14 = vadd.f32 %v6697_v60, %v6696_v44 }
 0x53a   :  { %v6699_v37 = vpop.f32.mrf.mxu1 }
 0x53b   :  { %v6674_v12 = vpop.f32.mrf.mxu0 }
 0x53c   :  { %v6700_v10 = vpop.f32.mrf.mxu1 }
 0x53d   :  { %v6675_v19 = vpop.f32.mrf.mxu0 }
 0x53e   :  { %v6676_v52 = vadd.f32 %v6675_v19, %v6674_v12 }
 0x53f   :  { %v6677_v57 = vpop.f32.mrf.mxu0 }
 0x540   :  { %v4747_v5 = vadd.f32 %v6698_v14, %v6676_v52 }
 0x541   :  { %v6678_v41 = vpop.f32.mrf.mxu0 }
 0x577   :  { %v6740_v49 = vpop.f32.mrf.mxu1 }
 0x579   :  { %v6741_v3 = vpop.f32.mrf.mxu1 }
 0x57a   :  { %v6742_v50 = vadd.f32 %v6741_v3, %v6740_v49 }
 0x57b   :  { %v6743_v62 = vpop.f32.mrf.mxu1 }
 0x57c   :  { %v6718_v15 = vpop.f32.mrf.mxu0 }
 0x57d   :  { %v6744_v17 = vpop.f32.mrf.mxu1 }
 0x57e   :  { %v6719_v51 = vpop.f32.mrf.mxu0 }
 0x57f   :  { %v6720_v43 = vadd.f32 %v6719_v51, %v6718_v15 }
 0x580   :  { %v6721_v40 = vpop.f32.mrf.mxu0 }
 0x581   :  { %v4787_v61 = vadd.f32 %v6720_v43, %v4747_v5 }
 0x582   :  { %v6722_v29 = vpop.f32.mrf.mxu0 }
 0x583   :  { %v4827_v9 = vadd.f32 %v6742_v50, %v4787_v61 }
 0x59c   :  { %v6762_v33 = vpop.f32.mrf.mxu0 }
 0x59e   :  { %v6763_v27 = vpop.f32.mrf.mxu0 }
 0x59f   :  { %v6764_v42 = vadd.f32 %v6763_v27, %v6762_v33  ;;  %v4906_v59 = vpop.f32.mrf.mxu1 }
 0x5a0   :  { %v6765_v36 = vpop.f32.mrf.mxu0 }
 0x5a1   :  { %v4867_v2 = vadd.f32 %v6764_v42, %v4827_v9  ;;  %v4908_v53 = vpop.f32.mrf.mxu1 }
 0x5a2   :  { %v6766_v55 = vpop.f32.mrf.mxu0 }
 0x5a3   :  { %v4907_v28 = vadd.f32 %v4906_v59, %v4867_v2  ;;  %v4909_v35 = vpop.f32.mrf.mxu1 }
 0x5a5   :  { %v4912_v26 = vadd.f32 %v4907_v28, %v3923_v22  ;;  %v4910_v25 = vpop.f32.mrf.mxu1 }
 0x5a7   :  { %v4913_v8 = vpack.c.bf16 %v4912_v26, %v4912_v26 }
 0x5a9   :  { %6514 = vmatmul.mubr.msk.bf16.vlgmr.msra.gmra.mxu0 %vm4974_vm15, %v4913_v8 }
 0x5aa   :  { %5079 = vmatpush1.bf16.msra.mxu0 %v12168_v16  ;;  %5102 = vmatprep.mubr.bf16.mxu0 %v7885_v21 }
 0x5ab   :  { %5080 = vmatprep.subr.bf16.mxu0 %v12175_v54 }
 0x5ae   :  { %5081 = vmatpush1.bf16.msra.mxu0 %v12182_v39 }
 0x5af   :  { %5082 = vmatprep.subr.bf16.mxu0 %v12187_v48 }
 0x5b2   :  { %5083 = vmatpush1.bf16.msra.mxu0 %v12194_v47 }
 0x5b3   :  { %5084 = vmatprep.subr.bf16.mxu0 %v12199_v46 }
 0x5b6   :  { %5085 = vmatpush1.bf16.msra.mxu0 %v12206_v34 }
 0x5b7   :  { %5218 = vmatprep.subr.bf16.mxu0 %v12163_v58 }
 0x5b9   :  { %5103 = vmatmul.mubr.bf16.vlgmr.msra.gmra.mxu0 %v7885_v21 }
 0x5ba   :  { %5219 = vmatpush1.bf16.msra.mxu0 %v12168_v16  ;;  %5242 = vmatprep.mubr.bf16.mxu0 %v7885_v21 }
 0x5bb   :  { %5220 = vmatprep.subr.bf16.mxu0 %v12175_v54 }
 0x5be   :  { %5221 = vmatpush1.bf16.msra.mxu0 %v12182_v39 }
 0x5bf   :  { %5222 = vmatprep.subr.bf16.mxu0 %v12187_v48 }
 0x5c2   :  { %5223 = vmatpush1.bf16.msra.mxu0 %v12194_v47 }
 0x5c3   :  { %5224 = vmatprep.subr.bf16.mxu0 %v12199_v46 }
 0x5c6   :  { %5225 = vmatpush1.bf16.msra.mxu0 %v12206_v34 }
 0x669   :  { %v5012_v38 = vpop.f32.mrf.mxu0 }
 0x66a   :  { %v12238_v45 = vadd.f32 %v5012_v38, %v4927_v31 }
 0x66b   :  { %v5014_v20 = vpop.f32.mrf.mxu0 }
 0x66c   :  { %v12240_v32 = vadd.f32 %v5014_v20, %v4931_v13 }
 0x66d   :  { %v5016_v18 = vpop.f32.mrf.mxu0 }
 0x66f   :  { %v5017_v4 = vpop.f32.mrf.mxu0 }
 0x679   :  { %v5104_v63 = vpop.f32.mrf.mxu0 }
 0x67a   :  { %v5111_v0 = vadd.f32 %v5104_v63, %v12238_v45 }
 0x67b   :  { %v5106_v6 = vpop.f32.mrf.mxu0 }
 0x67c   :  { %7522 = vtanh.f32 %v5111_v0  ;;  %v5112_v23 = vadd.f32 %v5106_v6, %v12240_v32 }
 0x67d   :  { %v5108_v7 = vpop.f32.mrf.mxu0 }
 0x67e   :  { %7524 = vtanh.f32 %v5112_v23 }
 0x67f   :  { %v5109_v56 = vpop.f32.mrf.mxu0 }
 0x689   :  { %v7523_v58 = vpop.eup %7522 }
 0x68a   :  { %v5115_v44 = vmul.f32 0.5, %v7523_v58 }
 0x68b   :  { %v7525_v14 = vpop.eup %7524 }
 0x68c   :  { %v5116_v60 = vadd.f32 0.5, %v5115_v44  ;;  %v5117_v52 = vmul.f32 0.5, %v7525_v14 }
 0x68e   :  { %v5120_v37 = vmul.f32 %v7525_v14, %v5116_v60  ;;  %v5119_v12 = vmul.f32 0.0, %v5116_v60  ;;  %v5118_v57 = vadd.f32 0.5, %v5117_v52 }
 0x690   :  { %5122 = vrot.lane.b32.xlu0 %v5120_v37, %s7886_s7 }
 0x702   :  { %v5123_v10 = vpop.permute.xlu0 %5122 }
 0x703   :  { %v5125_v19 = vadd.f32 %v5123_v10, %v5119_v12 }
 0x705   :  { %7526 = vtanh.f32 %v5125_v19  ;;  %v5191_v43 = vrot.slane %v5125_v19, 6 }
 0x712   :  { %v7527_v5 = vpop.eup %7526 }
 0x713   :  { %v12245_v41 = vmul.f32 %v7527_v5, %v5118_v57 }
 0x715   :  { %v5128_v49 = vpack.c.bf16 %v12245_v41, %v12245_v41 }
 0x717   :  { %5130 = vrot.lane.b32.xlu1 %v5128_v49, %s7886_s7 }
 0x789   :  { %v5131_v3 = vpop.permute.xlu1 %5130 }
 0x78a   :  { %6523 = vmatmul.mubr.msk.bf16.vlgmr.msra.gmra.mxu1 %vm4974_vm15, %v5131_v3 }
 0x78b   :  { %5294 = vmatpush1.bf16.msra.mxu1 %v12168_v16  ;;  %5317 = vmatprep.mubr.bf16.mxu1 %v7885_v21 }
 0x78c   :  { %5295 = vmatprep.subr.bf16.mxu1 %v12175_v54 }
 0x78f   :  { %5296 = vmatpush1.bf16.msra.mxu1 %v12182_v39 }
 0x790   :  { %5297 = vmatprep.subr.bf16.mxu1 %v12187_v48 }
 0x793   :  { %5298 = vmatpush1.bf16.msra.mxu1 %v12194_v47 }
 0x794   :  { %5299 = vmatprep.subr.bf16.mxu1 %v12199_v46 }
 0x797   :  { %5300 = vmatpush1.bf16.msra.mxu1 %v12206_v34 }
 0x84a   :  { %v5169_v62 = vpop.f32.mrf.mxu1 }
 0x84b   :  { %v5178_v15 = vrot.slane %v5169_v62, 6 }
 0x84c   :  { %v5171_v17 = vpop.f32.mrf.mxu1 }
 0x84d   :  { %v5182_v51 = vadd.f32 %v5178_v15, %v12238_v45  ;;  %v5179_v16 = vrot.slane %v5171_v17, 6 }
 0x84e   :  { %v5173_v40 = vpop.f32.mrf.mxu1 }
 0x84f   :  { %7528 = vtanh.f32 %v5182_v51  ;;  %v5183_v54 = vadd.f32 %v5179_v16, %v12240_v32 }
 0x850   :  { %v5174_v29 = vpop.f32.mrf.mxu1 }
 0x851   :  { %7530 = vtanh.f32 %v5183_v54  ;;  %v7501_v54 = vld [vmem:[%s12447_s8 + $0x30] ss:$8 sps:$4 sm:$0xff]   ;;  %v7503_v29 = vld [vmem:[%s12447_s8 + $0x34] ss:$8 sps:$4 sm:$0xff]  }
 0x852   :  { %5433 = vmatprep.subr.bf16.mxu0 %v7503_v29 }
 0x85c   :  { %v7529_v39 = vpop.eup %7528 }
 0x85d   :  { %v5186_v48 = vmul.f32 0.5, %v7529_v39  ;;  %v12296_v39 = vld [vmem:[%s12448_s9 + $0x24] ss:$8 sps:$4 sm:$0xff]  }
 0x85e   :  { %v7531_v61 = vpop.eup %7530 }
 0x85f   :  { %v5187_v47 = vadd.f32 0.5, %v5186_v48  ;;  %v5188_v27 = vmul.f32 0.5, %v7531_v61  ;;  %v7509_v48 = vld [vmem:[%s12447_s8 + $0x24] ss:$8 sps:$4 sm:$0xff]  }
 0x861   :  { %v5194_v46 = vmul.f32 %v7531_v61, %v5187_v47  ;;  %v5193_v33 = vmul.f32 %v5191_v43, %v5187_v47  ;;  %v5189_v42 = vadd.f32 0.5, %v5188_v27  ;;  %v12306_v43 = vld [vmem:[%s12448_s9 + $0x20] ss:$8 sps:$4 sm:$0xff]   ;;  %v12315_v61 = vld [vmem:[%s12448_s9 + $0x14] ss:$8 sps:$4 sm:$0xff]  }
 0x862   :  { %v7507_v47 = vld [vmem:[%s12447_s8 + $0x20] ss:$8 sps:$4 sm:$0xff]   ;;  %v7521_v27 = vld [vmem:[%s12447_s8 + $0x4] ss:$8 sps:$4 sm:$0xff]  }
 0x863   :  { %5196 = vrot.lane.b32.xlu0 %v5194_v46, %s7886_s7  ;;  %v7515_v46 = vld [vmem:[%s12447_s8 + $0x14] ss:$8 sps:$4 sm:$0xff]  }
 0x8d5   :  { %v5197_v34 = vpop.permute.xlu0 %5196 }
 0x8d6   :  { %v5199_v50 = vadd.f32 %v5197_v34, %v5193_v33  ;;  %v12324_v33 = vld [vmem:[%s12448_s9 + $0x10] ss:$8 sps:$4 sm:$0xff]  }
 0x8d7   :  { %v7513_v34 = vld [vmem:[%s12447_s8 + $0x10] ss:$8 sps:$4 sm:$0xff]  }
 0x8d8   :  { %7532 = vtanh.f32 %v5199_v50  ;;  %v5266_v18 = vrot.slane %v5199_v50, 6  ;;  %v12333_v50 = vld [vmem:[%s12448_s9 + $0x4] ss:$8 sps:$4 sm:$0xff]  }
 0x8e5   :  { %v7533_v9 = vpop.eup %7532 }
 0x8e6   :  { %v5201_v59 = vmul.f32 %v7533_v9, %v5189_v42  ;;  %v12342_v42 = vld [vmem:[%s12448_s9] ss:$8 sps:$4 sm:$0xff]  }
 0x8e7   :  { %v7519_v9 = vld [vmem:[%s12447_s8] ss:$8 sps:$4 sm:$0xff]  }
 0x8e8   :  { %v5202_v24 = vpack.c.bf16 %v5201_v59, %v5201_v59  ;;  %v5353_v58 = vsel %vm5352_vm0, %v12245_v41, %v5201_v59 }
 0x8ea   :  { %v5204_v36 = vrot.slane %v5202_v24, 1 }
 0x8ec   :  { %5205 = vrot.lane.b32.xlu1 %v5204_v36, %s7886_s7 }
 0x95e   :  { %v5206_v2 = vpop.permute.xlu1 %5205 }
 0x95f   :  { %6524 = vmatmul.mubr.msk.bf16.vlgmr.msra.gmra.mxu0 %vm4974_vm15, %v5206_v2 }
 0x960   :  { %5457 = vmatprep.mubr.bf16.mxu0 %v7885_v21  ;;  %5434 = vmatpush1.bf16.msra.mxu0 %v7501_v54 }
 0x961   :  { %5435 = vmatprep.subr.bf16.mxu0 %v7509_v48 }
 0x964   :  { %5436 = vmatpush1.bf16.msra.mxu0 %v7507_v47 }
 0x965   :  { %5437 = vmatprep.subr.bf16.mxu0 %v7515_v46 }
 0x968   :  { %5438 = vmatpush1.bf16.msra.mxu0 %v7513_v34 }
 0x969   :  { %5439 = vmatprep.subr.bf16.mxu0 %v7521_v27 }
 0x96c   :  { %5440 = vmatpush1.bf16.msra.mxu0 %v7519_v9 }
 0xa1f   :  { %v5244_v53 = vpop.f32.mrf.mxu0 }
 0xa20   :  { %v5253_v55 = vrot.slane %v5244_v53, 4 }
 0xa21   :  { %v5246_v22 = vpop.f32.mrf.mxu0 }
 0xa22   :  { %v5257_v28 = vadd.f32 %v5253_v55, %v12238_v45  ;;  %v5254_v35 = vrot.slane %v5246_v22, 4 }
 0xa23   :  { %v5248_v26 = vpop.f32.mrf.mxu0 }
 0xa24   :  { %7534 = vtanh.f32 %v5257_v28  ;;  %v5258_v25 = vadd.f32 %v5254_v35, %v12240_v32 }
 0xa25   :  { %v5249_v8 = vpop.f32.mrf.mxu0 }
 0xa26   :  { %7536 = vtanh.f32 %v5258_v25 }
 0xa31   :  { %v7535_v38 = vpop.eup %7534 }
 0xa32   :  { %v5261_v20 = vmul.f32 0.5, %v7535_v38 }
 0xa33   :  { %v7537_v30 = vpop.eup %7536 }
 0xa34   :  { %v5262_v4 = vadd.f32 0.5, %v5261_v20  ;;  %v5263_v6 = vmul.f32 0.5, %v7537_v30  ;;  %v5367_v20 = vld [vmem:[%s12449_s10] sm:$0x3] }
 0xa36   :  { %v5269_v31 = vmul.f32 %v7537_v30, %v5262_v4  ;;  %v5268_v13 = vmul.f32 %v5266_v18, %v5262_v4  ;;  %v5264_v23 = vadd.f32 0.5, %v5263_v6  ;;  %v5372_v18 = vrot.slane %v5367_v20, %v13108_v11 }
 0xa37   :  { %v5376_v4 = vrot.slane %v5367_v20, %v13109_v1 }
 0xa38   :  { %5271 = vrot.lane.b32.xlu0 %v5269_v31, %s7886_s7 }
 0xaaa   :  { %v5272_v63 = vpop.permute.xlu0 %5271 }
 0xaab   :  { %v5274_v0 = vadd.f32 %v5272_v63, %v5268_v13 }
 0xaad   :  { %7538 = vtanh.f32 %v5274_v0  ;;  %v5341_v15 = vrot.slane %v5274_v0, 6 }
 0xaba   :  { %v7539_v7 = vpop.eup %7538 }
 0xabb   :  { %v5276_v56 = vmul.f32 %v7539_v7, %v5264_v23 }
 0xabd   :  { %v5277_v44 = vpack.c.bf16 %v5276_v56, %v5276_v56  ;;  %v12269_v60 = vsel %vm5354_vm1, %v5353_v58, %v5276_v56 }
 0xabf   :  { %v5279_v14 = vrot.slane %v5277_v44, 2 }
 0xac1   :  { %5280 = vrot.lane.b32.xlu1 %v5279_v14, %s7886_s7 }
 0xb33   :  { %v5281_v37 = vpop.permute.xlu1 %5280 }
 0xb34   :  { %6525 = vmatmul.mubr.msk.bf16.vlgmr.msra.gmra.mxu1 %vm4974_vm15, %v5281_v37 }
 0xb35   :  { %5546 = vmatprep.mubr.bf16.mxu1 %v7885_v21 }
 0xbf4   :  { %v5319_v12 = vpop.f32.mrf.mxu1 }
 0xbf5   :  { %v5328_v10 = vrot.slane %v5319_v12, 2 }
 0xbf6   :  { %v5321_v19 = vpop.f32.mrf.mxu1 }
 0xbf7   :  { %v5332_v52 = vadd.f32 %v5328_v10, %v12238_v45  ;;  %v5329_v57 = vrot.slane %v5321_v19, 2  ;;  %v12280_v45 = vld [vmem:[%s12448_s9 + $0x34] ss:$8 sps:$4 sm:$0xff]  }
 0xbf8   :  { %v5323_v5 = vpop.f32.mrf.mxu1  ;;  %5522 = vmatprep.subr.bf16.mxu1 %v12280_v45  ;;  %5587 = vmatprep.subr.bf16.mxu0 %v12280_v45 }
 0xbf9   :  { %7540 = vtanh.f32 %v5332_v52  ;;  %v5333_v41 = vadd.f32 %v5329_v57, %v12240_v32  ;;  %v12285_v32 = vld [vmem:[%s12448_s9 + $0x30] ss:$8 sps:$4 sm:$0xff]  }
 0xbfa   :  { %v5324_v49 = vpop.f32.mrf.mxu1  ;;  %5523 = vmatpush1.bf16.msra.mxu1 %v12285_v32 }
 0xbfb   :  { %7542 = vtanh.f32 %v5333_v41  ;;  %5524 = vmatprep.subr.bf16.mxu1 %v12296_v39 }
 0xbfe   :  { %5525 = vmatpush1.bf16.msra.mxu1 %v12306_v43 }
 0xbff   :  { %5526 = vmatprep.subr.bf16.mxu1 %v12315_v61 }
 0xc02   :  { %5527 = vmatpush1.bf16.msra.mxu1 %v12324_v33 }
 0xc03   :  { %5528 = vmatprep.subr.bf16.mxu1 %v12333_v50 }
 0xc06   :  { %v7541_v3 = vpop.eup %7540  ;;  %5529 = vmatpush1.bf16.msra.mxu1 %v12342_v42 }
 0xc07   :  { %v5336_v62 = vmul.f32 0.5, %v7541_v3  ;;  %5662 = vmatprep.subr.bf16.mxu1 %v12280_v45 }
 0xc08   :  { %v7543_v51 = vpop.eup %7542 }
 0xc09   :  { %v5337_v17 = vadd.f32 0.5, %v5336_v62  ;;  %5547 = vmatmul.mubr.bf16.vlgmr.msra.gmra.mxu1 %v7885_v21  ;;  %v5338_v36 = vmul.f32 0.5, %v7543_v51 }
 0xc0a   :  { %5663 = vmatpush1.bf16.msra.mxu1 %v12285_v32  ;;  %5686 = vmatprep.mubr.bf16.mxu1 %v7885_v21 }
 0xc0b   :  { %v5344_v16 = vmul.f32 %v7543_v51, %v5337_v17  ;;  %v5343_v40 = vmul.f32 %v5341_v15, %v5337_v17  ;;  %5664 = vmatprep.subr.bf16.mxu1 %v12296_v39  ;;  %v5339_v2 = vadd.f32 0.5, %v5338_v36 }
 0xc0d   :  { %5346 = vrot.lane.b32.xlu0 %v5344_v16, %s7886_s7 }
 0xc0e   :  { %5665 = vmatpush1.bf16.msra.mxu1 %v12306_v43 }
 0xc0f   :  { %5666 = vmatprep.subr.bf16.mxu1 %v12315_v61 }
 0xc12   :  { %5667 = vmatpush1.bf16.msra.mxu1 %v12324_v33 }
 0xc13   :  { %5668 = vmatprep.subr.bf16.mxu1 %v12333_v50 }
 0xc16   :  { %5669 = vmatpush1.bf16.msra.mxu1 %v12342_v42 }
 0xc7f   :  { %v5347_v59 = vpop.permute.xlu0 %5346 }
 0xc80   :  { %v5349_v24 = vadd.f32 %v5347_v59, %v5343_v40 }
 0xc82   :  { %7544 = vtanh.f32 %v5349_v24 }
 0xc8f   :  { %v7545_v53 = vpop.eup %7544 }
 0xc90   :  { %v5351_v55 = vmul.f32 %v7545_v53, %v5339_v2 }
 0xc92   :  { %v5357_v22 = vsel %vm5356_vm2, %v12269_v60, %v5351_v55 }
 0xc93   :  { %v5358_v28 = vpack.c.bf16 %v5357_v22, %v5357_v22 }
 0xc95   :  { %5380 = vrot.lane.b32.xlu1 %v5358_v28, %s7886_s7 }
 0xcc9   :  { %v5548_v35 = vpop.f32.mrf.mxu1 }
 0xccb   :  { %v5550_v26 = vpop.f32.mrf.mxu1 }
 0xccd   :  { %v5552_v25 = vpop.f32.mrf.mxu1 }
 0xccf   :  { %v5553_v8 = vpop.f32.mrf.mxu1 }
 0xd07   :  { %v5381_v38 = vpop.permute.xlu1 %5380 }
 0xd08   :  { %6534 = vmatmul.mubr.msk.bf16.vlgmr.msra.gmra.mxu0 %vm4974_vm15, %v5381_v38 }
 0xd09   :  { %5588 = vmatpush1.bf16.msra.mxu0 %v12285_v32  ;;  %5611 = vmatprep.mubr.bf16.mxu0 %v7885_v21 }
 0xd0a   :  { %5589 = vmatprep.subr.bf16.mxu0 %v12296_v39 }
 0xd0d   :  { %5590 = vmatpush1.bf16.msra.mxu0 %v12306_v43 }
 0xd0e   :  { %5591 = vmatprep.subr.bf16.mxu0 %v12315_v61 }
 0xd11   :  { %5592 = vmatpush1.bf16.msra.mxu0 %v12324_v33 }
 0xd12   :  { %5593 = vmatprep.subr.bf16.mxu0 %v12333_v50 }
 0xd15   :  { %5594 = vmatpush1.bf16.msra.mxu0 %v12342_v42 }
 0xd16   :  { %5737 = vmatprep.subr.bf16.mxu0 %v12280_v45 }
 0xdc8   :  { %v5459_v30 = vpop.f32.mrf.mxu0 }
 0xdc9   :  { %v12377_v31 = vadd.f32 %v5459_v30, %v5372_v18 }
 0xdca   :  { %v5461_v13 = vpop.f32.mrf.mxu0 }
 0xdcb   :  { %v5555_v63 = vadd.f32 %v5548_v35, %v12377_v31  ;;  %v12380_v0 = vadd.f32 %v5461_v13, %v5376_v4 }
 0xdcc   :  { %v5463_v6 = vpop.f32.mrf.mxu0 }
 0xdcd   :  { %7546 = vtanh.f32 %v5555_v63  ;;  %v5556_v23 = vadd.f32 %v5550_v26, %v12380_v0 }
 0xdce   :  { %v5464_v7 = vpop.f32.mrf.mxu0 }
 0xdcf   :  { %7548 = vtanh.f32 %v5556_v23 }
 0xdda   :  { %v7547_v56 = vpop.eup %7546 }
 0xddb   :  { %v5559_v58 = vmul.f32 0.5, %v7547_v56 }
 0xddc   :  { %v7549_v11 = vpop.eup %7548 }
 0xddd   :  { %v5560_v44 = vadd.f32 0.5, %v5559_v58  ;;  %v5561_v12 = vmul.f32 0.5, %v7549_v11 }
 0xddf   :  { %v5564_v60 = vmul.f32 %v7549_v11, %v5560_v44  ;;  %v5563_v1 = vmul.f32 0.0, %v5560_v44  ;;  %v5562_v10 = vadd.f32 0.5, %v5561_v12 }
 0xde1   :  { %5566 = vrot.lane.b32.xlu0 %v5564_v60, %s7886_s7 }
 0xe53   :  { %v5567_v14 = vpop.permute.xlu0 %5566 }
 0xe54   :  { %v5569_v37 = vadd.f32 %v5567_v14, %v5563_v1 }
 0xe56   :  { %7550 = vtanh.f32 %v5569_v37  ;;  %v5635_v45 = vrot.slane %v5569_v37, 6 }
 0xe63   :  { %v7551_v19 = vpop.eup %7550 }
 0xe64   :  { %v5571_v52 = vmul.f32 %v7551_v19, %v5562_v10 }
 0xe66   :  { %v5572_v57 = vpack.c.bf16 %v5571_v52, %v5571_v52 }
 0xe68   :  { %5574 = vrot.lane.b32.xlu1 %v5572_v57, %s7886_s7 }
 0xeda   :  { %v5575_v5 = vpop.permute.xlu1 %5574 }
 0xedb   :  { %6543 = vmatmul.mubr.msk.bf16.vlgmr.msra.gmra.mxu0 %vm4974_vm15, %v5575_v5 }
 0xedc   :  { %5738 = vmatpush1.bf16.msra.mxu0 %v12285_v32  ;;  %5761 = vmatprep.mubr.bf16.mxu0 %v7885_v21 }
 0xedd   :  { %5739 = vmatprep.subr.bf16.mxu0 %v12296_v39 }
 0xee0   :  { %5740 = vmatpush1.bf16.msra.mxu0 %v12306_v43 }
 0xee1   :  { %5741 = vmatprep.subr.bf16.mxu0 %v12315_v61 }
 0xee4   :  { %5742 = vmatpush1.bf16.msra.mxu0 %v12324_v33 }
 0xee5   :  { %5743 = vmatprep.subr.bf16.mxu0 %v12333_v50 }
 0xee8   :  { %5744 = vmatpush1.bf16.msra.mxu0 %v12342_v42 }
 0xf9b   :  { %v5613_v41 = vpop.f32.mrf.mxu0 }
 0xf9c   :  { %v5622_v49 = vrot.slane %v5613_v41, 6 }
 0xf9d   :  { %v5615_v3 = vpop.f32.mrf.mxu0 }
 0xf9e   :  { %v5626_v62 = vadd.f32 %v5622_v49, %v12377_v31  ;;  %v5623_v15 = vrot.slane %v5615_v3, 6  ;;  %v7887_v49 = vmov 0.0   ;;  %v5801_v3 = vld [vmem:[%s12450_s11 + $0x28] sm:$0xff] }
 0xf9f   :  { %v5617_v17 = vpop.f32.mrf.mxu0  ;;  %6777 = vmatprep.subr.mxu1 %v7887_v49 }
 0xfa0   :  { %7552 = vtanh.f32 %v5626_v62  ;;  %v5627_v21 = vadd.f32 %v5623_v15, %v12380_v0  ;;  %v5800_v62 = vld [vmem:[%s12450_s11 + $0x20] sm:$0xff]  ;;  %v5799_v15 = vld [vmem:[%s12450_s11 + $0x18] sm:$0xff]  ;;  %v5798_v17 = vld [vmem:[%s12450_s11 + $0x10] sm:$0xff] }
 0xfa1   :  { %v5618_v51 = vpop.f32.mrf.mxu0 }
 0xfa2   :  { %7554 = vtanh.f32 %v5627_v21  ;;  %v5797_v21 = vld [vmem:[%s12450_s11 + $0x8] sm:$0xff]  ;;  %v5796_v51 = vld [vmem:[%s12450_s11] sm:$0xff] }
 0xfad   :  { %v7553_v16 = vpop.eup %7552 }
 0xfae   :  { %v5630_v40 = vmul.f32 0.5, %v7553_v16 }
 0xfaf   :  { %v7555_v54 = vpop.eup %7554 }
 0xfb0   :  { %v5631_v32 = vadd.f32 0.5, %v5630_v40  ;;  %v5632_v47 = vmul.f32 0.5, %v7555_v54 }
 0xfb2   :  { %v5638_v29 = vmul.f32 %v7555_v54, %v5631_v32  ;;  %v5637_v39 = vmul.f32 %v5635_v45, %v5631_v32  ;;  %v5633_v61 = vadd.f32 0.5, %v5632_v47 }
 0xfb4   :  { %5640 = vrot.lane.b32.xlu0 %v5638_v29, %s7886_s7 }
0x1026   :  { %v5641_v48 = vpop.permute.xlu0 %5640 }
0x1027   :  { %v5643_v43 = vadd.f32 %v5641_v48, %v5637_v39 }
0x1029   :  { %7556 = vtanh.f32 %v5643_v43  ;;  %v5710_v35 = vrot.slane %v5643_v43, 6  ;;  %v6546_v43 = vld [vmem:[%s12451_s12] ss:$0 sm:$0xff] }
0x1036   :  { %v7557_v46 = vpop.eup %7556 }
0x1037   :  { %v5645_v33 = vmul.f32 %v7557_v46, %v5633_v61 }
0x1039   :  { %v5646_v34 = vpack.c.bf16 %v5645_v33, %v5645_v33 }
0x103b   :  { %v5648_v50 = vrot.slane %v5646_v34, 1 }
0x103d   :  { %5649 = vrot.lane.b32.xlu1 %v5648_v50, %s7886_s7 }
0x10af   :  { %v5650_v27 = vpop.permute.xlu1 %5649 }
0x10b0   :  { %6544 = vmatmul.mubr.msk.bf16.vlgmr.msra.gmra.mxu1 %vm4974_vm15, %v5650_v27 }
0x10b1   :  { %6793 = vmatprep.mubr.msk.f32.mxu1 %vm7888_vm3, %v7887_v49 }
0x1170   :  { %v5688_v42 = vpop.f32.mrf.mxu1 }
0x1171   :  { %v5697_v9 = vrot.slane %v5688_v42, 4 }
0x1172   :  { %v5690_v59 = vpop.f32.mrf.mxu1 }
0x1173   :  { %v5701_v24 = vadd.f32 %v5697_v9, %v12377_v31  ;;  %v5698_v36 = vrot.slane %v5690_v59, 4 }
0x1174   :  { %v5692_v2 = vpop.f32.mrf.mxu1 }
0x1175   :  { %7558 = vtanh.f32 %v5701_v24  ;;  %v5702_v53 = vadd.f32 %v5698_v36, %v12380_v0 }
0x1176   :  { %v5693_v55 = vpop.f32.mrf.mxu1 }
0x1177   :  { %7560 = vtanh.f32 %v5702_v53 }
0x1182   :  { %v7559_v22 = vpop.eup %7558 }
0x1183   :  { %v5705_v28 = vmul.f32 0.5, %v7559_v22 }
0x1184   :  { %v7561_v25 = vpop.eup %7560 }
0x1185   :  { %v5706_v26 = vadd.f32 0.5, %v5705_v28  ;;  %v5707_v4 = vmul.f32 0.5, %v7561_v25 }
0x1187   :  { %v5713_v8 = vmul.f32 %v7561_v25, %v5706_v26  ;;  %v5712_v38 = vmul.f32 %v5710_v35, %v5706_v26  ;;  %v5708_v30 = vadd.f32 0.5, %v5707_v4 }
0x1189   :  { %5715 = vrot.lane.b32.xlu0 %v5713_v8, %s7886_s7 }
0x11fb   :  { %v5716_v20 = vpop.permute.xlu0 %5715 }
0x11fc   :  { %v5718_v18 = vadd.f32 %v5716_v20, %v5712_v38 }
0x11fe   :  { %7562 = vtanh.f32 %v5718_v18  ;;  %v5785_v19 = vrot.slane %v5718_v18, 6 }
0x120b   :  { %v7563_v13 = vpop.eup %7562 }
0x120c   :  { %v5720_v63 = vmul.f32 %v7563_v13, %v5708_v30 }
0x120e   :  { %v5721_v6 = vpack.c.bf16 %v5720_v63, %v5720_v63 }
0x1210   :  { %v5723_v23 = vrot.slane %v5721_v6, 2 }
0x1212   :  { %5724 = vrot.lane.b32.xlu1 %v5723_v23, %s7886_s7 }
0x1284   :  { %v5725_v7 = vpop.permute.xlu1 %5724 }
0x1285   :  { %6545 = vmatmul.mubr.msk.bf16.vlgmr.msra.gmra.mxu0 %vm4974_vm15, %v5725_v7 }
0x1345   :  { %v5763_v56 = vpop.f32.mrf.mxu0 }
0x1346   :  { %v5772_v58 = vrot.slane %v5763_v56, 2 }
0x1347   :  { %v5765_v44 = vpop.f32.mrf.mxu0 }
0x1348   :  { %v5776_v11 = vadd.f32 %v5772_v58, %v12377_v31  ;;  %v5773_v60 = vrot.slane %v5765_v44, 2  ;;  %v5803_v31 = vld [vmem:[%s12450_s11 + $0x38] sm:$0xff] }
0x1349   :  { %v5767_v1 = vpop.f32.mrf.mxu0  ;;  %6778 = vmatpush3.msra.mxu1 %v5803_v31 }
0x134a   :  { %7564 = vtanh.f32 %v5776_v11  ;;  %v5777_v14 = vadd.f32 %v5773_v60, %v12380_v0  ;;  %v5802_v0 = vld [vmem:[%s12450_s11 + $0x30] sm:$0xff]  ;;  %6779 = vmatprep.subr.mxu1 %v7887_v49  ;;  %s7889_s11 = smov [#allocation2]  }
0x134b   :  { %v5768_v37 = vpop.f32.mrf.mxu0  ;;  %6780 = vmatpush3.msra.mxu1 %v5802_v0  ;;  %s5895_s17 = sshll.u32 %s7889_s11, 4  ;;  %s5896_s17 = int_to_ptr.vmem [resolvable:$true] %s5895_s17 }
0x134c   :  { %7566 = vtanh.f32 %v5777_v14  ;;  %6781 = vmatprep.subr.mxu1 %v7887_v49  ;;  %s7858_s18 = scalar_lea.vmem %s5896_s17, 32  ;;  %p7863_p1 = scmp.lt.s32.totalorder %s5896_s17, %s5896_s17 }
0x134d   :  { %6782 = vmatpush3.msra.mxu1 %v5801_v3  ;;  %p7859_p0 = scmp.ne.s32.totalorder %s5896_s17, %s7858_s18  ;;  %p7864_p2 = scmp.lt.s32.totalorder %s7858_s18, %s7858_s18 }
0x134e   :  { %6783 = vmatprep.subr.mxu1 %v7887_v49 }
0x134f   :  { %6784 = vmatpush3.msra.mxu1 %v5800_v62  ;;  %p7865_p3 = por %p7864_p2, %p7863_p1 }
0x1350   :  { %6785 = vmatprep.subr.mxu1 %v7887_v49 }
0x1351   :  { %6786 = vmatpush3.msra.mxu1 %v5799_v15  ;;  %p7866_p4 = pnand %p7865_p3, %p7859_p0 }
0x1352   :  { %6787 = vmatprep.subr.mxu1 %v7887_v49 }
0x1353   :  { %6788 = vmatpush3.msra.mxu1 %v5798_v17 }
0x1354   :  { %6789 = vmatprep.subr.mxu1 %v7887_v49 }
0x1355   :  { %6790 = vmatpush3.msra.mxu1 %v5797_v21 }
0x1356   :  { %6791 = vmatprep.subr.mxu1 %v7887_v49 }
0x1357   :  { %v7565_v12 = vpop.eup %7564  ;;  %6792 = vmatpush3.msra.mxu1 %v5796_v51 }
0x1358   :  { %v5780_v10 = vmul.f32 0.5, %v7565_v12 }
0x1359   :  { %v7567_v57 = vpop.eup %7566 }
0x135a   :  { %v5781_v52 = vadd.f32 0.5, %v5780_v10  ;;  %v5782_v45 = vmul.f32 0.5, %v7567_v57 }
0x135c   :  { %v5788_v5 = vmul.f32 %v7567_v57, %v5781_v52  ;;  %v5787_v41 = vmul.f32 %v5785_v19, %v5781_v52  ;;  %v5783_v32 = vadd.f32 0.5, %v5782_v45 }
0x135e   :  { %5790 = vrot.lane.b32.xlu0 %v5788_v5, %s7886_s7 }
0x13d0   :  { %v5791_v16 = vpop.permute.xlu0 %5790 }
0x13d1   :  { %v5793_v40 = vadd.f32 %v5791_v16, %v5787_v41 }
0x13d3   :  { %7568 = vtanh.f32 %v5793_v40 }
0x13e0   :  { %v7569_v54 = vpop.eup %7568 }
0x13e1   :  { %v5795_v29 = vmul.f32 %v7569_v54, %v5783_v32 }
0x13e3   :  { %v5812_v39 = vrot.slane %v5795_v29, 6 }
0x13e5   :  { %5813 = vrot.lane.b32.xlu1 %v5812_v39, %s7886_s7 }
0x1457   :  { %v5814_v48 = vpop.permute.xlu1 %5813 }
0x1458   :  { %6794 = vmatmul.mubr.msk.f32.vlgmr.msra.gmra.mxu1 %vm4974_vm15, %v5814_v48 }
0x1518   :  { %v5883_v47 = vpop.f32.mrf.mxu1 }
0x1519   :  { %v5884_v61 = vadd.f32 %v6546_v43, %v5883_v47 }
0x151a   :  { %v6795_v46 = vpop.f32.mrf.mxu1 }
0x151b   :  { %5888 = vst.msk [vmem:[#allocation2] sm:$0x3] %vm5887_vm4, %v5884_v61 }
0x151c   :  { %7869 = shalt.err (!%p7866_p4)
}
0x151d   :  { %5898 = dma.vmem_to_hbm [thread:$0]  %s5896_s17, 32, %s12452_s13, [#allocation3]  }
0x151e   :  { %7878 = dma.done.wait [#allocation3], 32  }
0x151f   :  { %7879 = vsyncadd [#allocation3], 4294967264 }
0x1520   :  { %5902 = vsyncpa [#allocation3], 1 }

</bundles_post_ra>
